<compile_context>
chip_gen: v7x
topology: tpu7x:2x2x1
jax: 0.10.0
libtpu: 0.0.40
codegen_flags: <defaults>
</compile_context>

<pallas_src>
import functools

import jax
import jax.numpy as jnp
from jax import lax
from jax.experimental import pallas as pl
from jax.experimental.pallas import tpu as pltpu


# ----------------------------------------------------------------------------
# Fused 3x3, stride-1 convolution Pallas kernel (the hot path)
# ----------------------------------------------------------------------------
def _conv3x3_kernel(x_ref, w_ref, b_ref, o_ref, *, th, ow, cin, cout):
    """x_ref: (1, Hp, Wp, Cin) padded image (resident in VMEM across row tiles).
    w_ref: (9, Cin, Cout) per-tap weight matrices (bf16).
    b_ref: (1, Cout) f32 bias.
    o_ref: (1, th, ow, Cout) output row tile."""
    r = pl.program_id(1)
    row0 = r * th                       # output row tile == input row offset (stride 1)
    acc = jnp.zeros((th * ow, cout), jnp.float32)
    for t in range(9):                  # static unroll over the 9 taps (fused im2col)
        dy, dx = divmod(t, 3)
        a = x_ref[0, pl.ds(row0 + dy, th), pl.ds(dx, ow), :]      # (th, ow, cin)
        acc = acc + jnp.dot(a.reshape(th * ow, cin), w_ref[t],
                            preferred_element_type=jnp.float32)
    acc = acc + b_ref[...]
    o_ref[...] = acc.reshape(1, th, ow, cout).astype(o_ref.dtype)


def _pallas_conv3x3_s1(x, w_hwio, b, out_dtype):
    """x: (N, H, W, Cin).  w_hwio: (3, 3, Cin, Cout).  stride=1, padding=1."""
    n, h, wd, cin = x.shape
    cout = w_hwio.shape[-1]
    oh, ow = h, wd

    xp = jnp.pad(x.astype(jnp.bfloat16),
                 ((0, 0), (1, 1), (1, 1), (0, 0)))      # halo pad only, no im2col slab
    hp, wp = h + 2, wd + 2
    wt = w_hwio.astype(jnp.bfloat16).reshape(9, cin, cout)
    b2 = b.astype(jnp.float32).reshape(1, cout)

    # Row-tile height: target ~1024-row GEMM tiles (review: TM toward 1024).
    th = min(oh, max(8, 1024 // ow))
    while oh % th:
        th //= 2
    grid = (n, oh // th)

    flops = 2 * n * oh * ow * 9 * cin * cout
    bytes_accessed = int(xp.size * 2 + wt.size * 2 + n * oh * ow * cout * 2)

    kernel = functools.partial(_conv3x3_kernel, th=th, ow=ow, cin=cin, cout=cout)
    return pl.pallas_call(
        kernel,
        out_shape=jax.ShapeDtypeStruct((n, oh, ow, cout), out_dtype),
        grid_spec=pltpu.PrefetchScalarGridSpec(
            num_scalar_prefetch=0,
            grid=grid,
            in_specs=[
                # Whole padded image per n; block index constant across row tiles,
                # so it is DMA'd once per image and stays VMEM-resident.
                pl.BlockSpec((1, hp, wp, cin), lambda i, r: (i, 0, 0, 0)),
                pl.BlockSpec((9, cin, cout), lambda i, r: (0, 0, 0)),
                pl.BlockSpec((1, cout), lambda i, r: (0, 0)),
            ],
            out_specs=pl.BlockSpec((1, th, ow, cout), lambda i, r: (i, r, 0, 0)),
        ),
        compiler_params=pltpu.CompilerParams(
            dimension_semantics=("parallel", "parallel")),
        cost_estimate=pl.CostEstimate(flops=flops, transcendentals=0,
                                      bytes_accessed=bytes_accessed),
    )(xp, wt, b2)


# ----------------------------------------------------------------------------
# Convolution dispatch: Pallas for the heavy stride-1 3x3 convs, XLA otherwise
# ----------------------------------------------------------------------------
def conv2d_hwio(x, w_hwio, b, stride, padding, out_dtype=jnp.bfloat16):
    """x: NHWC (any float dtype).  w_hwio: (KH, KW, Cin, Cout).  -> NHWC out_dtype."""
    n, h, wd, cin = x.shape
    kh, kw, _, cout = w_hwio.shape
    oh = (h + 2 * padding - kh) // stride + 1
    ow = (wd + 2 * padding - kw) // stride + 1

    xb = x.astype(jnp.bfloat16)
    wb = w_hwio.astype(jnp.bfloat16)

    # Pallas only where it pays off (review: route tiny GEMMs to XLA).
    use_pallas = (stride == 1 and kh == 3 and kw == 3 and padding == 1
                  and n * oh * ow >= 512 and cout >= 16 and cin >= 32
                  and oh % 8 == 0 and ow % 8 == 0)
    if use_pallas:
        return _pallas_conv3x3_s1(xb, wb, b, out_dtype)

    # TODO(synk): the stride-2 encoder 3x3 convs could also be fused in Pallas
    # (strided pl.ds reads of the VMEM-resident image); they are small here.
    out = lax.conv_general_dilated(
        xb, wb, window_strides=(stride, stride),
        padding=((padding, padding), (padding, padding)),
        dimension_numbers=("NHWC", "HWIO", "NHWC"),
        preferred_element_type=jnp.float32)
    return (out + b.astype(jnp.float32)).astype(out_dtype)


def conv2d(x, w, b, stride, padding, out_dtype=jnp.bfloat16):
    """w in torch layout (Cout, Cin, KH, KW)."""
    return conv2d_hwio(x, jnp.transpose(w, (2, 3, 1, 0)), b, stride, padding,
                       out_dtype)


# ----------------------------------------------------------------------------
# Norm / activation / upsample glue (plain XLA, fuses around the conv kernels)
# ----------------------------------------------------------------------------
def batchnorm(x, gamma, beta, eps=1e-5):
    # PyTorch default training-mode BN: batch statistics over (N, H, W).
    # Conv write-back is bf16; statistics are computed in f32.
    # TODO(synk): emit per-channel sum / sum-of-squares as side outputs of the
    # conv kernel so BN stats do not require re-reading the activation.
    x = x.astype(jnp.float32)
    mean = jnp.mean(x, axis=(0, 1, 2), keepdims=True)
    var = jnp.mean(jnp.square(x - mean), axis=(0, 1, 2), keepdims=True)
    return (x - mean) * lax.rsqrt(var + eps) * gamma + beta


def relu(x):
    return jnp.maximum(x, 0.0)          # reluType='normal'


def upsample_nearest2x(x):
    return jnp.repeat(jnp.repeat(x, 2, axis=1), 2, axis=2)


# ----------------------------------------------------------------------------
# UpsampleConvolution: sub-pixel (phase-packed) decomposition
#   conv3x3_pad1(nearest_up2(x)) == pixel_shuffle2(conv3x3_pad1(x; packed w))
# so the 2x-upsampled activation is never materialized in HBM.
# ----------------------------------------------------------------------------
def _pack_upsample3x3_weights(w):
    """w: torch (Cout, Cin, 3, 3) -> (3, 3, Cin, 4*Cout) phase-packed weights.

    For output phase parity p along an axis, the three high-res taps collapse
    onto low-res offsets {-1, 0, +1}:
        p=0: tap0 -> -1,  taps 1,2 -> 0       p=1: taps 0,1 -> 0,  tap2 -> +1
    """
    cout, cin = w.shape[0], w.shape[1]
    w_hwio = jnp.transpose(w, (2, 3, 1, 0)).astype(jnp.float32)   # (ky, kx, Cin, Cout)
    m = (jnp.array([[1., 0., 0.], [0., 1., 1.], [0., 0., 0.]], jnp.float32),
         jnp.array([[0., 0., 0.], [1., 1., 0.], [0., 0., 1.]], jnp.float32))
    phases = [jnp.einsum('ak,bl,klio->abio', m[py], m[px], w_hwio)
              for py in range(2) for px in range(2)]
    return jnp.stack(phases, axis=3).reshape(3, 3, cin, 4 * cout)


def _pixel_shuffle2(y, cout):
    """(N, H, W, 4*Cout) phase-major -> (N, 2H, 2W, Cout)."""
    n, h, wd, _ = y.shape
    y = y.reshape(n, h, wd, 2, 2, cout)
    y = jnp.transpose(y, (0, 1, 3, 2, 4, 5))
    return y.reshape(n, 2 * h, 2 * wd, cout)


def upsample_conv3x3(x, w, b):
    """blocks.UpsampleConvolution(scale=2, k=3, s=1, p=1), computed at low res."""
    cout = w.shape[0]
    y = conv2d_hwio(x, _pack_upsample3x3_weights(w), jnp.tile(b, 4),
                    stride=1, padding=1)
    return _pixel_shuffle2(y, cout)


def upsample_conv1x1(x, w, b):
    """blocks.UpsampleConvolution(scale=2, k=1, s=1, p=0): 1x1 conv commutes
    with nearest upsample, so the matmul runs at quarter resolution."""
    return upsample_nearest2x(conv2d(x, w, b, stride=1, padding=0))


# ----------------------------------------------------------------------------
# Blocks
# ----------------------------------------------------------------------------
def conv_res_block(x, p):
    out_skip = conv2d(x, p['conv1_1_w'], p['conv1_1_b'], stride=2, padding=0)
    out = conv2d(x, p['conv3_1_w'], p['conv3_1_b'], stride=2, padding=1)
    out = relu(batchnorm(out, p['bn1_g'], p['bn1_b']))
    out = conv2d(out, p['conv3_2_w'], p['conv3_2_b'], stride=1, padding=1)
    out = out + out_skip
    return relu(batchnorm(out, p['bn2_g'], p['bn2_b']))


def deconv_res_block(x, p):
    out_skip = upsample_conv1x1(x, p['conv1_1_w'], p['conv1_1_b'])
    out = upsample_conv3x3(x, p['conv3_1_w'], p['conv3_1_b'])
    out = relu(batchnorm(out, p['bn1_g'], p['bn1_b']))
    out = conv2d(out, p['conv3_2_w'], p['conv3_2_b'], stride=1, padding=1)
    out = out + out_skip
    return relu(batchnorm(out, p['bn2_g'], p['bn2_b']))


def squeeze_excitation_block(x, p):
    # NB: the reference builds nn.BatchNorm2d(out_c, out_c), i.e. the second
    # positional argument (eps) equals out_channels = 320.  Replicated faithfully.
    se_eps = 320.0
    out_skip = conv2d(x, p['conv_skip_w'], p['conv_skip_b'], stride=1, padding=0)
    out = conv2d(x, p['conv3_1_w'], p['conv3_1_b'], stride=1, padding=1)
    out = relu(batchnorm(out, p['bn1_g'], p['bn1_b'], eps=se_eps))
    out = conv2d(out, p['conv3_2_w'], p['conv3_2_b'], stride=1, padding=1)
    out = out + out_skip
    out_after_residual = relu(batchnorm(out, p['bn2_g'], p['bn2_b'], eps=se_eps))
    pooled = jnp.mean(out_after_residual, axis=(1, 2))             # (N, C) f32
    # M=2 GEMVs: plain XLA is far cheaper than a padded MXU kernel launch.
    h = relu(pooled @ p['lin1_w'].T + p['lin1_b'])
    h = h @ p['lin2_w'].T + p['lin2_b']
    s = jax.nn.sigmoid(h)
    return s[:, None, None, :] * out_after_residual


# ----------------------------------------------------------------------------
# Parameter construction (deterministic, synthetic)
# ----------------------------------------------------------------------------
def _winit(key, shape, scale=0.05):
    return jax.random.normal(key, shape, jnp.float32) * scale


def _conv_params(key, cout, cin, k):
    kw, kb = jax.random.split(key)
    return _winit(kw, (cout, cin, k, k)), _winit(kb, (cout,))


def _resblock_params(key, cin, cout):
    ks = jax.random.split(key, 3)
    p = {}
    p['conv1_1_w'], p['conv1_1_b'] = _conv_params(ks[0], cout, cin, 1)
    p['conv3_1_w'], p['conv3_1_b'] = _conv_params(ks[1], cout, cin, 3)
    p['conv3_2_w'], p['conv3_2_b'] = _conv_params(ks[2], cout, cout, 3)
    p['bn1_g'] = jnp.ones((cout,), jnp.float32)
    p['bn1_b'] = jnp.zeros((cout,), jnp.float32)
    p['bn2_g'] = jnp.ones((cout,), jnp.float32)
    p['bn2_b'] = jnp.zeros((cout,), jnp.float32)
    return p


def _se_params(key, cin, cout, rr=16):
    ks = jax.random.split(key, 5)
    p = {}
    p['conv_skip_w'], p['conv_skip_b'] = _conv_params(ks[0], cout, cin, 1)
    p['conv3_1_w'], p['conv3_1_b'] = _conv_params(ks[1], cout, cin, 3)
    p['conv3_2_w'], p['conv3_2_b'] = _conv_params(ks[2], cout, cout, 3)
    p['bn1_g'] = jnp.ones((cout,), jnp.float32)
    p['bn1_b'] = jnp.zeros((cout,), jnp.float32)
    p['bn2_g'] = jnp.ones((cout,), jnp.float32)
    p['bn2_b'] = jnp.zeros((cout,), jnp.float32)
    hid = cout // rr
    p['lin1_w'] = _winit(ks[3], (hid, cout))
    p['lin1_b'] = jnp.zeros((hid,), jnp.float32)
    p['lin2_w'] = _winit(ks[4], (cout, hid))
    p['lin2_b'] = jnp.zeros((cout,), jnp.float32)
    return p


def make_generator_params(key, in_channels, nf=64):
    ks = jax.random.split(key, 13)
    plan_enc = [(in_channels, nf), (nf, nf), (nf, 2 * nf),
                (2 * nf, 2 * nf), (2 * nf, 4 * nf), (4 * nf, 320)]
    plan_dec = [(320, 4 * nf), (4 * nf, 2 * nf), (2 * nf, 2 * nf),
                (2 * nf, nf), (nf, nf), (nf, in_channels)]
    params = {}
    for i, (ci, co) in enumerate(plan_enc):
        params[f'enc{i + 1}'] = _resblock_params(ks[i], ci, co)
    params['se'] = _se_params(ks[6], 320, 320, rr=16)
    for i, (ci, co) in enumerate(plan_dec):
        params[f'dec{6 - i}'] = _resblock_params(ks[7 + i], ci, co)
    return params


# ----------------------------------------------------------------------------
# Generator forward (input/output NCHW, matching the PyTorch module)
# ----------------------------------------------------------------------------
def generator_forward(params, x_nchw):
    x = jnp.transpose(x_nchw, (0, 2, 3, 1))  # -> NHWC
    out1 = conv_res_block(x, params['enc1'])
    out2 = conv_res_block(out1, params['enc2'])
    out3 = conv_res_block(out2, params['enc3'])
    out4 = conv_res_block(out3, params['enc4'])
    out5 = conv_res_block(out4, params['enc5'])
    out6 = conv_res_block(out5, params['enc6'])
    out = squeeze_excitation_block(out6, params['se'])
    out = deconv_res_block(out, params['dec6']) + out5
    out = deconv_res_block(out, params['dec5']) + out4
    out = deconv_res_block(out, params['dec4']) + out3
    out = deconv_res_block(out, params['dec3']) + out2
    out = deconv_res_block(out, params['dec2']) + out1
    out = deconv_res_block(out, params['dec1'])
    return jnp.transpose(out, (0, 3, 1, 2)).astype(jnp.float32)  # -> NCHW


if __name__ == "__main__":
    # ---- lightweight self-check of the fused Pallas conv against XLA ----
    k1, k2, k3 = jax.random.split(jax.random.PRNGKey(0), 3)
    xt = jax.random.normal(k1, (2, 16, 16, 64), jnp.float32)
    wt = jax.random.normal(k2, (3, 3, 64, 64), jnp.float32) * 0.05
    bt = jax.random.normal(k3, (64,), jnp.float32) * 0.05
    y_pallas = _pallas_conv3x3_s1(xt.astype(jnp.bfloat16),
                                  wt.astype(jnp.bfloat16), bt, jnp.float32)
    y_ref = lax.conv_general_dilated(
        xt.astype(jnp.bfloat16), wt.astype(jnp.bfloat16), (1, 1), ((1, 1), (1, 1)),
        dimension_numbers=("NHWC", "HWIO", "NHWC"),
        preferred_element_type=jnp.float32) + bt
    err = float(jnp.max(jnp.abs(y_pallas - y_ref)))
    assert err < 0.15, f"Pallas conv mismatch vs XLA reference: max abs err {err}"

    # ---- full Generator forward ----
    # Spatial size must survive 6 stride-2 halvings, so 64x64 is the minimum.
    B, C, H, W = 2, 3, 64, 64
    x = jax.random.normal(jax.random.PRNGKey(0), (B, C, H, W), jnp.float32)
    params = make_generator_params(jax.random.PRNGKey(42), in_channels=C)

    fwd = jax.jit(generator_forward)
    out = jax.block_until_ready(fwd(params, x))

    assert out.shape == (B, C, H, W), out.shape
    assert jnp.all(jnp.isfinite(out))
    print("KERNEL_OK")
</pallas_src>

<mosaic_0001>
module attributes {stable_mosaic.version = 11 : i64} {
  func.func @_conv3x3_kernel(%arg0: i32, %arg1: i32, %arg2: memref<1x18x18x64xbf16, #tpu.memory_space<vmem>>, %arg3: memref<9x64x64xbf16, #tpu.memory_space<vmem>>, %arg4: memref<1x64xf32, #tpu.memory_space<vmem>>, %arg5: memref<1x16x16x64xf32, #tpu.memory_space<vmem>>) attributes {dimension_semantics = [#tpu.dimension_semantics<parallel>, #tpu.dimension_semantics<parallel>], iteration_bounds = array<i64: 2, 1>, scalar_prefetch = 0 : i64, scratch_operands = 0 : i64, tpu.core_type = #tpu.core_type<tc>, window_params = [{transform_indices = @transform_0, window_bounds = array<i64: 1, 18, 18, 64>}, {pipeline_mode = #tpu.pipeline_mode<synchronous>, transform_indices = @transform_1, window_bounds = array<i64: 9, 64, 64>}, {pipeline_mode = #tpu.pipeline_mode<synchronous>, transform_indices = @transform_2, window_bounds = array<i64: 1, 64>}, {transform_indices = @transform_3, window_bounds = array<i64: 1, 16, 16, 64>}]} {
    %c16_i32 = arith.constant 16 : i32
    %0 = arith.muli %arg1, %c16_i32 : i32
    %cst = arith.constant 0.000000e+00 : f32
    %1 = vector.broadcast %cst : f32 to vector<256x64xf32>
    %c0_i32 = arith.constant 0 : i32
    %2 = arith.addi %0, %c0_i32 : i32
    %c0 = arith.constant 0 : index
    %3 = arith.index_cast %2 : i32 to index
    %c0_0 = arith.constant 0 : index
    %c0_1 = arith.constant 0 : index
    %4 = vector.load %arg2[%c0, %3, %c0_0, %c0_1] : memref<1x18x18x64xbf16, #tpu.memory_space<vmem>>, vector<1x16x16x64xbf16>
    %5 = vector.shape_cast %4 : vector<1x16x16x64xbf16> to vector<16x16x64xbf16>
    %6 = vector.shape_cast %5 : vector<16x16x64xbf16> to vector<256x64xbf16>
    %c0_2 = arith.constant 0 : index
    %c0_3 = arith.constant 0 : index
    %c0_4 = arith.constant 0 : index
    %7 = vector.load %arg3[%c0_2, %c0_3, %c0_4] : memref<9x64x64xbf16, #tpu.memory_space<vmem>>, vector<1x64x64xbf16>
    %8 = vector.shape_cast %7 : vector<1x64x64xbf16> to vector<64x64xbf16>
    %cst_5 = arith.constant dense<0.000000e+00> : vector<256x64xf32>
    %9 = tpu.matmul %6, %8, %cst_5 {dimension_numbers = #tpu.dot_dimension_numbers<[1], [0], [0], [1], [0, 0, 1, 1], [], []>} : vector<256x64xbf16>, vector<64x64xbf16>, vector<256x64xf32> -> vector<256x64xf32>
    %10 = arith.addf %1, %9 : vector<256x64xf32>
    %c0_i32_6 = arith.constant 0 : i32
    %11 = arith.addi %0, %c0_i32_6 : i32
    %c0_7 = arith.constant 0 : index
    %12 = arith.index_cast %11 : i32 to index
    %c1 = arith.constant 1 : index
    %c0_8 = arith.constant 0 : index
    %13 = vector.load %arg2[%c0_7, %12, %c1, %c0_8] : memref<1x18x18x64xbf16, #tpu.memory_space<vmem>>, vector<1x16x16x64xbf16>
    %14 = vector.shape_cast %13 : vector<1x16x16x64xbf16> to vector<16x16x64xbf16>
    %15 = vector.shape_cast %14 : vector<16x16x64xbf16> to vector<256x64xbf16>
    %c1_9 = arith.constant 1 : index
    %c0_10 = arith.constant 0 : index
    %c0_11 = arith.constant 0 : index
    %16 = vector.load %arg3[%c1_9, %c0_10, %c0_11] : memref<9x64x64xbf16, #tpu.memory_space<vmem>>, vector<1x64x64xbf16>
    %17 = vector.shape_cast %16 : vector<1x64x64xbf16> to vector<64x64xbf16>
    %cst_12 = arith.constant dense<0.000000e+00> : vector<256x64xf32>
    %18 = tpu.matmul %15, %17, %cst_12 {dimension_numbers = #tpu.dot_dimension_numbers<[1], [0], [0], [1], [0, 0, 1, 1], [], []>} : vector<256x64xbf16>, vector<64x64xbf16>, vector<256x64xf32> -> vector<256x64xf32>
    %19 = arith.addf %10, %18 : vector<256x64xf32>
    %c0_i32_13 = arith.constant 0 : i32
    %20 = arith.addi %0, %c0_i32_13 : i32
    %c0_14 = arith.constant 0 : index
    %21 = arith.index_cast %20 : i32 to index
    %c2 = arith.constant 2 : index
    %c0_15 = arith.constant 0 : index
    %22 = vector.load %arg2[%c0_14, %21, %c2, %c0_15] : memref<1x18x18x64xbf16, #tpu.memory_space<vmem>>, vector<1x16x16x64xbf16>
    %23 = vector.shape_cast %22 : vector<1x16x16x64xbf16> to vector<16x16x64xbf16>
    %24 = vector.shape_cast %23 : vector<16x16x64xbf16> to vector<256x64xbf16>
    %c2_16 = arith.constant 2 : index
    %c0_17 = arith.constant 0 : index
    %c0_18 = arith.constant 0 : index
    %25 = vector.load %arg3[%c2_16, %c0_17, %c0_18] : memref<9x64x64xbf16, #tpu.memory_space<vmem>>, vector<1x64x64xbf16>
    %26 = vector.shape_cast %25 : vector<1x64x64xbf16> to vector<64x64xbf16>
    %cst_19 = arith.constant dense<0.000000e+00> : vector<256x64xf32>
    %27 = tpu.matmul %24, %26, %cst_19 {dimension_numbers = #tpu.dot_dimension_numbers<[1], [0], [0], [1], [0, 0, 1, 1], [], []>} : vector<256x64xbf16>, vector<64x64xbf16>, vector<256x64xf32> -> vector<256x64xf32>
    %28 = arith.addf %19, %27 : vector<256x64xf32>
    %c1_i32 = arith.constant 1 : i32
    %29 = arith.addi %0, %c1_i32 : i32
    %c0_20 = arith.constant 0 : index
    %30 = arith.index_cast %29 : i32 to index
    %c0_21 = arith.constant 0 : index
    %c0_22 = arith.constant 0 : index
    %31 = vector.load %arg2[%c0_20, %30, %c0_21, %c0_22] : memref<1x18x18x64xbf16, #tpu.memory_space<vmem>>, vector<1x16x16x64xbf16>
    %32 = vector.shape_cast %31 : vector<1x16x16x64xbf16> to vector<16x16x64xbf16>
    %33 = vector.shape_cast %32 : vector<16x16x64xbf16> to vector<256x64xbf16>
    %c3 = arith.constant 3 : index
    %c0_23 = arith.constant 0 : index
    %c0_24 = arith.constant 0 : index
    %34 = vector.load %arg3[%c3, %c0_23, %c0_24] : memref<9x64x64xbf16, #tpu.memory_space<vmem>>, vector<1x64x64xbf16>
    %35 = vector.shape_cast %34 : vector<1x64x64xbf16> to vector<64x64xbf16>
    %cst_25 = arith.constant dense<0.000000e+00> : vector<256x64xf32>
    %36 = tpu.matmul %33, %35, %cst_25 {dimension_numbers = #tpu.dot_dimension_numbers<[1], [0], [0], [1], [0, 0, 1, 1], [], []>} : vector<256x64xbf16>, vector<64x64xbf16>, vector<256x64xf32> -> vector<256x64xf32>
    %37 = arith.addf %28, %36 : vector<256x64xf32>
    %c1_i32_26 = arith.constant 1 : i32
    %38 = arith.addi %0, %c1_i32_26 : i32
    %c0_27 = arith.constant 0 : index
    %39 = arith.index_cast %38 : i32 to index
    %c1_28 = arith.constant 1 : index
    %c0_29 = arith.constant 0 : index
    %40 = vector.load %arg2[%c0_27, %39, %c1_28, %c0_29] : memref<1x18x18x64xbf16, #tpu.memory_space<vmem>>, vector<1x16x16x64xbf16>
    %41 = vector.shape_cast %40 : vector<1x16x16x64xbf16> to vector<16x16x64xbf16>
    %42 = vector.shape_cast %41 : vector<16x16x64xbf16> to vector<256x64xbf16>
    %c4 = arith.constant 4 : index
    %c0_30 = arith.constant 0 : index
    %c0_31 = arith.constant 0 : index
    %43 = vector.load %arg3[%c4, %c0_30, %c0_31] : memref<9x64x64xbf16, #tpu.memory_space<vmem>>, vector<1x64x64xbf16>
    %44 = vector.shape_cast %43 : vector<1x64x64xbf16> to vector<64x64xbf16>
    %cst_32 = arith.constant dense<0.000000e+00> : vector<256x64xf32>
    %45 = tpu.matmul %42, %44, %cst_32 {dimension_numbers = #tpu.dot_dimension_numbers<[1], [0], [0], [1], [0, 0, 1, 1], [], []>} : vector<256x64xbf16>, vector<64x64xbf16>, vector<256x64xf32> -> vector<256x64xf32>
    %46 = arith.addf %37, %45 : vector<256x64xf32>
    %c1_i32_33 = arith.constant 1 : i32
    %47 = arith.addi %0, %c1_i32_33 : i32
    %c0_34 = arith.constant 0 : index
    %48 = arith.index_cast %47 : i32 to index
    %c2_35 = arith.constant 2 : index
    %c0_36 = arith.constant 0 : index
    %49 = vector.load %arg2[%c0_34, %48, %c2_35, %c0_36] : memref<1x18x18x64xbf16, #tpu.memory_space<vmem>>, vector<1x16x16x64xbf16>
    %50 = vector.shape_cast %49 : vector<1x16x16x64xbf16> to vector<16x16x64xbf16>
    %51 = vector.shape_cast %50 : vector<16x16x64xbf16> to vector<256x64xbf16>
    %c5 = arith.constant 5 : index
    %c0_37 = arith.constant 0 : index
    %c0_38 = arith.constant 0 : index
    %52 = vector.load %arg3[%c5, %c0_37, %c0_38] : memref<9x64x64xbf16, #tpu.memory_space<vmem>>, vector<1x64x64xbf16>
    %53 = vector.shape_cast %52 : vector<1x64x64xbf16> to vector<64x64xbf16>
    %cst_39 = arith.constant dense<0.000000e+00> : vector<256x64xf32>
    %54 = tpu.matmul %51, %53, %cst_39 {dimension_numbers = #tpu.dot_dimension_numbers<[1], [0], [0], [1], [0, 0, 1, 1], [], []>} : vector<256x64xbf16>, vector<64x64xbf16>, vector<256x64xf32> -> vector<256x64xf32>
    %55 = arith.addf %46, %54 : vector<256x64xf32>
    %c2_i32 = arith.constant 2 : i32
    %56 = arith.addi %0, %c2_i32 : i32
    %c0_40 = arith.constant 0 : index
    %57 = arith.index_cast %56 : i32 to index
    %c0_41 = arith.constant 0 : index
    %c0_42 = arith.constant 0 : index
    %58 = vector.load %arg2[%c0_40, %57, %c0_41, %c0_42] : memref<1x18x18x64xbf16, #tpu.memory_space<vmem>>, vector<1x16x16x64xbf16>
    %59 = vector.shape_cast %58 : vector<1x16x16x64xbf16> to vector<16x16x64xbf16>
    %60 = vector.shape_cast %59 : vector<16x16x64xbf16> to vector<256x64xbf16>
    %c6 = arith.constant 6 : index
    %c0_43 = arith.constant 0 : index
    %c0_44 = arith.constant 0 : index
    %61 = vector.load %arg3[%c6, %c0_43, %c0_44] : memref<9x64x64xbf16, #tpu.memory_space<vmem>>, vector<1x64x64xbf16>
    %62 = vector.shape_cast %61 : vector<1x64x64xbf16> to vector<64x64xbf16>
    %cst_45 = arith.constant dense<0.000000e+00> : vector<256x64xf32>
    %63 = tpu.matmul %60, %62, %cst_45 {dimension_numbers = #tpu.dot_dimension_numbers<[1], [0], [0], [1], [0, 0, 1, 1], [], []>} : vector<256x64xbf16>, vector<64x64xbf16>, vector<256x64xf32> -> vector<256x64xf32>
    %64 = arith.addf %55, %63 : vector<256x64xf32>
    %c2_i32_46 = arith.constant 2 : i32
    %65 = arith.addi %0, %c2_i32_46 : i32
    %c0_47 = arith.constant 0 : index
    %66 = arith.index_cast %65 : i32 to index
    %c1_48 = arith.constant 1 : index
    %c0_49 = arith.constant 0 : index
    %67 = vector.load %arg2[%c0_47, %66, %c1_48, %c0_49] : memref<1x18x18x64xbf16, #tpu.memory_space<vmem>>, vector<1x16x16x64xbf16>
    %68 = vector.shape_cast %67 : vector<1x16x16x64xbf16> to vector<16x16x64xbf16>
    %69 = vector.shape_cast %68 : vector<16x16x64xbf16> to vector<256x64xbf16>
    %c7 = arith.constant 7 : index
    %c0_50 = arith.constant 0 : index
    %c0_51 = arith.constant 0 : index
    %70 = vector.load %arg3[%c7, %c0_50, %c0_51] : memref<9x64x64xbf16, #tpu.memory_space<vmem>>, vector<1x64x64xbf16>
    %71 = vector.shape_cast %70 : vector<1x64x64xbf16> to vector<64x64xbf16>
    %cst_52 = arith.constant dense<0.000000e+00> : vector<256x64xf32>
    %72 = tpu.matmul %69, %71, %cst_52 {dimension_numbers = #tpu.dot_dimension_numbers<[1], [0], [0], [1], [0, 0, 1, 1], [], []>} : vector<256x64xbf16>, vector<64x64xbf16>, vector<256x64xf32> -> vector<256x64xf32>
    %73 = arith.addf %64, %72 : vector<256x64xf32>
    %c2_i32_53 = arith.constant 2 : i32
    %74 = arith.addi %0, %c2_i32_53 : i32
    %c0_54 = arith.constant 0 : index
    %75 = arith.index_cast %74 : i32 to index
    %c2_55 = arith.constant 2 : index
    %c0_56 = arith.constant 0 : index
    %76 = vector.load %arg2[%c0_54, %75, %c2_55, %c0_56] : memref<1x18x18x64xbf16, #tpu.memory_space<vmem>>, vector<1x16x16x64xbf16>
    %77 = vector.shape_cast %76 : vector<1x16x16x64xbf16> to vector<16x16x64xbf16>
    %78 = vector.shape_cast %77 : vector<16x16x64xbf16> to vector<256x64xbf16>
    %c8 = arith.constant 8 : index
    %c0_57 = arith.constant 0 : index
    %c0_58 = arith.constant 0 : index
    %79 = vector.load %arg3[%c8, %c0_57, %c0_58] : memref<9x64x64xbf16, #tpu.memory_space<vmem>>, vector<1x64x64xbf16>
    %80 = vector.shape_cast %79 : vector<1x64x64xbf16> to vector<64x64xbf16>
    %cst_59 = arith.constant dense<0.000000e+00> : vector<256x64xf32>
    %81 = tpu.matmul %78, %80, %cst_59 {dimension_numbers = #tpu.dot_dimension_numbers<[1], [0], [0], [1], [0, 0, 1, 1], [], []>} : vector<256x64xbf16>, vector<64x64xbf16>, vector<256x64xf32> -> vector<256x64xf32>
    %82 = arith.addf %73, %81 : vector<256x64xf32>
    %c0_60 = arith.constant 0 : index
    %c0_61 = arith.constant 0 : index
    %83 = vector.load %arg4[%c0_60, %c0_61] : memref<1x64xf32, #tpu.memory_space<vmem>>, vector<1x64xf32>
    %84 = vector.broadcast %83 : vector<1x64xf32> to vector<256x64xf32>
    %85 = arith.addf %82, %84 : vector<256x64xf32>
    %86 = vector.shape_cast %85 : vector<256x64xf32> to vector<1x16x16x64xf32>
    %c0_62 = arith.constant 0 : index
    %c0_63 = arith.constant 0 : index
    %c0_64 = arith.constant 0 : index
    %c0_65 = arith.constant 0 : index
    %87 = vector.load %arg5[%c0_62, %c0_63, %c0_64, %c0_65] : memref<1x16x16x64xf32, #tpu.memory_space<vmem>>, vector<1x16x16x64xf32>
    tpu.vector_store %arg5[%c0_62, %c0_63, %c0_64, %c0_65], %86 {strides = array<i32>} : memref<1x16x16x64xf32, #tpu.memory_space<vmem>>, vector<1x16x16x64xf32>,
    return
  }
  func.func @transform_0(%arg0: i32, %arg1: i32) -> (i32, i32, i32, i32) {
    %c0_i32 = arith.constant 0 : i32
    %c0_i32_0 = arith.constant 0 : i32
    %c0_i32_1 = arith.constant 0 : i32
    %c0_i32_2 = arith.constant 0 : i32
    return %arg0, %c0_i32, %c0_i32_0, %c0_i32_1 : i32, i32, i32, i32
  }
  func.func @transform_1(%arg0: i32, %arg1: i32) -> (i32, i32, i32) {
    %c0_i32 = arith.constant 0 : i32
    %c0_i32_0 = arith.constant 0 : i32
    %c0_i32_1 = arith.constant 0 : i32
    %c0_i32_2 = arith.constant 0 : i32
    return %c0_i32, %c0_i32_0, %c0_i32_1 : i32, i32, i32
  }
  func.func @transform_2(%arg0: i32, %arg1: i32) -> (i32, i32) {
    %c0_i32 = arith.constant 0 : i32
    %c0_i32_0 = arith.constant 0 : i32
    %c0_i32_1 = arith.constant 0 : i32
    return %c0_i32, %c0_i32_0 : i32, i32
  }
  func.func @transform_3(%arg0: i32, %arg1: i32) -> (i32, i32, i32, i32) {
    %c0_i32 = arith.constant 0 : i32
    %c0_i32_0 = arith.constant 0 : i32
    %c0_i32_1 = arith.constant 0 : i32
    return %arg0, %arg1, %c0_i32, %c0_i32_0 : i32, i32, i32, i32
  }
}

</mosaic_0001>

<bundles_post_ra>
// kernel: tpu_custom_call.1
= control target key start
LH: loop header
LB: loop body
LE: loop exit
PB: predicated region body
PF: predicated region fallthrough
CT: control target
= control target key end

     0   :  { %8 = vsyncpa [#allocation3], 0  ;;  %s8923_s0 = inlined_call_operand.vmem [shape: bf16[2,18,18,64], index: 0, kind: input, shape index: {}]   ;;  %s8924_s1 = inlined_call_operand.vmem [shape: bf16[9,64,64], index: 1, kind: input, shape index: {}]   ;;  %s8925_s2 = inlined_call_operand.vmem [shape: f32[1,64], index: 2, kind: input, shape index: {}]   ;;  %s8926_s3 = inlined_call_operand.hbm [shape: f32[2,16,16,64], index: 3, kind: output, shape index: {}]  }
   0x1   :  { %10 = vsyncpa [#allocation3 + $0x1], 0  ;;  %s6933_s12 = smov 0   ;;  %s6935_s13 = smov 0  }
   0x2   :  { %s6937_s14 = smov 0   ;;  %s6939_s15 = smov 0  }
   0x3   :  { %s6941_s16 = smov 0   ;;  %s6943_s17 = smov 0  }
   0x4 LB: > { %s5176_s18 = sadd.s32 4294967295, %s6908_s17   ;;  %s5177_s19 = sadd.s32 4294967294, %s6908_s17   ;;  %s6908_s17 = sphi %s6943_s17, %s16_s17   ;;  %s6904_s16 = sphi %s6941_s16, %s8995_s16   ;;  %s6900_s15 = sphi %s6939_s15, %s8994_s15   ;;  %s6896_s14 = sphi %s6937_s14, %s8993_s14   ;;  %s6892_s13 = sphi %s6935_s13, %s8992_s13   ;;  %s6888_s12 = sphi %s6933_s12, %s8991_s12  }
   0x5   : > { %s28_s20 = sadd.s32 1, %s6904_s16  ;;  %s105_s21 = sadd.s32 1, %s6896_s14 }
   0x6   : > { %p30_p0 = scmp.ge.s32.totalorder %s28_s20, 2  ;;  %p115_p1 = scmp.ne.s32.totalorder %s6896_s14, %s6892_s13 }
   0x7   : > { %p116_p2 = scmp.eq.s32.totalorder %s5176_s18, 1  ;;  %p121_p3 = scmp.ne.s32.totalorder %s6892_s13, %s6888_s12 }
   0x8   : > { %s8997_s20 = smov (%p30_p0, %s28_s20), 0  ;;  %p122_p5 = scmp.eq.s32.totalorder %s5177_s19, 1 }
   0x9   : > { %p6973_p4 = por %p116_p2, %p115_p1  ;;  %s100_s23 = ssub.s32 %s6904_s16, %s8997_s20 }
   0xa   : > { %p5180_p6 = scmp.ge.s32.totalorder %s6908_s17, 1  ;;  %p103_p7 = scmp.eq.s32.totalorder %s100_s23, 0 }
   0xb   : > { %p6980_p8 = por %p122_p5, %p121_p3  ;;  %p154_p9 = scmp.lt.s32.totalorder %s6908_s17, 3 }
   0xc   : > { %s6986_s25 = scalar_select %p103_p7, %s6896_s14, %s105_s21  }
   0xd   : > { %p155_p10 = pnand %p5180_p6, %p154_p9 }
   0xf   : > { %158 = sbr.rel (%p155_p10) target bundleno = 609 (0x261), region = 32 }
  0x16   : > { %v6680_v0 = vld [vmem:[%s8924_s1 + $0x20] sm:$0xff]   ;;  %p178_p11 = scmp.lt.s32.totalorder %s6900_s15, 1  ;;  %v6682_v2 = vld [vmem:[%s8924_s1 + $0x28] sm:$0xff]   ;;  %v6684_v4 = vld [vmem:[%s8924_s1 + $0x30] sm:$0xff]   ;;  %vm245_vm0 = vsmask.f32 3328 }
  0x17   : > { %v6681_v1 = vld [vmem:[%s8924_s1 + $0x80] sm:$0xff]   ;;  %5998 = vmatprep.subr.bf16.mxu1 %v6680_v0  ;;  %v6683_v3 = vld [vmem:[%s8924_s1 + $0x88] sm:$0xff]   ;;  %v6685_v5 = vld [vmem:[%s8924_s1 + $0x90] sm:$0xff]   ;;  %vm246_vm1 = vsmask.f32 7440  ;;  %vm713_vm3 = vcmask 523264  }
  0x18   : > { %s179_s5 = scalar_select %p178_p11, %s6900_s15, 1  ;;  %6158 = vmatprep.subr.bf16.mxu0 %v6681_v1  ;;  %5999 = vmatpush3.bf16.msra.mxu1 %v6680_v0  ;;  %v6686_v6 = vld [vmem:[%s8924_s1 + $0x38] sm:$0xff]   ;;  %v7025_v18 = vld [vmem:[%s8924_s1] sm:$0xff]   ;;  %vm7041_vm2 = vmor %vm245_vm0, %vm246_vm1  ;;  %vm1284_vm4 = vcmask 1042432   ;;  %vm1285_vm5 = vcmask 1046532  }
  0x19   : > { %6159 = vmatpush3.bf16.msra.mxu0 %v6681_v1  ;;  %6000 = vmatprep.subr.bf16.mxu1 %v6682_v2  ;;  %v6687_v7 = vld [vmem:[%s8924_s1 + $0x98] sm:$0xff]   ;;  %v7031_v23 = vld [vmem:[%s8924_s1 + $0xa0] sm:$0xff]   ;;  %vm7274_vm6 = vmor %vm1284_vm4, %vm1285_vm5  ;;  %s5817_s9 = sshll.u32 %s6900_s15, 12  ;;  %s6910_s23 = smov [#allocation2]  }
  0x1a   : > { %s6622_s10 = smul.u32 216, %s179_s5  ;;  %6160 = vmatprep.subr.bf16.mxu0 %v6683_v3  ;;  %s8864_s19 = scalar_lea.hbm %s8926_s3, %s5817_s9 }
  0x1b   : > { %s6834_s26 = sshll.u32 %s6910_s23, 4  ;;  %s6835_s26 = int_to_ptr.vmem [resolvable:$false] %s6834_s26 }
  0x1c   : > { %s7014_s27 = scalar_lea.vmem %s8923_s0, %s6622_s10  ;;  %6001 = vmatpush3.bf16.msra.mxu1 %v6682_v2  ;;  %s6836_s28 = scalar_lea.vmem %s6835_s26, 8192 }
  0x1d   : > { %6161 = vmatpush3.bf16.msra.mxu0 %v6683_v3  ;;  %6002 = vmatprep.subr.bf16.mxu1 %v6684_v4  ;;  %v189_v8 = vld [vmem:[%s7014_s27] sm:$0xf]  ;;  %v190_v9 = vld [vmem:[%s7014_s27 + $0x4] sm:$0xf]  ;;  %v229_v10 = vld [vmem:[%s7014_s27 + $0x8] sm:$0x1] }
  0x1e   : > { %6162 = vmatprep.subr.bf16.mxu0 %v6685_v5  ;;  %v249_v11 = vshrl.u32 %v189_v8, 16  ;;  %v252_v12 = vshll.u32 %v189_v8, 16  ;;  %v258_v13 = vshll.u32 %v190_v9, 16  ;;  %v262_v14 = vshrl.u32 %v190_v9, 16  ;;  %v5399_v22 = vld [vmem:[%s7014_s27 + $0xc] sm:$0xf] }
  0x1f   : > { %v268_v15 = vshll.u32 %v229_v10, 16  ;;  %v7034_v25 = vld [vmem:[%s7014_s27 + $0x10] sm:$0xf]  ;;  %v7037_v26 = vld [vmem:[%s7014_s27 + $0x14] sm:$0x1]  ;;  %v2160_v27 = vshrl.u32 %v5399_v22, 16 }
  0x20   : > { %6003 = vmatpush3.bf16.msra.mxu1 %v6684_v4  ;;  %v251_v16 = vrot.slane %v249_v11, 4  ;;  %v254_v17 = vrot.slane %v252_v12, 5  ;;  %v260_v19 = vrot.slane %v258_v13, 5  ;;  %v264_v20 = vrot.slane %v262_v14, 4  ;;  %v191_v40 = vld [vmem:[%s7014_s27 + $0xc] sm:$0xf] }
  0x21   : > { %6163 = vmatpush3.bf16.msra.mxu0 %v6685_v5  ;;  %6004 = vmatprep.subr.bf16.mxu1 %v6686_v6  ;;  %v270_v21 = vrot.slane %v268_v15, 5  ;;  %v2163_v28 = vshll.u32 %v5399_v22, 16  ;;  %v2169_v31 = vshll.u32 %v7034_v25, 16  ;;  %v2173_v32 = vshrl.u32 %v7034_v25, 16  ;;  %v192_v44 = vld [vmem:[%s7014_s27 + $0x10] sm:$0xf] }
  0x22   : > { %6164 = vmatprep.subr.bf16.mxu0 %v6687_v7  ;;  %v255_v24 = vor.u32 %v254_v17, %v251_v16  ;;  %v265_v30 = vor.u32 %v264_v20, %v260_v19  ;;  %v2179_v33 = vshll.u32 %v7037_v26, 16  ;;  %v2162_v35 = vrot.slane %v2160_v27, 4  ;;  %v230_v45 = vld [vmem:[%s7014_s27 + $0x14] sm:$0x1]  ;;  %v5402_v55 = vld [vmem:[%s7014_s27 + $0x18] sm:$0xf] }
  0x23   : > { %v2165_v36 = vrot.slane %v2163_v28, 5  ;;  %v2171_v38 = vrot.slane %v2169_v31, 5  ;;  %v2175_v39 = vrot.slane %v2173_v32, 4  ;;  %v273_v46 = vshrl.u32 %v191_v40, 16  ;;  %v7059_v60 = vld [vmem:[%s7014_s27 + $0x1c] sm:$0xf] }
  0x24   : > { %6005 = vmatpush3.bf16.msra.mxu1 %v6686_v6  ;;  %v256_v34 = vrot.slane %v255_v24, 4  ;;  %v266_v37 = vrot.slane %v265_v30, 4  ;;  %v2181_v43 = vrot.slane %v2179_v33, 5  ;;  %v276_v49 = vshll.u32 %v191_v40, 16  ;;  %v7067_v1 = vld [vmem:[%s7014_s27 + $0x20] sm:$0x1] }
  0x25   : > { %6165 = vmatpush3.bf16.msra.mxu0 %v6687_v7  ;;  %6038 = vmatprep.subr.bf16.mxu1 %v7025_v18  ;;  %v2166_v42 = vor.u32 %v2165_v36, %v2162_v35  ;;  %v2176_v48 = vor.u32 %v2175_v39, %v2171_v38  ;;  %v282_v50 = vshll.u32 %v192_v44, 16  ;;  %v275_v53 = vrot.slane %v273_v46, 4  ;;  %v193_v10 = vld [vmem:[%s7014_s27 + $0x18] sm:$0xf]  ;;  %v194_v11 = vld [vmem:[%s7014_s27 + $0x1c] sm:$0xf] }
  0x26   : > { %v261_v41 = vsel %vm7041_vm2, %v256_v34, %v260_v19  ;;  %6198 = vmatprep.subr.bf16.mxu0 %v7031_v23  ;;  %v271_v47 = vsel %vm7041_vm2, %v266_v37, %v270_v21  ;;  %v286_v54 = vshrl.u32 %v192_v44, 16  ;;  %v278_v57 = vrot.slane %v276_v49, 5  ;;  %v231_v28 = vld [vmem:[%s7014_s27 + $0x20] sm:$0x1]  ;;  %v5405_v34 = vld [vmem:[%s7014_s27 + $0x24] sm:$0xf] }
  0x27   : > { %v5191_v51 = vcombine.low %v261_v41, %v271_v47  ;;  %v2167_v52 = vrot.slane %v2166_v42, 4  ;;  %v2177_v56 = vrot.slane %v2176_v48, 4  ;;  %v284_v58 = vrot.slane %v282_v50, 5  ;;  %v6691_v39 = vld [vmem:[%s8924_s1 + $0x8] sm:$0xff]  }
  0x28   : > { %v292_v59 = vshll.u32 %v230_v45, 16  ;;  %v2931_v62 = vrot.slane %v7034_v25, 5  ;;  %v2934_v63 = vrot.slane %v7037_v26, 5  ;;  %v288_v0 = vrot.slane %v286_v54, 4  ;;  %v7093_v44 = vld [vmem:[%s7014_s27 + $0x28] sm:$0xf] }
  0x29   : > { %6006 = vmatprep.mubr.msk.bf16.mxu1 %vm713_vm3, %v5191_v51  ;;  %v2172_v61 = vsel %vm7041_vm2, %v2167_v52, %v2171_v38  ;;  %v2182_v2 = vsel %vm7041_vm2, %v2177_v56, %v2181_v43  ;;  %v279_v3 = vor.u32 %v278_v57, %v275_v53  ;;  %v2184_v5 = vshrl.u32 %v5402_v55, 16  ;;  %v7097_v48 = vld [vmem:[%s7014_s27 + $0x2c] sm:$0x1]  ;;  %v6694_v56 = vld [vmem:[%s8924_s1 + $0x10] sm:$0xff]  }
  0x2a   : > { %v294_v4 = vrot.slane %v292_v59, 5  ;;  %v5455_v6 = vcombine.low %v2172_v61, %v2182_v2  ;;  %v289_v7 = vor.u32 %v288_v0, %v284_v58  ;;  %v2187_v8 = vshll.u32 %v5402_v55, 16  ;;  %v6690_v54 = vld [vmem:[%s8924_s1 + $0xa8] sm:$0xff]   ;;  %v195_v55 = vld [vmem:[%s7014_s27 + $0x24] sm:$0xf] }
  0x2b   : > { %v2193_v9 = vshll.u32 %v7059_v60, 16  ;;  %v280_v12 = vrot.slane %v279_v3, 4  ;;  %v2186_v13 = vrot.slane %v2184_v5, 4  ;;  %v2197_v14 = vshrl.u32 %v7059_v60, 16  ;;  %v196_v61 = vld [vmem:[%s7014_s27 + $0x28] sm:$0xf] }
  0x2c   : > { %v2203_v15 = vshll.u32 %v7067_v1, 16  ;;  %6166 = vmatprep.mubr.msk.bf16.mxu0 %vm713_vm3, %v5455_v6  ;;  %v290_v16 = vrot.slane %v289_v7, 4  ;;  %v2189_v17 = vrot.slane %v2187_v8, 5  ;;  %v2938_v20 = vrot.slane %v7059_v60, 5  ;;  %v232_v5 = vld [vmem:[%s7014_s27 + $0x2c] sm:$0x1] }
  0x2d   : > { %v2195_v19 = vrot.slane %v2193_v9, 5  ;;  %v285_v21 = vsel %vm7041_vm2, %v280_v12, %v284_v58  ;;  %v2199_v22 = vrot.slane %v2197_v14, 4  ;;  %v2941_v27 = vrot.slane %v7067_v1, 5 }
  0x2e   : > { %v2205_v24 = vrot.slane %v2203_v15, 5  ;;  %v295_v30 = vsel %vm7041_vm2, %v290_v16, %v294_v4  ;;  %v2190_v31 = vor.u32 %v2189_v17, %v2186_v13  ;;  %v7086_v32 = vrot.slane %v2938_v20, 4  ;;  %v7119_v15 = vld [vmem:[%s7014_s27 + $0x34] sm:$0xf] }
  0x2f   : > { %v297_v33 = vshrl.u32 %v193_v10, 16  ;;  %v5192_v35 = vcombine.low %v285_v21, %v295_v30  ;;  %v2200_v36 = vor.u32 %v2199_v22, %v2195_v19  ;;  %v300_v37 = vshll.u32 %v193_v10, 16  ;;  %v5408_v10 = vld [vmem:[%s7014_s27 + $0x30] sm:$0xf] }
  0x30   : > { %v306_v38 = vshll.u32 %v194_v11, 16  ;;  %v2191_v40 = vrot.slane %v2190_v31, 4  ;;  %v310_v42 = vshrl.u32 %v194_v11, 16  ;;  %v316_v43 = vshll.u32 %v231_v28, 16  ;;  %v6692_v31 = vld [vmem:[%s8924_s1 + $0xb0] sm:$0xff]  }
  0x31   : > { %v299_v41 = vrot.slane %v297_v33, 4  ;;  %6007 = vmatmul.mubr.msk.bf16.vlgmr.msra.gmra.mrb[0].mxu1 %vm713_vm3, %v5192_v35  ;;  %v2201_v45 = vrot.slane %v2200_v36, 4  ;;  %v302_v46 = vrot.slane %v300_v37, 5  ;;  %v2208_v49 = vshrl.u32 %v5405_v34, 16 }
  0x32   : > { %v308_v47 = vrot.slane %v306_v38, 5  ;;  %6039 = vmatpush3.bf16.msra.mxu1 %v7025_v18  ;;  %v2196_v50 = vsel %vm7041_vm2, %v2191_v40, %v2195_v19  ;;  %v312_v51 = vrot.slane %v310_v42, 4  ;;  %v318_v52 = vrot.slane %v316_v43, 5  ;;  %v7135_v40 = vld [vmem:[%s7014_s27 + $0x38] sm:$0x1] }
  0x33   : > { %v2211_v53 = vshll.u32 %v5405_v34, 16  ;;  %v2206_v18 = vsel %vm7041_vm2, %v2201_v45, %v2205_v24  ;;  %v303_v57 = vor.u32 %v302_v46, %v299_v41  ;;  %v2210_v58 = vrot.slane %v2208_v49, 4  ;;  %6040 = vmatprep.subr.bf16.mxu1 %v6691_v39  ;;  %v6693_v42 = vld [vmem:[%s8924_s1 + $0xb8] sm:$0xff]   ;;  %v197_v49 = vld [vmem:[%s7014_s27 + $0x30] sm:$0xf] }
  0x34   : > { %v2217_v59 = vshll.u32 %v7093_v44, 16  ;;  %v5456_v0 = vcombine.low %v2196_v50, %v2206_v18  ;;  %v313_v2 = vor.u32 %v312_v51, %v308_v47  ;;  %v2221_v4 = vshrl.u32 %v7093_v44, 16 }
  0x35   : > { %v2213_v3 = vrot.slane %v2211_v53, 5  ;;  %v304_v6 = vrot.slane %v303_v57, 4  ;;  %v2227_v8 = vshll.u32 %v7097_v48, 16  ;;  %v321_v9 = vshrl.u32 %v195_v55, 16 }
  0x36   : > { %v2219_v7 = vrot.slane %v2217_v59, 5  ;;  %6167 = vmatmul.mubr.msk.bf16.vlgmr.msra.gmra.mrb[0].mxu0 %vm713_vm3, %v5456_v0  ;;  %v314_v11 = vrot.slane %v313_v2, 4  ;;  %v2223_v13 = vrot.slane %v2221_v4, 4  ;;  %v324_v14 = vshll.u32 %v195_v55, 16  ;;  %6041 = vmatpush3.bf16.msra.mxu1 %v6691_v39  ;;  %v198_v55 = vld [vmem:[%s7014_s27 + $0x34] sm:$0xf] }
  0x37   : > { %v2214_v12 = vor.u32 %v2213_v3, %v2210_v58  ;;  %6199 = vmatpush3.bf16.msra.mxu0 %v7031_v23  ;;  %v309_v16 = vsel %vm7041_vm2, %v304_v6, %v308_v47  ;;  %v2229_v17 = vrot.slane %v2227_v8, 5  ;;  %v323_v19 = vrot.slane %v321_v9, 4  ;;  %6042 = vmatprep.subr.bf16.mxu1 %v6694_v56  ;;  %v6696_v23 = vld [vmem:[%s8924_s1 + $0x18] sm:$0xff]  }
  0x38   : > { %v330_v21 = vshll.u32 %v196_v61, 16  ;;  %v319_v22 = vsel %vm7041_vm2, %v314_v11, %v318_v52  ;;  %v2224_v28 = vor.u32 %v2223_v13, %v2219_v7  ;;  %6200 = vmatprep.subr.bf16.mxu0 %v6690_v54  ;;  %v326_v30 = vrot.slane %v324_v14, 5  ;;  %v7159_v13 = vld [vmem:[%s8924_s1 + $0xc0] sm:$0xff]  }
  0x39   : > { %v2215_v24 = vrot.slane %v2214_v12, 4  ;;  %v5193_v33 = vcombine.low %v309_v16, %v319_v22  ;;  %v334_v35 = vshrl.u32 %v196_v61, 16  ;;  %v340_v36 = vshll.u32 %v232_v5, 16  ;;  %v233_v5 = vld [vmem:[%s7014_s27 + $0x38] sm:$0x1] }
  0x3a   : > { %v332_v34 = vrot.slane %v330_v21, 5  ;;  %v2225_v38 = vrot.slane %v2224_v28, 4  ;;  %v327_v39 = vor.u32 %v326_v30, %v323_v19  ;;  %v2232_v41 = vshrl.u32 %v5408_v10, 16  ;;  %6043 = vmatpush3.bf16.msra.mxu1 %v6694_v56  ;;  %v6699_v56 = vld [vmem:[%s8924_s1 + $0x40] sm:$0xff]   ;;  %v5411_v12 = vld [vmem:[%s7014_s27 + $0x3c] sm:$0xf] }
  0x3b   : > { %v2220_v37 = vsel %vm7041_vm2, %v2215_v24, %v2219_v7  ;;  %6010 = vmatprep.mubr.msk.bf16.mxu1 %vm713_vm3, %v5193_v33  ;;  %v336_v43 = vrot.slane %v334_v35, 4  ;;  %v342_v45 = vrot.slane %v340_v36, 5  ;;  %v2235_v46 = vshll.u32 %v5408_v10, 16  ;;  %6201 = vmatpush3.bf16.msra.mxu0 %v6690_v54  ;;  %v7164_v21 = vld [vmem:[%s7014_s27 + $0x40] sm:$0xf] }
  0x3c   : > { %v2241_v47 = vshll.u32 %v7119_v15, 16  ;;  %v2230_v50 = vsel %vm7041_vm2, %v2225_v38, %v2229_v17  ;;  %v328_v51 = vrot.slane %v327_v39, 4  ;;  %v2234_v52 = vrot.slane %v2232_v41, 4  ;;  %6202 = vmatprep.subr.bf16.mxu0 %v6692_v31  ;;  %6044 = vmatprep.subr.bf16.mxu1 %v6696_v23  ;;  %v7169_v33 = vld [vmem:[%s7014_s27 + $0x44] sm:$0x1] }
  0x3d   : > { %v2245_v53 = vshrl.u32 %v7119_v15, 16  ;;  %v5457_v18 = vcombine.low %v2220_v37, %v2230_v50  ;;  %v337_v57 = vor.u32 %v336_v43, %v332_v34  ;;  %v2237_v58 = vrot.slane %v2235_v46, 5  ;;  %v199_v41 = vld [vmem:[%s7014_s27 + $0x3c] sm:$0xf] }
  0x3e   : > { %v2243_v54 = vrot.slane %v2241_v47, 5  ;;  %v333_v59 = vsel %vm7041_vm2, %v328_v51, %v332_v34  ;;  %v2251_v0 = vshll.u32 %v7135_v40, 16  ;;  %v345_v2 = vshrl.u32 %v197_v49, 16  ;;  %6045 = vmatpush3.bf16.msra.mxu1 %v6696_v23 }
  0x3f   : > { %v2247_v61 = vrot.slane %v2245_v53, 4  ;;  %6170 = vmatprep.mubr.msk.bf16.mxu0 %vm713_vm3, %v5457_v18  ;;  %v338_v3 = vrot.slane %v337_v57, 4  ;;  %v2238_v4 = vor.u32 %v2237_v58, %v2234_v52  ;;  %v348_v6 = vshll.u32 %v197_v49, 16  ;;  %6203 = vmatpush3.bf16.msra.mxu0 %v6692_v31  ;;  %v200_v49 = vld [vmem:[%s7014_s27 + $0x40] sm:$0xf] }
  0x40   : > { %v354_v7 = vshll.u32 %v198_v55, 16  ;;  %v2253_v9 = vrot.slane %v2251_v0, 5  ;;  %v347_v10 = vrot.slane %v345_v2, 4  ;;  %v358_v11 = vshrl.u32 %v198_v55, 16  ;;  %6204 = vmatprep.subr.bf16.mxu0 %v6693_v42  ;;  %6078 = vmatprep.subr.bf16.mxu1 %v6699_v56  ;;  %v234_v56 = vld [vmem:[%s7014_s27 + $0x44] sm:$0x1] }
  0x41   : > { %v2248_v8 = vor.u32 %v2247_v61, %v2243_v54  ;;  %v343_v14 = vsel %vm7041_vm2, %v338_v3, %v342_v45  ;;  %v2239_v16 = vrot.slane %v2238_v4, 4  ;;  %v350_v17 = vrot.slane %v348_v6, 5  ;;  %v5414_v58 = vld [vmem:[%s7014_s27 + $0x48] sm:$0xf]  ;;  %v7188_v2 = vld [vmem:[%s7014_s27 + $0x4c] sm:$0xf] }
  0x42   : > { %v356_v19 = vrot.slane %v354_v7, 5  ;;  %v5194_v22 = vcombine.low %v333_v59, %v343_v14  ;;  %v360_v28 = vrot.slane %v358_v11, 4  ;;  %v364_v30 = vshll.u32 %v233_v5, 16  ;;  %v7191_v7 = vld [vmem:[%s7014_s27 + $0x50] sm:$0x1] }
  0x43   : > { %v2249_v24 = vrot.slane %v2248_v8, 4  ;;  %v2244_v31 = vsel %vm7041_vm2, %v2239_v16, %v2243_v54  ;;  %v351_v23 = vor.u32 %v350_v17, %v347_v10  ;;  %v2256_v34 = vshrl.u32 %v5411_v12, 16  ;;  %6205 = vmatpush3.bf16.msra.mxu0 %v6693_v42 }
  0x44   : > { %v2259_v35 = vshll.u32 %v5411_v12, 16  ;;  %6011 = vmatmul.mubr.msk.bf16.gmra.mrb[4].mxu1 %vm713_vm3, %v5194_v22  ;;  %v361_v37 = vor.u32 %v360_v28, %v356_v19  ;;  %v366_v38 = vrot.slane %v364_v30, 5  ;;  %v2265_v39 = vshll.u32 %v7164_v21, 16  ;;  %6238 = vmatprep.subr.bf16.mxu0 %v7159_v13 }
  0x45   : > { %v2254_v36 = vsel %vm7041_vm2, %v2249_v24, %v2253_v9  ;;  %v352_v45 = vrot.slane %v351_v23, 4  ;;  %v2258_v46 = vrot.slane %v2256_v34, 4  ;;  %v2269_v51 = vshrl.u32 %v7164_v21, 16 }
  0x46   : > { %v5458_v43 = vcombine.low %v2244_v31, %v2254_v36  ;;  %v2261_v47 = vrot.slane %v2259_v35, 5  ;;  %v362_v42 = vrot.slane %v361_v37, 4  ;;  %v2267_v50 = vrot.slane %v2265_v39, 5 }
  0x47   : > { %v2275_v52 = vshll.u32 %v7169_v33, 16  ;;  %v357_v53 = vsel %vm7041_vm2, %v352_v45, %v356_v19  ;;  %v369_v18 = vshrl.u32 %v199_v41, 16  ;;  %v372_v57 = vshll.u32 %v199_v41, 16  ;;  %v201_v19 = vld [vmem:[%s7014_s27 + $0x48] sm:$0xf] }
  0x48   : > { %6171 = vmatmul.mubr.msk.bf16.gmra.mrb[4].mxu0 %vm713_vm3, %v5458_v43  ;;  %v2262_v55 = vor.u32 %v2261_v47, %v2258_v46  ;;  %v367_v54 = vsel %vm7041_vm2, %v362_v42, %v366_v38  ;;  %v2271_v59 = vrot.slane %v2269_v51, 4  ;;  %v378_v0 = vshll.u32 %v200_v49, 16  ;;  %v202_v41 = vld [vmem:[%s7014_s27 + $0x4c] sm:$0xf] }
  0x49   : > { %v2277_v61 = vrot.slane %v2275_v52, 5  ;;  %v5195_v3 = vcombine.low %v357_v53, %v367_v54  ;;  %v371_v5 = vrot.slane %v369_v18, 4  ;;  %v374_v6 = vrot.slane %v372_v57, 5  ;;  %v5417_v57 = vld [vmem:[%s7014_s27 + $0x54] sm:$0xf] }
  0x4a   : > { %v2263_v4 = vrot.slane %v2262_v55, 4  ;;  %v2272_v8 = vor.u32 %v2271_v59, %v2267_v50  ;;  %v380_v9 = vrot.slane %v378_v0, 5  ;;  %v382_v10 = vshrl.u32 %v200_v49, 16  ;;  %v235_v49 = vld [vmem:[%s7014_s27 + $0x50] sm:$0x1] }
  0x4b   : > { %v388_v11 = vshll.u32 %v234_v56, 16  ;;  %6014 = vmatprep.mubr.msk.bf16.mxu1 %vm713_vm3, %v5195_v3  ;;  %v375_v14 = vor.u32 %v374_v6, %v371_v5  ;;  %v2280_v16 = vshrl.u32 %v5414_v58, 16  ;;  %v2283_v17 = vshll.u32 %v5414_v58, 16  ;;  %v7211_v0 = vld [vmem:[%s7014_s27 + $0x58] sm:$0xf] }
  0x4c   : > { %v2268_v12 = vsel %vm7041_vm2, %v2263_v4, %v2267_v50  ;;  %v2273_v22 = vrot.slane %v2272_v8, 4  ;;  %v384_v24 = vrot.slane %v382_v10, 4  ;;  %v2289_v30 = vshll.u32 %v7188_v2, 16 }
  0x4d   : > { %v390_v28 = vrot.slane %v388_v11, 5  ;;  %v376_v31 = vrot.slane %v375_v14, 4  ;;  %v2282_v23 = vrot.slane %v2280_v16, 4  ;;  %v2285_v34 = vrot.slane %v2283_v17, 5  ;;  %v7216_v11 = vld [vmem:[%s7014_s27 + $0x5c] sm:$0x1] }
  0x4e   : > { %v2293_v35 = vshrl.u32 %v7188_v2, 16  ;;  %v2278_v36 = vsel %vm7041_vm2, %v2273_v22, %v2277_v61  ;;  %v385_v37 = vor.u32 %v384_v24, %v380_v9  ;;  %v2291_v38 = vrot.slane %v2289_v30, 5  ;;  %v7224_v22 = vld [vmem:[%s7014_s27 + $0x54] sm:$0xf] }
  0x4f   : > { %v2299_v39 = vshll.u32 %v7191_v7, 16  ;;  %v5459_v43 = vcombine.low %v2268_v12, %v2278_v36  ;;  %v381_v45 = vsel %vm7041_vm2, %v376_v31, %v380_v9  ;;  %v2286_v46 = vor.u32 %v2285_v34, %v2282_v23  ;;  %v7227_v23 = vld [vmem:[%s7014_s27 + $0x58] sm:$0xf] }
  0x50   : > { %v2295_v47 = vrot.slane %v2293_v35, 4  ;;  %v386_v42 = vrot.slane %v385_v37, 4  ;;  %v393_v51 = vshrl.u32 %v201_v19, 16  ;;  %v396_v52 = vshll.u32 %v201_v19, 16 }
  0x51   : > { %v2301_v50 = vrot.slane %v2299_v39, 5  ;;  %6174 = vmatprep.mubr.msk.bf16.mxu0 %vm713_vm3, %v5459_v43  ;;  %v2287_v53 = vrot.slane %v2286_v46, 4  ;;  %v402_v56 = vshll.u32 %v202_v41, 16  ;;  %v406_v18 = vshrl.u32 %v202_v41, 16  ;;  %v5420_v46 = vld [vmem:[%s7014_s27 + $0x60] sm:$0xf] }
  0x52   : > { %v2296_v55 = vor.u32 %v2295_v47, %v2291_v38  ;;  %v391_v58 = vsel %vm7041_vm2, %v386_v42, %v390_v28  ;;  %v395_v54 = vrot.slane %v393_v51, 4  ;;  %v398_v59 = vrot.slane %v396_v52, 5 }
  0x53   : > { %v412_v61 = vshll.u32 %v235_v49, 16  ;;  %v5196_v3 = vcombine.low %v381_v45, %v391_v58  ;;  %v2292_v4 = vsel %vm7041_vm2, %v2287_v53, %v2291_v38  ;;  %v404_v6 = vrot.slane %v402_v56, 5  ;;  %v236_v38 = vld [vmem:[%s7014_s27 + $0x5c] sm:$0x1]  ;;  %v7242_v56 = vld [vmem:[%s7014_s27 + $0x64] sm:$0xf] }
  0x54   : > { %v2297_v5 = vrot.slane %v2296_v55, 4  ;;  %v399_v8 = vor.u32 %v398_v59, %v395_v54  ;;  %v408_v9 = vrot.slane %v406_v18, 4  ;;  %v2304_v12 = vshrl.u32 %v5417_v57, 16 }
  0x55   : > { %v414_v10 = vrot.slane %v412_v61, 5  ;;  %6015 = vmatmul.mubr.msk.bf16.gmra.mrb[8].mxu1 %vm713_vm3, %v5196_v3  ;;  %v2307_v16 = vshll.u32 %v5417_v57, 16  ;;  %v2313_v17 = vshll.u32 %v7211_v0, 16  ;;  %v2317_v19 = vshrl.u32 %v7211_v0, 16 }
  0x56   : > { %v2302_v14 = vsel %vm7041_vm2, %v2297_v5, %v2301_v50  ;;  %v400_v28 = vrot.slane %v399_v8, 4  ;;  %v409_v30 = vor.u32 %v408_v9, %v404_v6  ;;  %v2306_v31 = vrot.slane %v2304_v12, 4  ;;  %v7250_v8 = vld [vmem:[%s7014_s27 + $0x68] sm:$0x1]  ;;  %v7254_v12 = vld [vmem:[%s7014_s27 + $0x60] sm:$0xf] }
  0x57   : > { %v5460_v24 = vcombine.low %v2292_v4, %v2302_v14  ;;  %v2309_v34 = vrot.slane %v2307_v16, 5  ;;  %v2315_v35 = vrot.slane %v2313_v17, 5  ;;  %v2319_v36 = vrot.slane %v2317_v19, 4 }
  0x58   : > { %v2323_v37 = vshll.u32 %v7216_v11, 16  ;;  %v405_v39 = vsel %vm7041_vm2, %v400_v28, %v404_v6  ;;  %v410_v41 = vrot.slane %v409_v30, 4  ;;  %v417_v43 = vshrl.u32 %v7224_v22, 16 }
  0x59   : > { %6175 = vmatmul.mubr.msk.bf16.gmra.mrb[8].mxu0 %vm713_vm3, %v5460_v24  ;;  %v420_v45 = vshll.u32 %v7224_v22, 16  ;;  %v2310_v47 = vor.u32 %v2309_v34, %v2306_v31  ;;  %v2320_v49 = vor.u32 %v2319_v36, %v2315_v35  ;;  %v426_v50 = vshll.u32 %v7227_v23, 16  ;;  %v7257_v24 = vld [vmem:[%s7014_s27 + $0x64] sm:$0xf] }
  0x5a   : > { %v2325_v42 = vrot.slane %v2323_v37, 5  ;;  %v415_v51 = vsel %vm7041_vm2, %v410_v41, %v414_v10  ;;  %v419_v52 = vrot.slane %v417_v43, 4  ;;  %v430_v55 = vshrl.u32 %v7227_v23, 16 }
  0x5b   : > { %v422_v53 = vrot.slane %v420_v45, 5  ;;  %v5197_v18 = vcombine.low %v405_v39, %v415_v51  ;;  %v2311_v57 = vrot.slane %v2310_v47, 4  ;;  %v2321_v58 = vrot.slane %v2320_v49, 4  ;;  %v5491_v47 = vld [vmem:[%s7014_s27 + $0xc] sm:$0xe] }
  0x5c   : > { %v428_v54 = vrot.slane %v426_v50, 5  ;;  %v432_v61 = vrot.slane %v430_v55, 4  ;;  %v436_v3 = vshll.u32 %v236_v38, 16  ;;  %v2328_v4 = vshrl.u32 %v5420_v46, 16  ;;  %v237_v38 = vld [vmem:[%s7014_s27 + $0x68] sm:$0x1] }
  0x5d   : > { %v423_v59 = vor.u32 %v422_v53, %v419_v52  ;;  %6018 = vmatprep.mubr.msk.bf16.mxu1 %vm713_vm3, %v5197_v18  ;;  %v2316_v5 = vsel %vm7041_vm2, %v2311_v57, %v2315_v35  ;;  %v2326_v6 = vsel %vm7041_vm2, %v2321_v58, %v2325_v42  ;;  %v2331_v9 = vshll.u32 %v5420_v46, 16  ;;  %v7279_v58 = vld [vmem:[%s7014_s27 + $0x6c] sm:$0xf] }
  0x5e   : > { %v2337_v10 = vshll.u32 %v7242_v56, 16  ;;  %v5461_v14 = vcombine.low %v2316_v5, %v2326_v6  ;;  %v433_v17 = vor.u32 %v432_v61, %v428_v54  ;;  %v438_v19 = vrot.slane %v436_v3, 5 }
  0x5f   : > { %v424_v16 = vrot.slane %v423_v59, 4  ;;  %v2330_v28 = vrot.slane %v2328_v4, 4  ;;  %v2333_v30 = vrot.slane %v2331_v9, 5  ;;  %v2341_v34 = vshrl.u32 %v7242_v56, 16 }
  0x60   : > { %v2339_v31 = vrot.slane %v2337_v10, 5  ;;  %6178 = vmatprep.mubr.msk.bf16.mxu0 %vm713_vm3, %v5461_v14  ;;  %v434_v36 = vrot.slane %v433_v17, 4  ;;  %v2347_v37 = vshll.u32 %v7250_v8, 16  ;;  %v441_v39 = vshrl.u32 %v7254_v12, 16  ;;  %v7291_v17 = vld [vmem:[%s7014_s27 + $0x70] sm:$0xf] }
  0x61   : > { %v429_v35 = vsel %vm7041_vm2, %v424_v16, %v428_v54  ;;  %v2334_v41 = vor.u32 %v2333_v30, %v2330_v28  ;;  %v2343_v43 = vrot.slane %v2341_v34, 4  ;;  %v444_v45 = vshll.u32 %v7254_v12, 16  ;;  %v238_v34 = vld [vmem:[%s7014_s27 + $0x74] sm:$0x1] }
  0x62   : > { %v450_v46 = vshll.u32 %v7257_v24, 16  ;;  %v439_v49 = vsel %vm7041_vm2, %v434_v36, %v438_v19  ;;  %v2349_v42 = vrot.slane %v2347_v37, 5  ;;  %v443_v50 = vrot.slane %v441_v39, 4 }
  0x63   : > { %v454_v51 = vshrl.u32 %v7257_v24, 16  ;;  %v5198_v52 = vcombine.low %v429_v35, %v439_v49  ;;  %v2335_v53 = vrot.slane %v2334_v41, 4  ;;  %v2344_v55 = vor.u32 %v2343_v43, %v2339_v31  ;;  %v5492_v35 = vld [vmem:[%s7014_s27 + $0x18] sm:$0xe] }
  0x64   : > { %v446_v18 = vrot.slane %v444_v45, 5  ;;  %v452_v54 = vrot.slane %v450_v46, 5  ;;  %v460_v61 = vshll.u32 %v237_v38, 16  ;;  %v5507_v3 = vrot.slane %v5491_v47, 9  ;;  %v7308_v45 = vld [vmem:[%s7014_s27 + $0x78] sm:$0xf] }
  0x65   : > { %v456_v59 = vrot.slane %v454_v51, 4  ;;  %6019 = vmatmul.mubr.msk.bf16.gmra.mrb[12].mxu1 %vm713_vm3, %v5198_v52  ;;  %v2340_v4 = vsel %vm7041_vm2, %v2335_v53, %v2339_v31  ;;  %v2345_v5 = vrot.slane %v2344_v55, 4  ;;  %v2933_v9 = vrot.slane %v2931_v62, 4  ;;  %v239_v55 = vld [vmem:[%s7014_s27 + $0x80] sm:$0x1] }
  0x66   : > { %v447_v6 = vor.u32 %v446_v18, %v443_v50  ;;  %v462_v14 = vrot.slane %v460_v61, 5  ;;  %v2932_v16 = vsel %vm7274_vm6, %v5507_v3, %v2931_v62  ;;  %v465_v19 = vshrl.u32 %v7279_v58, 16 }
  0x67   : > { %v457_v10 = vor.u32 %v456_v59, %v452_v54  ;;  %v2350_v28 = vsel %vm7041_vm2, %v2345_v5, %v2349_v42  ;;  %v2935_v31 = vsel %vm7274_vm6, %v2933_v9, %v2934_v63  ;;  %v468_v25 = vshll.u32 %v7279_v58, 16  ;;  %v7319_v42 = vld [vmem:[%s7014_s27 + $0x7c] sm:$0xf]  ;;  %v7333_v5 = vld [vmem:[%s7014_s27 + $0x84] sm:$0xf] }
  0x68   : > { %v448_v30 = vrot.slane %v447_v6, 4  ;;  %v5462_v62 = vcombine.low %v2340_v4, %v2350_v28  ;;  %v5531_v37 = vcombine.low %v2932_v16, %v2935_v31  ;;  %v467_v38 = vrot.slane %v465_v19, 4 }
  0x69   : > { %v458_v36 = vrot.slane %v457_v10, 4  ;;  %v470_v41 = vrot.slane %v468_v25, 5  ;;  %v474_v43 = vshll.u32 %v7291_v17, 16  ;;  %v478_v26 = vshrl.u32 %v7291_v17, 16  ;;  %v7337_v10 = vld [vmem:[%s7014_s27 + $0x88] sm:$0xf] }
  0x6a   : > { %v453_v39 = vsel %vm7041_vm2, %v448_v30, %v452_v54  ;;  %6179 = vmatmul.mubr.msk.bf16.gmra.mrb[12].mxu0 %vm713_vm3, %v5462_v62  ;;  %v484_v46 = vshll.u32 %v238_v34, 16  ;;  %v5508_v47 = vrot.slane %v5492_v35, 9  ;;  %v2942_v49 = vsel %vm7274_vm6, %v7086_v32, %v2941_v27  ;;  %v5493_v32 = vld [vmem:[%s7014_s27 + $0x24] sm:$0xe]  ;;  %v6697_v35 = vld [vmem:[%s8924_s1 + $0xc8] sm:$0xff]  }
  0x6b   : > { %v463_v63 = vsel %vm7041_vm2, %v458_v36, %v462_v14  ;;  %6206 = vmatprep.mubr.msk.bf16.mxu0 %vm713_vm3, %v5531_v37  ;;  %v471_v51 = vor.u32 %v470_v41, %v467_v38  ;;  %v476_v52 = vrot.slane %v474_v43, 5  ;;  %v480_v53 = vrot.slane %v478_v26, 4  ;;  %v240_v37 = vld [vmem:[%s7014_s27 + $0x8c] sm:$0x1] }
  0x6c   : > { %v5199_v50 = vcombine.low %v453_v39, %v463_v63  ;;  %v486_v18 = vrot.slane %v484_v46, 5  ;;  %v2939_v1 = vsel %vm7274_vm6, %v5508_v47, %v2938_v20  ;;  %v489_v54 = vshrl.u32 %v7308_v45, 16  ;;  %v5494_v63 = vld [vmem:[%s7014_s27 + $0x30] sm:$0xe] }
  0x6d   : > { %v492_v27 = vshll.u32 %v7308_v45, 16  ;;  %v472_v59 = vrot.slane %v471_v51, 4  ;;  %v481_v61 = vor.u32 %v480_v53, %v476_v52  ;;  %v5532_v3 = vcombine.low %v2939_v1, %v2942_v49 }
  0x6e   : > { %6022 = vmatprep.mubr.msk.bf16.mxu1 %vm713_vm3, %v5199_v50  ;;  %v498_v4 = vshll.u32 %v7319_v42, 16  ;;  %v491_v6 = vrot.slane %v489_v54, 4  ;;  %v502_v9 = vshrl.u32 %v7319_v42, 16  ;;  %v508_v20 = vshll.u32 %v239_v55, 16 }
  0x6f   : > { %v494_v60 = vrot.slane %v492_v27, 5  ;;  %v477_v14 = vsel %vm7041_vm2, %v472_v59, %v476_v52  ;;  %v482_v16 = vrot.slane %v481_v61, 4  ;;  %v5509_v28 = vrot.slane %v5493_v32, 9  ;;  %v7367_v27 = vld [vmem:[%s7014_s27 + $0x90] sm:$0xf] }
  0x70   : > { %v500_v19 = vrot.slane %v498_v4, 5  ;;  %v504_v31 = vrot.slane %v502_v9, 4  ;;  %v510_v34 = vrot.slane %v508_v20, 5  ;;  %v2945_v25 = vrot.slane %v7093_v44, 5  ;;  %v7370_v32 = vld [vmem:[%s7014_s27 + $0x94] sm:$0xf] }
  0x71   : > { %v495_v30 = vor.u32 %v494_v60, %v491_v6  ;;  %v487_v62 = vsel %vm7041_vm2, %v482_v16, %v486_v18  ;;  %v2948_v36 = vrot.slane %v7097_v48, 5  ;;  %v513_v38 = vshrl.u32 %v7333_v5, 16 }
  0x72   : > { %v516_v39 = vshll.u32 %v7333_v5, 16  ;;  %v5200_v41 = vcombine.low %v477_v14, %v487_v62  ;;  %6207 = vmatmul.mubr.msk.bf16.vlgmr.msra.gmra.mrb[0].mxu0 %vm713_vm3, %v5532_v3  ;;  %v505_v26 = vor.u32 %v504_v31, %v500_v19  ;;  %v2946_v44 = vsel %vm7274_vm6, %v5509_v28, %v2945_v25  ;;  %v241_v14 = vld [vmem:[%s7014_s27 + $0x98] sm:$0x1]  ;;  %v5495_v31 = vld [vmem:[%s7014_s27 + $0x3c] sm:$0xe] }
  0x73   : > { %v496_v43 = vrot.slane %v495_v30, 4  ;;  %6239 = vmatpush3.bf16.msra.mxu0 %v7159_v13  ;;  %v2947_v46 = vrot.slane %v2945_v25, 4  ;;  %v515_v48 = vrot.slane %v513_v38, 4  ;;  %v522_v49 = vshll.u32 %v7337_v10, 16  ;;  %v6700_v13 = vld [vmem:[%s8924_s1 + $0xd0] sm:$0xff]  }
  0x74   : > { %v518_v47 = vrot.slane %v516_v39, 5  ;;  %6023 = vmatmul.mubr.msk.bf16.gmra.mrb[16].mxu1 %vm713_vm3, %v5200_v41  ;;  %v506_v51 = vrot.slane %v505_v26, 4  ;;  %v526_v52 = vshrl.u32 %v7337_v10, 16  ;;  %v532_v53 = vshll.u32 %v240_v37, 16  ;;  %6240 = vmatprep.subr.bf16.mxu0 %v6697_v35  ;;  %v7392_v62 = vld [vmem:[%s7014_s27 + $0x9c] sm:$0xf] }
  0x75   : > { %v501_v50 = vsel %vm7041_vm2, %v496_v43, %v500_v19  ;;  %v2949_v55 = vsel %vm7274_vm6, %v2947_v46, %v2948_v36  ;;  %v524_v1 = vrot.slane %v522_v49, 5  ;;  %v5510_v54 = vrot.slane %v5494_v63, 9  ;;  %v7395_v41 = vld [vmem:[%s7014_s27 + $0xa0] sm:$0xf]  ;;  %v242_v46 = vld [vmem:[%s7014_s27 + $0xa4] sm:$0x1] }
  0x76   : > { %v519_v18 = vor.u32 %v518_v47, %v515_v48  ;;  %v511_v59 = vsel %vm7041_vm2, %v506_v51, %v510_v34  ;;  %v5533_v61 = vcombine.low %v2946_v44, %v2949_v55  ;;  %v528_v3 = vrot.slane %v526_v52, 4  ;;  %v7406_v51 = vld [vmem:[%s8924_s1 + $0xe0] sm:$0xff]  }
  0x77   : > { %v534_v4 = vrot.slane %v532_v53, 5  ;;  %v5201_v6 = vcombine.low %v501_v50, %v511_v59  ;;  %v2952_v9 = vrot.slane %v7119_v15, 5  ;;  %v2955_v20 = vrot.slane %v7135_v40, 5  ;;  %6241 = vmatpush3.bf16.msra.mxu0 %v6697_v35  ;;  %v6706_v15 = vld [vmem:[%s8924_s1 + $0xd8] sm:$0xff]  }
  0x78   : > { %v520_v60 = vrot.slane %v519_v18, 4  ;;  %6210 = vmatprep.mubr.msk.bf16.mxu0 %vm713_vm3, %v5533_v61  ;;  %v529_v16 = vor.u32 %v528_v3, %v524_v1  ;;  %v537_v19 = vshrl.u32 %v7367_v27, 16  ;;  %v540_v28 = vshll.u32 %v7367_v27, 16  ;;  %6242 = vmatprep.subr.bf16.mxu0 %v6700_v13  ;;  %v5496_v18 = vld [vmem:[%s7014_s27 + $0x48] sm:$0xe] }
  0x79   : > { %v546_v30 = vshll.u32 %v7370_v32, 16  ;;  %6026 = vmatprep.mubr.msk.bf16.mxu1 %vm713_vm3, %v5201_v6  ;;  %v2953_v34 = vsel %vm7274_vm6, %v5510_v54, %v2952_v9  ;;  %v2954_v25 = vrot.slane %v2952_v9, 4  ;;  %v550_v35 = vshrl.u32 %v7370_v32, 16  ;;  %v7415_v61 = vld [vmem:[%s7014_s27 + $0xa8] sm:$0xf] }
  0x7a   : > { %v525_v40 = vsel %vm7041_vm2, %v520_v60, %v524_v1  ;;  %v530_v36 = vrot.slane %v529_v16, 4  ;;  %v539_v37 = vrot.slane %v537_v19, 4  ;;  %v542_v38 = vrot.slane %v540_v28, 5  ;;  %v7422_v60 = vld [vmem:[%s7014_s27 + $0xac] sm:$0xf] }
  0x7b   : > { %v548_v39 = vrot.slane %v546_v30, 5  ;;  %v2956_v43 = vsel %vm7274_vm6, %v2954_v25, %v2955_v20  ;;  %v552_v26 = vrot.slane %v550_v35, 4  ;;  %v556_v44 = vshll.u32 %v241_v14, 16  ;;  %6243 = vmatpush3.bf16.msra.mxu0 %v6700_v13  ;;  %v243_v35 = vld [vmem:[%s7014_s27 + $0xb0] sm:$0x1] }
  0x7c   : > { %v5511_v63 = vrot.slane %v5495_v31, 9  ;;  %v535_v48 = vsel %vm7041_vm2, %v530_v36, %v534_v4  ;;  %v5534_v47 = vcombine.low %v2953_v34, %v2956_v43  ;;  %v543_v49 = vor.u32 %v542_v38, %v539_v37  ;;  %6244 = vmatprep.subr.bf16.mxu0 %v6706_v15  ;;  %v5497_v36 = vld [vmem:[%s7014_s27 + $0x54] sm:$0xe] }
  0x7d   : > { %v2959_v50 = vrot.slane %v7164_v21, 5  ;;  %v5202_v52 = vcombine.low %v525_v40, %v535_v48  ;;  %v553_v53 = vor.u32 %v552_v26, %v548_v39  ;;  %v558_v55 = vrot.slane %v556_v44, 5 }
  0x7e   : > { %v2962_v13 = vrot.slane %v7169_v33, 5  ;;  %6211 = vmatmul.mubr.msk.bf16.gmra.mrb[4].mxu0 %vm713_vm3, %v5534_v47  ;;  %v544_v1 = vrot.slane %v543_v49, 4  ;;  %v561_v59 = vshrl.u32 %v7392_v62, 16  ;;  %v564_v4 = vshll.u32 %v7392_v62, 16 }
  0x7f   : > { %v2960_v54 = vsel %vm7274_vm6, %v5511_v63, %v2959_v50  ;;  %v2961_v21 = vrot.slane %v2959_v50, 4  ;;  %6027 = vmatmul.mubr.msk.bf16.gmra.mrb[20].mxu1 %vm713_vm3, %v5202_v52  ;;  %v554_v3 = vrot.slane %v553_v53, 4  ;;  %v570_v6 = vshll.u32 %v7395_v41, 16  ;;  %6245 = vmatpush3.bf16.msra.mxu0 %v6706_v15  ;;  %v7444_v50 = vld [vmem:[%s7014_s27 + $0xb4] sm:$0xf] }
  0x80   : > { %v574_v33 = vshrl.u32 %v7395_v41, 16  ;;  %v549_v9 = vsel %vm7041_vm2, %v544_v1, %v548_v39  ;;  %v563_v14 = vrot.slane %v561_v59, 4  ;;  %v580_v16 = vshll.u32 %v242_v46, 16  ;;  %6278 = vmatprep.subr.bf16.mxu0 %v7406_v51 }
  0x81   : > { %v2963_v20 = vsel %vm7274_vm6, %v2961_v21, %v2962_v13  ;;  %v559_v19 = vsel %vm7041_vm2, %v554_v3, %v558_v55  ;;  %v566_v30 = vrot.slane %v564_v4, 5  ;;  %v572_v31 = vrot.slane %v570_v6, 5  ;;  %v7447_v13 = vld [vmem:[%s7014_s27 + $0xb8] sm:$0xf] }
  0x82   : > { %v5535_v28 = vcombine.low %v2960_v54, %v2963_v20  ;;  %v5203_v40 = vcombine.low %v549_v9, %v559_v19  ;;  %v576_v34 = vrot.slane %v574_v33, 4  ;;  %v582_v25 = vrot.slane %v580_v16, 5  ;;  %v244_v16 = vld [vmem:[%s7014_s27 + $0xbc] sm:$0x1]  ;;  %v5498_v19 = vld [vmem:[%s7014_s27 + $0x60] sm:$0xe] }
  0x83   : > { %v5512_v15 = vrot.slane %v5496_v18, 9  ;;  %v567_v37 = vor.u32 %v566_v30, %v563_v14  ;;  %v2966_v38 = vrot.slane %v7188_v2, 5  ;;  %v2969_v39 = vrot.slane %v7191_v7, 5 }
  0x84   : > { %6214 = vmatprep.mubr.msk.bf16.mxu0 %vm713_vm3, %v5535_v28  ;;  %v585_v43 = vshrl.u32 %v7415_v61, 16  ;;  %6030 = vmatprep.mubr.msk.bf16.mxu1 %vm713_vm3, %v5203_v40  ;;  %v577_v26 = vor.u32 %v576_v34, %v572_v31  ;;  %v588_v44 = vshll.u32 %v7415_v61, 16  ;;  %v594_v63 = vshll.u32 %v7422_v60, 16 }
  0x85   : > { %v598_v46 = vshrl.u32 %v7422_v60, 16  ;;  %v568_v48 = vrot.slane %v567_v37, 4  ;;  %v2967_v47 = vsel %vm7274_vm6, %v5512_v15, %v2966_v38  ;;  %v2968_v49 = vrot.slane %v2966_v38, 4  ;;  %v5424_v15 = vld [vmem:[%s7014_s27 + $0x70] sm:$0xf] }
  0x86   : > { %v587_v2 = vrot.slane %v585_v43, 4  ;;  %v578_v7 = vrot.slane %v577_v26, 4  ;;  %v590_v52 = vrot.slane %v588_v44, 5  ;;  %v596_v53 = vrot.slane %v594_v63, 5  ;;  %v5499_v43 = vld [vmem:[%s7014_s27 + $0x6c] sm:$0xe] }
  0x87   : > { %v600_v55 = vrot.slane %v598_v46, 4  ;;  %v573_v18 = vsel %vm7041_vm2, %v568_v48, %v572_v31  ;;  %v2970_v1 = vsel %vm7274_vm6, %v2968_v49, %v2969_v39  ;;  %v604_v54 = vshll.u32 %v243_v35, 16  ;;  %v5425_v35 = vld [vmem:[%s7014_s27 + $0x74] sm:$0x1] }
  0x88   : > { %v5513_v21 = vrot.slane %v5497_v36, 9  ;;  %v583_v59 = vsel %vm7041_vm2, %v578_v7, %v582_v25  ;;  %v5536_v3 = vcombine.low %v2967_v47, %v2970_v1  ;;  %v591_v4 = vor.u32 %v590_v52, %v587_v2 }
  0x89   : > { %v601_v6 = vor.u32 %v600_v55, %v596_v53  ;;  %v5204_v33 = vcombine.low %v573_v18, %v583_v59  ;;  %v606_v9 = vrot.slane %v604_v54, 5  ;;  %v2973_v20 = vrot.slane %v7211_v0, 5  ;;  %v5500_v59 = vld [vmem:[%s7014_s27 + $0x78] sm:$0xe] }
  0x8a   : > { %v2976_v14 = vrot.slane %v7216_v11, 5  ;;  %6215 = vmatmul.mubr.msk.bf16.gmra.mrb[8].mxu0 %vm713_vm3, %v5536_v3  ;;  %v592_v28 = vrot.slane %v591_v4, 4  ;;  %v609_v31 = vshrl.u32 %v7444_v50, 16  ;;  %v612_v40 = vshll.u32 %v7444_v50, 16 }
  0x8b   : > { %v602_v30 = vrot.slane %v601_v6, 4  ;;  %6031 = vmatmul.mubr.msk.bf16.gmra.mrb[24].mxu1 %vm713_vm3, %v5204_v33  ;;  %v2974_v34 = vsel %vm7274_vm6, %v5513_v21, %v2973_v20  ;;  %v2975_v25 = vrot.slane %v2973_v20, 4  ;;  %v618_v0 = vshll.u32 %v7447_v13, 16  ;;  %v7484_v6 = vld [vmem:[%s7014_s27 + $0x7c] sm:$0xf] }
  0x8c   : > { %v622_v11 = vshrl.u32 %v7447_v13, 16  ;;  %v597_v36 = vsel %vm7041_vm2, %v592_v28, %v596_v53  ;;  %v611_v38 = vrot.slane %v609_v31, 4  ;;  %v614_v39 = vrot.slane %v612_v40, 5  ;;  %v6764_v28 = vld [vmem:[%s7014_s27] sm:$0xf] }
  0x8d   : > { %v607_v37 = vsel %vm7041_vm2, %v602_v30, %v606_v9  ;;  %v2977_v44 = vsel %vm7274_vm6, %v2975_v25, %v2976_v14  ;;  %v620_v63 = vrot.slane %v618_v0, 5  ;;  %v628_v49 = vshll.u32 %v244_v16, 16  ;;  %v5430_v14 = vld [vmem:[%s7014_s27 + $0x88] sm:$0xf]  ;;  %v7500_v30 = vld [vmem:[%s7014_s27 + $0x4] sm:$0xf] }
  0x8e   : > { %v5205_v26 = vcombine.low %v597_v36, %v607_v37  ;;  %v624_v46 = vrot.slane %v622_v11, 4  ;;  %v5537_v48 = vcombine.low %v2974_v34, %v2977_v44  ;;  %v615_v47 = vor.u32 %v614_v39, %v611_v38  ;;  %v5431_v40 = vld [vmem:[%s7014_s27 + $0x8c] sm:$0x1]  ;;  %v5501_v34 = vld [vmem:[%s7014_s27 + $0x84] sm:$0xe] }
  0x8f   : > { %v5514_v2 = vrot.slane %v5498_v19, 9  ;;  %v2980_v52 = vrot.slane %v7242_v56, 5  ;;  %v2983_v53 = vrot.slane %v7250_v8, 5  ;;  %v5515_v55 = vrot.slane %v5499_v43, 9  ;;  %v7487_v8 = vld [vmem:[%s7014_s27 + $0x80] sm:$0x1] }
  0x90   : > { %6034 = vmatprep.mubr.msk.bf16.mxu1 %vm713_vm3, %v5205_v26  ;;  %v625_v7 = vor.u32 %v624_v46, %v620_v63  ;;  %6218 = vmatprep.mubr.msk.bf16.mxu0 %vm713_vm3, %v5537_v48  ;;  %v616_v18 = vrot.slane %v615_v47, 4  ;;  %v630_v1 = vrot.slane %v628_v49, 5  ;;  %v2987_v54 = vrot.slane %v5424_v15, 5  ;;  %v5433_v15 = vld [vmem:[%s7014_s27 + $0x94] sm:$0xf] }
  0x91   : > { %v2990_v21 = vrot.slane %v5425_v35, 5  ;;  %v2981_v4 = vsel %vm7274_vm6, %v5514_v2, %v2980_v52  ;;  %v2982_v56 = vrot.slane %v2980_v52, 4  ;;  %v5227_v31 = vcombine.low %v6764_v28, %v7500_v30  ;;  %v5434_v37 = vld [vmem:[%s7014_s27 + $0x98] sm:$0x1]  ;;  %v5502_v38 = vld [vmem:[%s7014_s27 + $0x90] sm:$0xe] }
  0x92   : > { %v626_v3 = vrot.slane %v625_v7, 4  ;;  %v621_v33 = vsel %vm7041_vm2, %v616_v18, %v620_v63  ;;  %v2988_v9 = vsel %vm7274_vm6, %v5515_v55, %v2987_v54  ;;  %v2989_v20 = vrot.slane %v2987_v54, 4  ;;  %v5436_v44 = vld [vmem:[%s7014_s27 + $0xa0] sm:$0xf]  ;;  %v5437_v2 = vld [vmem:[%s7014_s27 + $0xa4] sm:$0x1] }
  0x93   : > { %v2984_v19 = vsel %vm7274_vm6, %v2982_v56, %v2983_v53  ;;  %v5516_v36 = vrot.slane %v5500_v59, 9  ;;  %v2994_v39 = vrot.slane %v7484_v6, 5  ;;  %v2997_v43 = vrot.slane %v7487_v8, 5  ;;  %v6766_v7 = vld [vmem:[%s7014_s27 + $0xc] sm:$0xf] }
  0x94   : > { %v631_v16 = vsel %vm7041_vm2, %v626_v3, %v630_v1  ;;  %v5538_v0 = vcombine.low %v2981_v4, %v2984_v19  ;;  %v2991_v11 = vsel %vm7274_vm6, %v2989_v20, %v2990_v21  ;;  %v5517_v26 = vrot.slane %v5501_v34, 9  ;;  %v7522_v52 = vld [vmem:[%s7014_s27 + $0x10] sm:$0xf]  ;;  %v5503_v1 = vld [vmem:[%s7014_s27 + $0x9c] sm:$0xe] }
  0x95   : > { %v5206_v25 = vcombine.low %v621_v33, %v631_v16  ;;  %v5539_v35 = vcombine.low %v2988_v9, %v2991_v11  ;;  %v3001_v63 = vrot.slane %v5430_v14, 5  ;;  %v3004_v46 = vrot.slane %v5431_v40, 5  ;;  %v6768_v21 = vld [vmem:[%s7014_s27 + $0x18] sm:$0xf]  ;;  %v7532_v59 = vld [vmem:[%s7014_s27 + $0x1c] sm:$0xf] }
  0x96   : > { %6219 = vmatmul.mubr.msk.bf16.gmra.mrb[12].mxu0 %vm713_vm3, %v5538_v0  ;;  %v2995_v48 = vsel %vm7274_vm6, %v5516_v36, %v2994_v39  ;;  %v2996_v47 = vrot.slane %v2994_v39, 4  ;;  %v3008_v49 = vrot.slane %v5433_v15, 5  ;;  %v5228_v53 = vcombine.low %v6766_v7, %v7522_v52  ;;  %v6705_v33 = vld [vmem:[%s8924_s1 + $0x48] sm:$0xff]   ;;  %v5440_v0 = vld [vmem:[%s7014_s27 + $0xb0] sm:$0x1]  ;;  %v6770_v11 = vld [vmem:[%s8924_s1 + $0x40] sm:$0xff]  }
  0x97   : > { %6035 = vmatmul.mubr.msk.bf16.gmra.mrb[28].mxu1 %vm713_vm3, %v5206_v25  ;;  %6222 = vmatprep.mubr.msk.bf16.mxu0 %vm713_vm3, %v5539_v35  ;;  %v3002_v55 = vsel %vm7274_vm6, %v5517_v26, %v3001_v63  ;;  %v3003_v18 = vrot.slane %v3001_v63, 4  ;;  %v5229_v3 = vcombine.low %v6768_v21, %v7532_v59  ;;  %v5518_v4 = vrot.slane %v5502_v38, 9  ;;  %v5439_v40 = vld [vmem:[%s7014_s27 + $0xac] sm:$0xf]  ;;  %v5442_v25 = vld [vmem:[%s7014_s27 + $0xb8] sm:$0xf] }
  0x98   : > { %6046 = vmatprep.mubr.msk.bf16.mxu1 %vm713_vm3, %v5227_v31  ;;  %v2998_v54 = vsel %vm7274_vm6, %v2996_v47, %v2997_v43  ;;  %v3011_v56 = vrot.slane %v5434_v37, 5  ;;  %v3010_v14 = vrot.slane %v3008_v49, 4  ;;  %v3015_v16 = vrot.slane %v5436_v44, 5  ;;  %v5504_v36 = vld [vmem:[%s7014_s27 + $0xa8] sm:$0xe]  ;;  %v6711_v26 = vld [vmem:[%s8924_s1 + $0x50] sm:$0xff]  }
  0x99   : > { %v5540_v9 = vcombine.low %v2995_v48, %v2998_v54  ;;  %v3005_v20 = vsel %vm7274_vm6, %v3003_v18, %v3004_v46  ;;  %v5519_v28 = vrot.slane %v5503_v1, 9  ;;  %v3018_v31 = vrot.slane %v5437_v2, 5  ;;  %v5443_v44 = vld [vmem:[%s7014_s27 + $0xbc] sm:$0x1]  ;;  %v5505_v63 = vld [vmem:[%s7014_s27 + $0xb4] sm:$0xe] }
  0x9a   : > { %v5541_v19 = vcombine.low %v3002_v55, %v3005_v20  ;;  %v3017_v34 = vrot.slane %v3015_v16, 4  ;;  %v3009_v15 = vsel %vm7274_vm6, %v5518_v4, %v3008_v49  ;;  %v3012_v35 = vsel %vm7274_vm6, %v3010_v14, %v3011_v56  ;;  %v6771_v46 = vld [vmem:[%s7014_s27 + $0x24] sm:$0xf]  ;;  %v7566_v48 = vld [vmem:[%s7014_s27 + $0x28] sm:$0xf] }
  0x9b   : > { %v3022_v37 = vrot.slane %v5439_v40, 5  ;;  %v3016_v38 = vsel %vm7274_vm6, %v5519_v28, %v3015_v16  ;;  %v3029_v43 = vrot.slane %v5442_v25, 5  ;;  %v5230_v47 = vcombine.low %v6771_v46, %v7566_v48  ;;  %v6773_v2 = vld [vmem:[%s7014_s27 + $0x30] sm:$0xf]  ;;  %v7571_v7 = vld [vmem:[%s7014_s27 + $0x34] sm:$0xf] }
  0x9c   : > { %v3019_v39 = vsel %vm7274_vm6, %v3017_v34, %v3018_v31  ;;  %v5542_v49 = vcombine.low %v3009_v15, %v3012_v35  ;;  %v5520_v18 = vrot.slane %v5504_v36, 9  ;;  %v3025_v54 = vrot.slane %v5440_v0, 5  ;;  %v5445_v56 = vld [vmem:[%s7014_s27 + $0xc4] sm:$0xf]  ;;  %v5506_v14 = vld [vmem:[%s7014_s27 + $0xc0] sm:$0xe] }
  0x9d   : > { %v5543_v55 = vcombine.low %v3016_v38, %v3019_v39  ;;  %v3024_v1 = vrot.slane %v3022_v37, 4  ;;  %v5521_v21 = vrot.slane %v5505_v63, 9  ;;  %v3032_v4 = vrot.slane %v5443_v44, 5  ;;  %v5446_v31 = vld [vmem:[%s7014_s27 + $0xc8] sm:$0x1]  ;;  %v7595_v40 = vld [vmem:[%s8924_s1 + $0x60] sm:$0xff]  }
  0x9e   : > { %6223 = vmatmul.mubr.msk.bf16.gmra.mrb[16].mxu0 %vm713_vm3, %v5540_v9  ;;  %v6721_v9 = vld [vmem:[%s8924_s1 + $0x58] sm:$0xff]   ;;  %v3036_v16 = vrot.slane %v5445_v56, 5  ;;  %v7599_v25 = vld [vmem:[%s7014_s27 + $0x40] sm:$0xf]  ;;  %v5522_v15 = vrot.slane %v5506_v14, 9  ;;  %v2385_v63 = vshll.u32 %v7484_v6, 16 }
  0x9f   : > { %6047 = vmatmul.mubr.msk.bf16.vlgmr.msra.gmra.mrb[0].mxu1 %vm713_vm3, %v5228_v53  ;;  %6226 = vmatprep.mubr.msk.bf16.mxu0 %vm713_vm3, %v5541_v19  ;;  %v5231_v53 = vcombine.low %v6773_v2, %v7571_v7  ;;  %v3026_v20 = vsel %vm7274_vm6, %v3024_v1, %v3025_v54  ;;  %v3030_v19 = vsel %vm7274_vm6, %v5521_v21, %v3029_v43  ;;  %v6775_v34 = vld [vmem:[%s7014_s27 + $0x3c] sm:$0xf]  ;;  %v6777_v35 = vld [vmem:[%s7014_s27 + $0x48] sm:$0xf]  ;;  %v7604_v36 = vld [vmem:[%s7014_s27 + $0x4c] sm:$0xf] }
  0xa0   : > { %6079 = vmatpush3.bf16.msra.mxu1 %v6770_v11  ;;  %6050 = vmatprep.mubr.msk.bf16.mxu1 %vm713_vm3, %v5229_v3  ;;  %v3031_v3 = vrot.slane %v3029_v43, 4  ;;  %v5232_v0 = vcombine.low %v6775_v34, %v7599_v25  ;;  %v3038_v39 = vrot.slane %v3036_v16, 4  ;;  %v3039_v43 = vrot.slane %v5446_v31, 5  ;;  %v1239_v56 = vld [vmem:[%s7014_s27 + $0x24] sm:$0xe] }
  0xa1   : > { %6080 = vmatprep.subr.bf16.mxu1 %v6705_v33  ;;  %v2389_v46 = vshrl.u32 %v7484_v6, 16  ;;  %v5235_v2 = vcombine.low %v7254_v12, %v7257_v24  ;;  %v7624_v1 = vrot.slane %v2385_v63, 5  ;;  %v1296_v21 = vrot.slane %v7522_v52, 5  ;;  %v1237_v12 = vld [vmem:[%s7014_s27 + $0xc] sm:$0xe] }
  0xa2   : > { %v3033_v28 = vsel %vm7274_vm6, %v3031_v3, %v3032_v4  ;;  %v3040_v44 = vsel %vm7274_vm6, %v3038_v39, %v3039_v43  ;;  %v6780_v24 = vld [vmem:[%s7014_s27 + $0x14] sm:$0x1]  ;;  %v1238_v3 = vld [vmem:[%s7014_s27 + $0x18] sm:$0xe]  ;;  %v1303_v52 = vrot.slane %v7532_v59, 5  ;;  %v2395_v4 = vshll.u32 %v7487_v8, 16 }
  0xa3   : > { %v5545_v38 = vcombine.low %v3030_v19, %v3033_v28  ;;  %8944 = vst [vmem:[#allocation5_spill] sm:$0xff] %v7624_v1  ;;  %v7626_v54 = vrot.slane %v2389_v46, 4  ;;  %v1299_v6 = vrot.slane %v6780_v24, 5  ;;  %v5237_v19 = vcombine.low %v7308_v45, %v7319_v42  ;;  %v6717_v59 = vld [vmem:[%s7014_s27 + $0x30] sm:$0xff]   ;;  %v6723_v8 = vld [vmem:[%s8924_s1 + $0xe8] sm:$0xff]  }
  0xa4   : > { %6081 = vmatpush3.bf16.msra.mxu1 %v6705_v33  ;;  %v3023_v33 = vsel %vm7274_vm6, %v5520_v18, %v3022_v37  ;;  %v5233_v37 = vcombine.low %v6777_v35, %v7604_v36  ;;  %v5265_v31 = vrot.slane %v1238_v3, 9  ;;  %v1240_v34 = vld [vmem:[%s7014_s27 + $0x30] sm:$0xe]  ;;  %v5238_v35 = vcombine.low %v7333_v5, %v7337_v10  ;;  %v5643_v24 = vld [vmem:[%s7014_s27 + $0x18] sm:$0xf] }
  0xa5   : > { %6082 = vmatprep.subr.bf16.mxu1 %v6711_v26  ;;  %v5544_v11 = vcombine.low %v3023_v33, %v3026_v20  ;;  %v5236_v33 = vcombine.low %v7279_v58, %v7291_v17  ;;  %v6715_v20 = vld [vmem:[%s7014_s27 + $0x24] sm:$0xff]   ;;  %v5266_v58 = vrot.slane %v1239_v56, 9  ;;  %v1317_v17 = vrot.slane %v7571_v7, 5 }
  0xa6   : > { %6227 = vmatmul.mubr.msk.bf16.gmra.mrb[20].mxu0 %vm713_vm3, %v5542_v49  ;;  %v5239_v45 = vcombine.low %v7367_v27, %v7370_v32  ;;  %v5240_v39 = vcombine.low %v7392_v62, %v7395_v41  ;;  %v6788_v10 = vld [vmem:[%s7014_s27 + $0x64] sm:$0xf] }
  0xa7   : > { %6051 = vmatmul.mubr.msk.bf16.gmra.mrb[4].mxu1 %vm713_vm3, %v5230_v47  ;;  %6230 = vmatprep.mubr.msk.bf16.mxu0 %vm713_vm3, %v5543_v55  ;;  %v5234_v47 = vcombine.low %v7224_v22, %v7227_v23  ;;  %v6779_v55 = vld [vmem:[%s7014_s27 + $0x8] sm:$0x1]  ;;  %v1236_v22 = vld [vmem:[%s7014_s27] sm:$0xe]  ;;  %v1289_v23 = vrot.slane %v7500_v30, 5 }
  0xa8   : > { %6054 = vmatprep.mubr.msk.bf16.mxu1 %vm713_vm3, %v5231_v53  ;;  %6083 = vmatpush3.bf16.msra.mxu1 %v6711_v26  ;;  %v3037_v26 = vsel %vm7274_vm6, %v5522_v15, %v3036_v16  ;;  %v6712_v53 = vld [vmem:[%s7014_s27 + $0x18] sm:$0xff]   ;;  %v1292_v18 = vrot.slane %v6779_v55, 5  ;;  %v5263_v14 = vrot.slane %v1236_v22, 9  ;;  %v5264_v16 = vrot.slane %v1237_v12, 9  ;;  %v1242_v22 = vld [vmem:[%s7014_s27 + $0x48] sm:$0xe] }
  0xa9   : > { %6084 = vmatprep.subr.bf16.mxu1 %v6721_v9  ;;  %v5546_v49 = vcombine.low %v3037_v26, %v3040_v44  ;;  %v1291_v28 = vrot.slane %v1289_v23, 4  ;;  %v1324_v26 = vrot.slane %v7599_v25, 5  ;;  %v7672_v44 = vrot.slane %v2395_v4, 5  ;;  %v1241_v25 = vld [vmem:[%s7014_s27 + $0x3c] sm:$0xe] }
  0xaa   : > { %v7665_v43 = vsel %vm7274_vm6, %v5263_v14, %v1289_v23  ;;  %v7669_v7 = vsel %vm7274_vm6, %v5264_v16, %v1296_v21  ;;  %v1319_v55 = vrot.slane %v1317_v17, 4  ;;  %v5268_v3 = vrot.slane %v1241_v25, 9  ;;  %v6784_v4 = vld [vmem:[%s7014_s27 + $0x44] sm:$0x1]  ;;  %v6722_v14 = vld [vmem:[%s7014_s27 + $0x48] sm:$0xff]  }
  0xab   : > { %8945 = vst [vmem:[#allocation6_spill] sm:$0xff] %v7672_v44  ;;  %v7678_v63 = vsel %vm7274_vm6, %v1291_v28, %v1292_v18  ;;  %v6783_v18 = vld [vmem:[%s7014_s27 + $0x38] sm:$0x1]  ;;  %v1327_v56 = vrot.slane %v6784_v4, 5  ;;  %v7726_v28 = vld [vmem:[%s7014_s27 + $0x54] sm:$0xe] }
  0xac   : > { %6085 = vmatpush3.bf16.msra.mxu1 %v6721_v9  ;;  %v1310_v9 = vrot.slane %v7566_v48, 5  ;;  %v1298_v48 = vrot.slane %v1296_v21, 4  ;;  %v1320_v21 = vrot.slane %v6783_v18, 5  ;;  %v6785_v25 = vld [vmem:[%s7014_s27 + $0x50] sm:$0x1] }
  0xad   : > { %6118 = vmatprep.subr.bf16.mxu1 %v7595_v40  ;;  %v5646_v18 = vld [vmem:[%s7014_s27 + $0x24] sm:$0xf] }
  0xae   : > { %6231 = vmatmul.mubr.msk.bf16.gmra.mrb[24].mxu0 %vm713_vm3, %v5544_v11  ;;  %v6781_v11 = vld [vmem:[%s7014_s27 + $0x20] sm:$0x1]  ;;  %v1312_v42 = vrot.slane %v1310_v9, 4  ;;  %v7682_v46 = vsel %vm7274_vm6, %v1298_v48, %v1299_v6  ;;  %v7705_v23 = vsel %vm7274_vm6, %v5266_v58, %v1310_v9  ;;  %v5644_v6 = vld [vmem:[%s7014_s27 + $0x1c] sm:$0xf]  ;;  %v7734_v48 = vsel %vm7274_vm6, %v1319_v55, %v1320_v21 }
  0xaf   : > { %6055 = vmatmul.mubr.msk.bf16.gmra.mrb[8].mxu1 %vm713_vm3, %v5232_v0  ;;  %6234 = vmatprep.mubr.msk.bf16.mxu0 %vm713_vm3, %v5545_v38  ;;  %v1305_v0 = vrot.slane %v1303_v52, 4  ;;  %v1306_v15 = vrot.slane %v6781_v11, 5  ;;  %v3811_v58 = vshll.u32 %v5644_v6, 16  ;;  %v5645_v55 = vld [vmem:[%s7014_s27 + $0x20] sm:$0x1]  ;;  %v5270_v21 = vrot.slane %v7726_v28, 9 }
  0xb0   : > { %6058 = vmatprep.mubr.msk.bf16.mxu1 %vm713_vm3, %v5233_v37  ;;  %v6782_v37 = vld [vmem:[%s7014_s27 + $0x2c] sm:$0x1]  ;;  %v6725_v28 = vld [vmem:[%s7014_s27 + $0x54] sm:$0xff]  }
  0xb1   : > { %v1313_v38 = vrot.slane %v6782_v37, 5  ;;  %v7781_v32 = vrot.slane %v3811_v58, 5  ;;  %v5650_v58 = vld [vmem:[%s7014_s27 + $0x34] sm:$0xf] }
  0xb2   : > { %v3859_v9 = vshll.u32 %v5650_v58, 16 }
  0xb3   : > { %v7709_v12 = vsel %vm7274_vm6, %v1312_v42, %v1313_v38  ;;  %v7746_v42 = vsel %vm7274_vm6, %v5268_v3, %v1324_v26 }
  0xb6   : > { %6235 = vmatmul.mubr.msk.bf16.gmra.mrb[28].mxu0 %vm713_vm3, %v5546_v49  ;;  %v6732_v49 = vld [vmem:[%s8924_s1 + $0xf0] sm:$0xff]  }
  0xb7   : > { %6059 = vmatmul.mubr.msk.bf16.gmra.mrb[12].mxu1 %vm713_vm3, %v5234_v47  ;;  %6246 = vmatprep.mubr.msk.bf16.mxu0 %vm713_vm3, %v6712_v53  ;;  %v7686_v47 = vsel %vm7274_vm6, %v5265_v31, %v1303_v52  ;;  %v5267_v53 = vrot.slane %v1240_v34, 9  ;;  %v1326_v52 = vrot.slane %v1324_v26, 4  ;;  %v7737_v31 = vld [vmem:[%s7014_s27 + $0x60] sm:$0xe]  ;;  %v3802_v34 = vshrl.u32 %v5643_v24, 16 }
  0xb8   : > { %6062 = vmatprep.mubr.msk.bf16.mxu1 %vm713_vm3, %v5235_v2  ;;  %v7696_v2 = vsel %vm7274_vm6, %v1305_v0, %v1306_v15  ;;  %v3805_v0 = vshll.u32 %v5643_v24, 16  ;;  %v5269_v15 = vrot.slane %v1242_v22, 9  ;;  %v6786_v22 = vld [vmem:[%s7014_s27 + $0x58] sm:$0xf]  ;;  %v5271_v5 = vrot.slane %v7737_v31, 9  ;;  %v6727_v31 = vld [vmem:[%s7014_s27 + $0x60] sm:$0xff]  }
  0xb9   : > { %v7750_v37 = vsel %vm7274_vm6, %v1326_v52, %v1327_v56  ;;  %v1338_v24 = vrot.slane %v6786_v22, 5  ;;  %v5647_v52 = vld [vmem:[%s7014_s27 + $0x28] sm:$0xf]  ;;  %v3804_v4 = vrot.slane %v3802_v34, 4  ;;  %v6789_v22 = vld [vmem:[%s7014_s27 + $0x70] sm:$0xf] }
  0xba   : > { %v3807_v56 = vrot.slane %v3805_v0, 5  ;;  %v7794_v0 = vld [vmem:[%s8924_s1 + $0x100] sm:$0xff]   ;;  %v6790_v26 = vld [vmem:[%s7014_s27 + $0x68] sm:$0x1] }
  0xbb   : > { %v1348_v11 = vrot.slane %v6790_v26, 5  ;;  %v6791_v26 = vld [vmem:[%s7014_s27 + $0x74] sm:$0x1]  ;;  %v7821_v62 = vsel %vm7274_vm6, %v5270_v21, %v1338_v24 }
  0xbe   : > { %6247 = vmatmul.mubr.msk.bf16.vlgmr.msra.gmra.mrb[0].mxu0 %vm713_vm3, %v6715_v20  ;;  %v6719_v20 = vld [vmem:[%s7014_s27 + $0x3c] sm:$0xff]  }
  0xbf   : > { %6063 = vmatmul.mubr.msk.bf16.gmra.mrb[16].mxu1 %vm713_vm3, %v5236_v33  ;;  %6279 = vmatpush3.bf16.msra.mxu0 %v7406_v51  ;;  %v1331_v33 = vrot.slane %v7604_v36, 5  ;;  %v7730_v36 = vsel %vm7274_vm6, %v5267_v53, %v1317_v17  ;;  %v3815_v17 = vshrl.u32 %v5644_v6, 16  ;;  %v1334_v53 = vrot.slane %v6785_v25, 5  ;;  %v6787_v6 = vld [vmem:[%s7014_s27 + $0x5c] sm:$0x1] }
  0xc0   : > { %6066 = vmatprep.mubr.msk.bf16.mxu1 %vm713_vm3, %v5237_v19  ;;  %6250 = vmatprep.mubr.msk.bf16.mxu0 %vm713_vm3, %v6717_v59  ;;  %v1341_v3 = vrot.slane %v6787_v6, 5  ;;  %v1352_v6 = vrot.slane %v6789_v22, 5  ;;  %v3839_v25 = vshrl.u32 %v5647_v52, 16  ;;  %v5648_v19 = vld [vmem:[%s7014_s27 + $0x2c] sm:$0x1] }
  0xc1   : > { %6280 = vmatprep.subr.bf16.mxu0 %v6723_v8  ;;  %v1333_v38 = vrot.slane %v1331_v33, 4  ;;  %v7779_v27 = vsel %vm7274_vm6, %v5269_v15, %v1331_v33  ;;  %v3826_v33 = vshrl.u32 %v5646_v18, 16  ;;  %v3829_v15 = vshll.u32 %v5646_v18, 16 }
  0xc2   : > { %v3863_v18 = vshrl.u32 %v5650_v58, 16  ;;  %v1246_v58 = vld [vmem:[%s7014_s27 + $0x78] sm:$0xe] }
  0xc3   : > { %6281 = vmatpush3.bf16.msra.mxu0 %v6723_v8  ;;  %v6738_v8 = vld [vmem:[%s8924_s1 + $0xf8] sm:$0xff]   ;;  %v7789_v34 = vsel %vm7274_vm6, %v1333_v38, %v1334_v53  ;;  %v3828_v22 = vrot.slane %v3826_v33, 4  ;;  %v3831_v51 = vrot.slane %v3829_v15, 5  ;;  %v3845_v33 = vshll.u32 %v5648_v19, 16 }
  0xc4   : > { %6282 = vmatprep.subr.bf16.mxu0 %v6732_v49  ;;  %v6731_v15 = vld [vmem:[%s7014_s27 + $0x78] sm:$0xff]  }
  0xc6   : > { %6251 = vmatmul.mubr.msk.bf16.gmra.mrb[4].mxu0 %vm713_vm3, %v6719_v20  ;;  %v5649_v20 = vld [vmem:[%s7014_s27 + $0x30] sm:$0xf] }
  0xc7   : > { %6067 = vmatmul.mubr.msk.bf16.gmra.mrb[20].mxu1 %vm713_vm3, %v5238_v35  ;;  %6254 = vmatprep.mubr.msk.bf16.mxu0 %vm713_vm3, %v6722_v14  ;;  %v1345_v35 = vrot.slane %v6788_v10, 5  ;;  %v7784_v14 = vld [vmem:[%s7014_s27 + $0x6c] sm:$0xe]  ;;  %v3835_v10 = vshll.u32 %v5647_v52, 16  ;;  %v3850_v38 = vshrl.u32 %v5649_v20, 16  ;;  %v3853_v53 = vshll.u32 %v5649_v20, 16 }
  0xc8   : > { %6070 = vmatprep.mubr.msk.bf16.mxu1 %vm713_vm3, %v5239_v45  ;;  %6283 = vmatpush3.bf16.msra.mxu0 %v6732_v49  ;;  %v3817_v45 = vrot.slane %v3815_v17, 4  ;;  %v3821_v49 = vshll.u32 %v5645_v55, 16  ;;  %v1340_v17 = vrot.slane %v1338_v24, 4  ;;  %v3808_v55 = vor.u32 %v3807_v56, %v3804_v4 }
  0xc9   : > { %6284 = vmatprep.subr.bf16.mxu0 %v6738_v8  ;;  %v1347_v30 = vrot.slane %v1345_v35, 4  ;;  %v5272_v52 = vrot.slane %v7784_v14, 9  ;;  %v1355_v4 = vrot.slane %v6791_v26, 5  ;;  %v7811_v56 = vrot.slane %v3835_v10, 5 }
  0xca   : > { %v3818_v59 = vor.u32 %v3817_v45, %v7781_v32  ;;  %v7801_v16 = vrot.slane %v3821_v49, 5  ;;  %v3841_v20 = vrot.slane %v3839_v25, 4  ;;  %v5651_v45 = vld [vmem:[%s7014_s27 + $0x38] sm:$0x1]  ;;  %v8946_v14 = vcombine.low %v7415_v61, %v7422_v60 }
  0xcb   : > { %v7825_v41 = vsel %vm7274_vm6, %v1340_v17, %v1341_v3  ;;  %v3809_v25 = vrot.slane %v3808_v55, 4  ;;  %v7827_v61 = vrot.slane %v3859_v9, 5  ;;  %v3865_v60 = vrot.slane %v3863_v18, 4  ;;  %v6729_v3 = vld [vmem:[%s7014_s27 + $0x6c] sm:$0xff]   ;;  %v6792_v17 = vld [vmem:[%s7014_s27 + $0x7c] sm:$0xf] }
  0xcc   : > { %6285 = vmatpush3.bf16.msra.mxu0 %v6738_v8  ;;  %v1354_v8 = vrot.slane %v1352_v6, 4  ;;  %v3819_v49 = vrot.slane %v3818_v59, 4  ;;  %v7833_v21 = vsel %vm7274_vm6, %v5271_v5, %v1345_v35  ;;  %v3832_v24 = vor.u32 %v3831_v51, %v3828_v22  ;;  %v6793_v22 = vld [vmem:[%s7014_s27 + $0x88] sm:$0xf] }
  0xcd   : > { %6318 = vmatprep.subr.bf16.mxu0 %v7794_v0  ;;  %v3842_v9 = vor.u32 %v3841_v20, %v7811_v56  ;;  %v1359_v10 = vrot.slane %v6792_v17, 5  ;;  %v7844_v5 = vsel %vm7274_vm6, %v1347_v30, %v1348_v11  ;;  %v7848_v51 = vsel %vm7274_vm6, %v5272_v52, %v1352_v6  ;;  %v1247_v11 = vld [vmem:[%s7014_s27 + $0x84] sm:$0xe]  ;;  %v5653_v52 = vld [vmem:[%s7014_s27 + $0x40] sm:$0xf] }
  0xce   : > { %6255 = vmatmul.mubr.msk.bf16.gmra.mrb[8].mxu0 %vm713_vm3, %v6725_v28  ;;  %v3855_v28 = vrot.slane %v3853_v53, 5  ;;  %v7852_v19 = vsel %vm7274_vm6, %v1354_v8, %v1355_v4  ;;  %v5652_v53 = vld [vmem:[%s7014_s27 + $0x3c] sm:$0xf]  ;;  %v3814_v55 = vsel %vm7041_vm2, %v3809_v25, %v7781_v32  ;;  %v3824_v18 = vsel %vm7041_vm2, %v3819_v49, %v7801_v16  ;;  %v6794_v20 = vld [vmem:[%s7014_s27 + $0x80] sm:$0x1] }
  0xcf   : > { %6071 = vmatmul.mubr.msk.bf16.gmra.mrb[24].mxu1 %vm713_vm3, %v5240_v39  ;;  %6258 = vmatprep.mubr.msk.bf16.mxu0 %vm713_vm3, %v6727_v31  ;;  %v3852_v39 = vrot.slane %v3850_v38, 4  ;;  %v3869_v38 = vshll.u32 %v5651_v45, 16  ;;  %v3866_v30 = vor.u32 %v3865_v60, %v7827_v61  ;;  %v1366_v6 = vrot.slane %v6793_v22, 5  ;;  %v6734_v22 = vld [vmem:[%s7014_s27 + $0x90] sm:$0xff]  }
  0xd0   : > { %6074 = vmatprep.mubr.msk.bf16.mxu1 %vm713_vm3, %v8946_v14  ;;  %v3833_v26 = vrot.slane %v3832_v24, 4  ;;  %v3847_v8 = vrot.slane %v3845_v33, 5  ;;  %v5273_v4 = vrot.slane %v1246_v58, 9  ;;  %v1362_v45 = vrot.slane %v6794_v20, 5  ;;  %v6733_v33 = vld [vmem:[%s7014_s27 + $0x84] sm:$0xff]  }
  0xd1   : > { %v3856_v35 = vor.u32 %v3855_v28, %v3852_v39  ;;  %v8947_v32 = vcombine.low %v7444_v50, %v7447_v13  ;;  %v3843_v16 = vrot.slane %v3842_v9, 4  ;;  %v1361_v14 = vrot.slane %v1359_v10, 4  ;;  %v5654_v13 = vld [vmem:[%s7014_s27 + $0x44] sm:$0x1]  ;;  %v6795_v58 = vld [vmem:[%s7014_s27 + $0x8c] sm:$0x1] }
  0xd2   : > { %v3871_v39 = vrot.slane %v3869_v38, 5  ;;  %v3874_v28 = vshrl.u32 %v5652_v53, 16  ;;  %v8948_v25 = vcombine.low %v7665_v43, %v7678_v63  ;;  %v5274_v50 = vrot.slane %v1247_v11, 9  ;;  %v5655_v43 = vld [vmem:[%s7014_s27 + $0x48] sm:$0xf] }
  0xd3   : > { %v3857_v49 = vrot.slane %v3856_v35, 4  ;;  %v3877_v60 = vshll.u32 %v5652_v53, 16  ;;  %v3883_v24 = vshll.u32 %v5653_v52, 16  ;;  %v1368_v9 = vrot.slane %v1366_v6, 4  ;;  %v7891_v11 = vld [vmem:[%s7014_s27 + $0x4c] sm:$0xf] }
  0xd4   : > { %v1369_v17 = vrot.slane %v6795_v58, 5  ;;  %v3887_v38 = vshrl.u32 %v5653_v52, 16  ;;  %v7888_v53 = vsel %vm7274_vm6, %v5273_v4, %v1359_v10  ;;  %v6736_v52 = vld [vmem:[%s8924_s1 + $0x68] sm:$0xff]   ;;  %v7905_v10 = vsel %vm7274_vm6, %v1361_v14, %v1362_v45  ;;  %v7908_v20 = vld [vmem:[%s7014_s27 + $0x58] sm:$0xf] }
  0xd5   : > { %v3876_v4 = vrot.slane %v3874_v28, 4  ;;  %v3893_v14 = vshll.u32 %v5654_v13, 16  ;;  %v1248_v28 = vld [vmem:[%s7014_s27 + $0x90] sm:$0xe]  ;;  %v3898_v58 = vshrl.u32 %v5655_v43, 16  ;;  %v3901_v35 = vshll.u32 %v5655_v43, 16 }
  0xd6   : > { %6259 = vmatmul.mubr.msk.bf16.gmra.mrb[12].mxu0 %vm713_vm3, %v6729_v3  ;;  %v3867_v3 = vrot.slane %v3866_v30, 4  ;;  %v5658_v30 = vld [vmem:[%s7014_s27 + $0x54] sm:$0xf]  ;;  %v7923_v45 = vsel %vm7274_vm6, %v1368_v9, %v1369_v17  ;;  %v5275_v9 = vrot.slane %v1248_v28, 9  ;;  %v5661_v17 = vld [vmem:[%s7014_s27 + $0x60] sm:$0xf] }
  0xd7   : > { %6075 = vmatmul.mubr.msk.bf16.gmra.mrb[28].mxu1 %vm713_vm3, %v8947_v32  ;;  %6262 = vmatprep.mubr.msk.bf16.mxu0 %vm713_vm3, %v6731_v15  ;;  %v7882_v15 = vcombine.low %v3814_v55, %v3824_v18  ;;  %v3838_v55 = vsel %vm7041_vm2, %v3833_v26, %v7811_v56  ;;  %v3848_v18 = vsel %vm7041_vm2, %v3843_v16, %v3847_v8  ;;  %v3879_v56 = vrot.slane %v3877_v60, 5  ;;  %v6797_v63 = vld [vmem:[%s7014_s27 + $0x98] sm:$0x1] }
  0xd8   : > { %6086 = vmatprep.mubr.msk.bf16.mxu1 %vm713_vm3, %v8948_v25  ;;  %v3862_v32 = vsel %vm7041_vm2, %v3857_v49, %v7827_v61  ;;  %v7915_v25 = vsel %vm7274_vm6, %v5274_v50, %v1366_v6  ;;  %v7917_v26 = vrot.slane %v3883_v24, 5  ;;  %v3872_v8 = vsel %vm7041_vm2, %v3867_v3, %v3871_v39  ;;  %v7934_v39 = vld [vmem:[%s7014_s27 + $0x50] sm:$0x1] }
  0xd9   : > { %v3889_v16 = vrot.slane %v3887_v38, 4  ;;  %v3907_v61 = vshll.u32 %v7891_v11, 16  ;;  %v3911_v6 = vshrl.u32 %v7891_v11, 16  ;;  %v8949_v49 = vcombine.low %v7669_v7, %v7682_v46  ;;  %v7949_v38 = vld [vmem:[%s7014_s27 + $0x64] sm:$0xf] }
  0xda   : > { %v3922_v50 = vshrl.u32 %v5658_v30, 16  ;;  %v3925_v13 = vshll.u32 %v5658_v30, 16  ;;  %v3931_v60 = vshll.u32 %v7908_v20, 16  ;;  %v3935_v24 = vshrl.u32 %v7908_v20, 16  ;;  %8951 = vst [vmem:[#allocation7_spill] sm:$0xff] %v7949_v38 }
  0xdb   : > { %v8950_v3 = vcombine.low %v7686_v47, %v7696_v2  ;;  %v7943_v7 = vcombine.low %v3838_v55, %v3848_v18  ;;  %v6742_v47 = vld [vmem:[%s8924_s1 + $0x70] sm:$0xff]   ;;  %v7956_v2 = vcombine.low %v3862_v32, %v3872_v8  ;;  %v3890_v30 = vor.u32 %v3889_v16, %v7917_v26  ;;  %v6737_v18 = vld [vmem:[%s7014_s27 + $0xa8] sm:$0xff]  }
  0xdc   : > { %v7961_v55 = vrot.slane %v3893_v14, 5  ;;  %v3913_v28 = vrot.slane %v3911_v6, 4  ;;  %v3924_v32 = vrot.slane %v3922_v50, 4  ;;  %v3927_v8 = vrot.slane %v3925_v13, 5  ;;  %v6796_v16 = vld [vmem:[%s7014_s27 + $0x94] sm:$0xf] }
  0xdd   : > { %v3937_v46 = vrot.slane %v3935_v24, 4  ;;  %v1373_v14 = vrot.slane %v6796_v16, 5  ;;  %v3946_v6 = vshrl.u32 %v5661_v17, 16  ;;  %v3949_v59 = vshll.u32 %v5661_v17, 16 }
  0xde   : > { %6263 = vmatmul.mubr.msk.bf16.gmra.mrb[16].mxu0 %vm713_vm3, %v6733_v33  ;;  %v3880_v33 = vor.u32 %v3879_v56, %v3876_v4  ;;  %v3900_v4 = vrot.slane %v3898_v58, 4  ;;  %v7964_v56 = vrot.slane %v3907_v61, 5  ;;  %v1376_v58 = vrot.slane %v6797_v63, 5  ;;  %v7977_v61 = vld [vmem:[%s7014_s27 + $0x5c] sm:$0x1] }
  0xdf   : > { %6087 = vmatmul.mubr.msk.bf16.vlgmr.msra.gmra.mrb[0].mxu1 %vm713_vm3, %v8949_v49  ;;  %6266 = vmatprep.mubr.msk.bf16.mxu0 %vm713_vm3, %v6734_v22  ;;  %v3903_v22 = vrot.slane %v3901_v35, 5  ;;  %v7967_v49 = vld [vmem:[%s7014_s27 + $0x9c] sm:$0xe]  ;;  %v3917_v35 = vshll.u32 %v7934_v39, 16  ;;  %8952 = vst [vmem:[#allocation8_spill] sm:$0xff] %v7977_v61  ;;  %v3955_v50 = vshll.u32 %v7949_v38, 16  ;;  %v8953_v17 = vcombine.low %v7705_v23, %v7709_v12 }
  0xe0   : > { %6119 = vmatpush3.bf16.msra.mxu1 %v7595_v40  ;;  %6090 = vmatprep.mubr.msk.bf16.mxu1 %vm713_vm3, %v8950_v3  ;;  %v6735_v40 = vld [vmem:[%s7014_s27 + $0x9c] sm:$0xff]   ;;  %v7969_v3 = vrot.slane %v3931_v60, 5  ;;  %v7971_v43 = vrot.slane %v3880_v33, 4  ;;  %v3959_v13 = vshrl.u32 %v7949_v38, 16  ;;  %v7981_v60 = vrot.slane %v3890_v30, 4 }
  0xe1   : > { %6120 = vmatprep.subr.bf16.mxu1 %v6736_v52  ;;  %v3904_v24 = vor.u32 %v3903_v22, %v3900_v4  ;;  %v3914_v63 = vor.u32 %v3913_v28, %v7964_v56  ;;  %v6798_v33 = vld [vmem:[%s7014_s27 + $0xa0] sm:$0xf]  ;;  %v7995_v30 = vsel %vm7274_vm6, %v5275_v9, %v1373_v14  ;;  %v3928_v31 = vor.u32 %v3927_v8, %v3924_v32  ;;  %v1250_v9 = vld [vmem:[%s7014_s27 + $0xa8] sm:$0xe]  ;;  %v6799_v28 = vld [vmem:[%s7014_s27 + $0xac] sm:$0xf] }
  0xe2   : > { %v1380_v16 = vrot.slane %v6798_v33, 5  ;;  %v3938_v44 = vor.u32 %v3937_v46, %v7969_v3  ;;  %v3941_v4 = vshll.u32 %v7977_v61, 16  ;;  %v8954_v22 = vcombine.low %v7730_v36, %v7734_v48  ;;  %v1251_v61 = vld [vmem:[%s7014_s27 + $0xb4] sm:$0xe] }
  0xe3   : > { %v1375_v23 = vrot.slane %v1373_v14, 4  ;;  %v3919_v12 = vrot.slane %v3917_v35, 5  ;;  %v1387_v32 = vrot.slane %v6799_v28, 5  ;;  %v3948_v46 = vrot.slane %v3946_v6, 4  ;;  %v6800_v35 = vld [vmem:[%s7014_s27 + $0xa4] sm:$0x1] }
  0xe4   : > { %6121 = vmatpush3.bf16.msra.mxu1 %v6736_v52  ;;  %v6744_v52 = vld [vmem:[%s8924_s1 + $0x78] sm:$0xff]   ;;  %v3951_v8 = vrot.slane %v3949_v59, 5  ;;  %v8007_v33 = vrot.slane %v3955_v50, 5  ;;  %v3961_v36 = vrot.slane %v3959_v13, 4  ;;  %v3905_v48 = vrot.slane %v3904_v24, 4  ;;  %v6740_v59 = vld [vmem:[%s7014_s27 + $0xc0] sm:$0xff]  }
  0xe5   : > { %6122 = vmatprep.subr.bf16.mxu1 %v6742_v47  ;;  %v1382_v14 = vrot.slane %v1380_v16, 4  ;;  %v3929_v38 = vrot.slane %v3928_v31, 4  ;;  %v3943_v6 = vrot.slane %v3941_v4, 5  ;;  %v5277_v28 = vrot.slane %v1250_v9, 9 }
  0xe6   : > { %6267 = vmatmul.mubr.msk.bf16.gmra.mrb[20].mxu0 %vm713_vm3, %v6735_v40  ;;  %v5276_v40 = vrot.slane %v7967_v49, 9  ;;  %v6739_v49 = vld [vmem:[%s7014_s27 + $0xb4] sm:$0xff]   ;;  %v3886_v50 = vsel %vm7041_vm2, %v7971_v43, %v7917_v26  ;;  %v3896_v13 = vsel %vm7041_vm2, %v7981_v60, %v7961_v55  ;;  %v1389_v24 = vrot.slane %v1387_v32, 4  ;;  %v5664_v26 = vld [vmem:[%s7014_s27 + $0x6c] sm:$0xf] }
  0xe7   : > { %6091 = vmatmul.mubr.msk.bf16.gmra.mrb[4].mxu1 %vm713_vm3, %v8953_v17  ;;  %6270 = vmatprep.mubr.msk.bf16.mxu0 %vm713_vm3, %v6737_v18  ;;  %v3915_v18 = vrot.slane %v3914_v63, 4  ;;  %v1383_v17 = vrot.slane %v6800_v35, 5  ;;  %v6801_v63 = vld [vmem:[%s7014_s27 + $0xb0] sm:$0x1]  ;;  %v8026_v31 = vsel %vm7274_vm6, %v1375_v23, %v1376_v58  ;;  %v3962_v4 = vor.u32 %v3961_v36, %v8007_v33 }
  0xe8   : > { %6094 = vmatprep.mubr.msk.bf16.mxu1 %vm713_vm3, %v8954_v22  ;;  %6123 = vmatpush3.bf16.msra.mxu1 %v6742_v47  ;;  %v8011_v22 = vld [vmem:[%s7014_s27 + $0x68] sm:$0x1]  ;;  %v3939_v47 = vrot.slane %v3938_v44, 4  ;;  %v1390_v35 = vrot.slane %v6801_v63, 5  ;;  %v3952_v44 = vor.u32 %v3951_v8, %v3948_v46  ;;  %v3910_v43 = vsel %vm7041_vm2, %v3905_v48, %v7964_v56 }
  0xe9   : > { %6124 = vmatprep.subr.bf16.mxu1 %v6744_v52  ;;  %v3965_v9 = vshll.u32 %v8011_v22, 16  ;;  %v3920_v55 = vsel %vm7041_vm2, %v3915_v18, %v3919_v12  ;;  %v8039_v58 = vsel %vm7274_vm6, %v5276_v40, %v1380_v16  ;;  %v8043_v60 = vsel %vm7274_vm6, %v1382_v14, %v1383_v17 }
  0xea   : > { %v8956_v56 = vor.u32 %v7626_v54, %v7624_v1  ;;  %v8958_v16 = vcombine.low %v7746_v42, %v7750_v37  ;;  %v3934_v12 = vsel %vm7041_vm2, %v3929_v38, %v7969_v3  ;;  %v3944_v40 = vsel %vm7041_vm2, %v3939_v47, %v3943_v6  ;;  %v6803_v38 = vld [vmem:[%s7014_s27 + $0xb8] sm:$0xf]  ;;  %v8101_v47 = vld [vmem:[%s7014_s27 + $0x7c] sm:$0xf]  ;;  %v5670_v6 = vld [vmem:[%s7014_s27 + $0x84] sm:$0xf] }
  0xeb   : > { %v8068_v46 = vsel %vm7274_vm6, %v5277_v28, %v1387_v32  ;;  %v8959_v54 = vcombine.low %v7779_v27, %v7789_v34  ;;  %v8077_v42 = vsel %vm7274_vm6, %v1389_v24, %v1390_v35  ;;  %v5278_v37 = vrot.slane %v1251_v61, 9  ;;  %v8081_v32 = vld [vmem:[%s7014_s27 + $0x70] sm:$0xf]  ;;  %8961 = vst [vmem:[#allocation12_spill] sm:$0xff] %v8101_v47  ;;  %v8113_v35 = vld [vmem:[%s7014_s27 + $0x88] sm:$0xf] }
  0xec   : > { %6125 = vmatpush3.bf16.msra.mxu1 %v6744_v52  ;;  %v8048_v52 = vld [vmem:[%s8924_s1 + $0x80] sm:$0xff]   ;;  %v8054_v23 = vrot.slane %v8956_v56, 4  ;;  %v1394_v3 = vrot.slane %v6803_v38, 5  ;;  %8960 = vst [vmem:[#allocation11_spill] sm:$0xff] %v8081_v32  ;;  %v3970_v8 = vshrl.u32 %v5664_v26, 16  ;;  %v8083_v27 = vcombine.low %v3886_v50, %v3896_v13  ;;  %v6741_v28 = vld [vmem:[%s7014_s27 + $0xcc] sm:$0xff]  }
  0xed   : > { %8955 = vst [vmem:[#allocation9_spill] sm:$0xff] %v8048_v52  ;;  %6358 = vmatprep.subr.bf16.mxu1 %v8048_v52  ;;  %v8085_v34 = vrot.slane %v3952_v44, 4  ;;  %v8087_v36 = vrot.slane %v3962_v4, 4  ;;  %v8089_v48 = vrot.slane %v3965_v9, 5  ;;  %v8093_v61 = vcombine.low %v3910_v43, %v3920_v55  ;;  %v8108_v50 = vld [vmem:[%s7014_s27 + $0xbc] sm:$0x1] }
  0xee   : > { %8957 = vst [vmem:[#allocation10_spill] sm:$0xff] %v8054_v23  ;;  %6271 = vmatmul.mubr.msk.bf16.gmra.mrb[24].mxu0 %vm713_vm3, %v6739_v49  ;;  %v8097_v17 = vcombine.low %v3934_v12, %v3944_v40  ;;  %v5667_v49 = vld [vmem:[%s7014_s27 + $0x78] sm:$0xf]  ;;  %v3973_v24 = vshll.u32 %v5664_v26, 16  ;;  %v3979_v63 = vshll.u32 %v8081_v32, 16  ;;  %8962 = vst [vmem:[#allocation13_spill] sm:$0xff] %v8113_v35  ;;  %v8117_v44 = vsel %vm7274_vm6, %v5278_v37, %v1394_v3 }
  0xef   : > { %6095 = vmatmul.mubr.msk.bf16.gmra.mrb[8].mxu1 %vm713_vm3, %v8958_v16  ;;  %6274 = vmatprep.mubr.msk.bf16.mxu0 %vm713_vm3, %v6740_v59  ;;  %v8119_v4 = vrot.slane %v1394_v3, 4  ;;  %v8121_v9 = vrot.slane %v3970_v8, 4  ;;  %v3983_v43 = vshrl.u32 %v8081_v32, 16  ;;  %v5673_v55 = vld [vmem:[%s7014_s27 + $0x90] sm:$0xf]  ;;  %v3994_v16 = vshrl.u32 %v5667_v49, 16 }
  0xf0   : > { %6098 = vmatprep.mubr.msk.bf16.mxu1 %vm713_vm3, %v8959_v54  ;;  %v3997_v12 = vshll.u32 %v5667_v49, 16  ;;  %v8134_v40 = vld [vmem:[%s7014_s27 + $0x94] sm:$0xf]  ;;  %v4003_v37 = vshll.u32 %v8101_v47, 16  ;;  %v4007_v38 = vshrl.u32 %v8101_v47, 16  ;;  %v4018_v3 = vshrl.u32 %v5670_v6, 16 }
  0xf1   : > { %8963 = vst [vmem:[#allocation14_spill] sm:$0xff] %v8134_v40  ;;  %v8137_v54 = vld [vmem:[%s7014_s27 + $0x74] sm:$0x1]  ;;  %v4021_v8 = vshll.u32 %v5670_v6, 16  ;;  %v8965_v59 = vcombine.low %v7821_v62, %v7825_v41  ;;  %v4027_v49 = vshll.u32 %v8113_v35, 16  ;;  %v4031_v14 = vshrl.u32 %v8113_v35, 16 }
  0xf2   : > { %8964 = vst [vmem:[#allocation15_spill] sm:$0xff] %v8137_v54  ;;  %v4042_v26 = vshrl.u32 %v5673_v55, 16  ;;  %v4045_v56 = vshll.u32 %v5673_v55, 16  ;;  %v8966_v18 = vcombine.low %v7833_v21, %v7844_v5  ;;  %v3975_v62 = vrot.slane %v3973_v24, 5  ;;  %v8157_v6 = vld [vmem:[%s7014_s27 + $0x80] sm:$0x1] }
  0xf3   : > { %v8154_v41 = vrot.slane %v3979_v63, 5  ;;  %v3985_v55 = vrot.slane %v3983_v43, 4  ;;  %v3989_v13 = vshll.u32 %v8137_v54, 16  ;;  %v3996_v21 = vrot.slane %v3994_v16, 4  ;;  %v8166_v24 = vld [vmem:[%s7014_s27 + $0x8c] sm:$0x1] }
  0xf4   : > { %v3999_v5 = vrot.slane %v3997_v12, 5  ;;  %v8163_v1 = vrot.slane %v4003_v37, 5  ;;  %v4020_v63 = vrot.slane %v4018_v3, 4  ;;  %v4023_v52 = vrot.slane %v4021_v8, 5  ;;  %v8174_v43 = vld [vmem:[%s7014_s27 + $0x98] sm:$0x1] }
  0xf5   : > { %v8168_v35 = vrot.slane %v4027_v49, 5  ;;  %v4033_v23 = vrot.slane %v4031_v14, 4  ;;  %v4044_v47 = vrot.slane %v4042_v26, 4  ;;  %v4047_v32 = vrot.slane %v4045_v56, 5  ;;  %8968 = vst [vmem:[#allocation17_spill] sm:$0xff] %v8174_v43 }
  0xf6   : > { %6275 = vmatmul.mubr.msk.bf16.gmra.mrb[28].mxu0 %vm713_vm3, %v6741_v28  ;;  %v4051_v28 = vshll.u32 %v8134_v40, 16  ;;  %v3976_v3 = vor.u32 %v3975_v62, %v8121_v9  ;;  %v3986_v8 = vor.u32 %v3985_v55, %v8154_v41  ;;  %v4000_v14 = vor.u32 %v3999_v5, %v3996_v21 }
  0xf7   : > { %6099 = vmatmul.mubr.msk.bf16.gmra.mrb[12].mxu1 %vm713_vm3, %v8965_v59  ;;  %6286 = vmatprep.mubr.msk.bf16.mxu0 %vm713_vm3, %v7882_v15  ;;  %v4055_v59 = vshrl.u32 %v8134_v40, 16  ;;  %v4009_v15 = vrot.slane %v4007_v38, 4  ;;  %v8171_v40 = vld [vmem:[%s7014_s27 + $0xa0] sm:$0xf]  ;;  %v6745_v38 = vld [vmem:[%s8924_s1 + $0x108] sm:$0xff]   ;;  %v4013_v26 = vshll.u32 %v8157_v6, 16  ;;  %v4024_v49 = vor.u32 %v4023_v52, %v4020_v63 }
  0xf8   : > { %6102 = vmatprep.mubr.msk.bf16.mxu1 %vm713_vm3, %v8966_v18  ;;  %v5676_v18 = vld [vmem:[%s7014_s27 + $0x9c] sm:$0xf]  ;;  %8967 = vst [vmem:[#allocation16_spill] sm:$0xff] %v8171_v40  ;;  %v8176_v54 = vrot.slane %v4051_v28, 5  ;;  %v4075_v28 = vshll.u32 %v8171_v40, 16  ;;  %v4034_v9 = vor.u32 %v4033_v23, %v8168_v35  ;;  %v4037_v62 = vshll.u32 %v8166_v24, 16 }
  0xf9   : > { %v4057_v16 = vrot.slane %v4055_v59, 4  ;;  %v4066_v12 = vshrl.u32 %v5676_v18, 16  ;;  %v4069_v37 = vshll.u32 %v5676_v18, 16  ;;  %v4010_v56 = vor.u32 %v4009_v15, %v8163_v1 }
  0xfa   : > { %v4079_v59 = vshrl.u32 %v8171_v40, 16  ;;  %v8969_v18 = vcombine.low %v7848_v51, %v7852_v19  ;;  %v4048_v55 = vor.u32 %v4047_v32, %v4044_v47  ;;  %v4061_v52 = vshll.u32 %v8174_v43, 16  ;;  %v6747_v19 = vld [vmem:[%s8924_s1 + $0x110] sm:$0xff]   ;;  %v5679_v47 = vld [vmem:[%s7014_s27 + $0xa8] sm:$0xf] }
  0xfb   : > { %v8970_v21 = vcombine.low %v7888_v53, %v7905_v10  ;;  %v3991_v51 = vrot.slane %v3989_v13, 5  ;;  %v4068_v23 = vrot.slane %v4066_v12, 4  ;;  %v4071_v5 = vrot.slane %v4069_v37, 5  ;;  %v8211_v40 = vld [vmem:[%s7014_s27 + $0xa4] sm:$0x1] }
  0xfc   : > { %v3987_v32 = vrot.slane %v3986_v8, 4  ;;  %v4001_v53 = vrot.slane %v4000_v14, 4  ;;  %v4015_v10 = vrot.slane %v4013_v26, 5  ;;  %v4011_v13 = vrot.slane %v4010_v56, 4 }
  0xfd   : > { %v4025_v15 = vrot.slane %v4024_v49, 4  ;;  %v8208_v63 = vrot.slane %v4075_v28, 5  ;;  %v4049_v12 = vrot.slane %v4048_v55, 4  ;;  %v4063_v37 = vrot.slane %v4061_v52, 5 }
  0xfe   : > { %6287 = vmatmul.mubr.msk.bf16.vlgmr.msra.gmra.mrb[0].mxu0 %vm713_vm3, %v7943_v7  ;;  %v4058_v7 = vor.u32 %v4057_v16, %v8176_v54  ;;  %v4039_v16 = vrot.slane %v4037_v62, 5  ;;  %v4072_v43 = vor.u32 %v4071_v5, %v4068_v23  ;;  %v4090_v8 = vshrl.u32 %v5679_v47, 16 }
  0xff   : > { %6103 = vmatmul.mubr.msk.bf16.gmra.mrb[16].mxu1 %vm713_vm3, %v8969_v18  ;;  %6319 = vmatpush3.bf16.msra.mxu0 %v7794_v0  ;;  %v3977_v0 = vrot.slane %v3976_v3, 4  ;;  %v4081_v18 = vrot.slane %v4079_v59, 4  ;;  %v8214_v3 = vld [vmem:[%s7014_s27 + $0xac] sm:$0xf]  ;;  %v4093_v14 = vshll.u32 %v5679_v47, 16  ;;  %v8971_v26 = vrot.slane %v8108_v50, 5 }
 0x100   : > { %6106 = vmatprep.mubr.msk.bf16.mxu1 %vm713_vm3, %v8970_v21  ;;  %6290 = vmatprep.mubr.msk.bf16.mxu0 %vm713_vm3, %v7956_v2  ;;  %v4035_v21 = vrot.slane %v4034_v9, 4  ;;  %v4059_v2 = vrot.slane %v4058_v7, 4  ;;  %v4006_v28 = vsel %vm7041_vm2, %v4001_v53, %v8163_v1  ;;  %v4016_v50 = vsel %vm7041_vm2, %v4011_v13, %v4015_v10  ;;  %v6752_v9 = vld [vmem:[%s8924_s1 + $0x118] sm:$0xff]   ;;  %v5740_v47 = vld [vmem:[%s7014_s27 + $0x54] sm:$0xe] }
 0x101   : > { %6320 = vmatprep.subr.bf16.mxu0 %v6745_v38  ;;  %v8221_v56 = vsel %vm7274_vm6, %v8119_v4, %v8971_v26  ;;  %v3982_v49 = vsel %vm7041_vm2, %v3977_v0, %v8154_v41  ;;  %v4030_v4 = vsel %vm7041_vm2, %v4025_v15, %v8168_v35  ;;  %v4082_v59 = vor.u32 %v4081_v18, %v8208_v63 }
 0x102   : > { %v4085_v41 = vshll.u32 %v8211_v40, 16  ;;  %v8972_v1 = vcombine.low %v7915_v25, %v7923_v45  ;;  %v4040_v62 = vsel %vm7041_vm2, %v4035_v21, %v4039_v16  ;;  %v4054_v35 = vsel %vm7041_vm2, %v4049_v12, %v8176_v54  ;;  %v8266_v54 = vld [vmem:[%s7014_s27 + $0xb0] sm:$0x1]  ;;  %v5741_v12 = vld [vmem:[%s7014_s27 + $0x60] sm:$0xe] }
 0x103   : > { %6321 = vmatpush3.bf16.msra.mxu0 %v6745_v38  ;;  %v3992_v38 = vsel %vm7041_vm2, %v3987_v32, %v3991_v51  ;;  %v4099_v55 = vshll.u32 %v8214_v3, 16  ;;  %v4103_v52 = vshrl.u32 %v8214_v3, 16  ;;  %v5739_v51 = vld [vmem:[%s7014_s27 + $0x48] sm:$0xe]  ;;  %v8973_v25 = vcombine.low %v7995_v30, %v8026_v31  ;;  %v5682_v32 = vld [vmem:[%s7014_s27 + $0xb4] sm:$0xf] }
 0x104   : > { %6322 = vmatprep.subr.bf16.mxu0 %v6747_v19  ;;  %v4064_v45 = vsel %vm7041_vm2, %v4059_v2, %v4063_v37  ;;  %v4092_v7 = vrot.slane %v4090_v8, 4  ;;  %v4095_v23 = vrot.slane %v4093_v14, 5  ;;  %v8974_v30 = vsel %vm7041_vm2, %v8087_v36, %v8089_v48  ;;  %v8976_v14 = vld [vmem:[#allocation8_spill] sm:$0xff] }
 0x105   : > { %v8975_v31 = vsel %vm7041_vm2, %v8085_v34, %v8007_v33  ;;  %v5302_v5 = vcombine.low %v8117_v44, %v8221_v56  ;;  %v8282_v0 = vcombine.low %v4006_v28, %v4016_v50  ;;  %v8285_v53 = vcombine.low %v4030_v4, %v4040_v62  ;;  %v8317_v50 = vld [vmem:[%s7014_s27 + $0xb8] sm:$0xf] }
 0x106   : > { %6291 = vmatmul.mubr.msk.bf16.gmra.mrb[4].mxu0 %vm713_vm3, %v8083_v27  ;;  %v8263_v27 = vrot.slane %v4072_v43, 4  ;;  %v8280_v43 = vcombine.low %v3982_v49, %v3992_v38  ;;  %v4083_v10 = vrot.slane %v4082_v59, 4  ;;  %v4087_v36 = vrot.slane %v4085_v41, 5  ;;  %v5742_v49 = vld [vmem:[%s7014_s27 + $0x6c] sm:$0xe] }
 0x107   : > { %6107 = vmatmul.mubr.msk.bf16.gmra.mrb[20].mxu1 %vm713_vm3, %v8972_v1  ;;  %6294 = vmatprep.mubr.msk.bf16.mxu0 %vm713_vm3, %v8093_v61  ;;  %v5705_v61 = vcombine.low %v8975_v31, %v8974_v30  ;;  %v5755_v48 = vrot.slane %v5739_v51, 9  ;;  %v8288_v33 = vcombine.low %v4054_v35, %v4064_v45  ;;  %v8290_v34 = vrot.slane %v4099_v55, 5  ;;  %v5685_v45 = vld [vmem:[%s7014_s27 + $0xc0] sm:$0xf] }
 0x108   : > { %6110 = vmatprep.mubr.msk.bf16.mxu1 %vm713_vm3, %v8973_v25  ;;  %6323 = vmatpush3.bf16.msra.mxu0 %v6747_v19  ;;  %v4105_v13 = vrot.slane %v4103_v52, 4  ;;  %v4109_v15 = vshll.u32 %v8266_v54, 16  ;;  %v4078_v19 = vsel %vm7041_vm2, %v8263_v27, %v8208_v63  ;;  %v4096_v18 = vor.u32 %v4095_v23, %v4092_v7  ;;  %v8981_v52 = vld [vmem:[#allocation15_spill] sm:$0xff] }
 0x109   : > { %6324 = vmatprep.subr.bf16.mxu0 %v6752_v9  ;;  %v4601_v21 = vrot.slane %v7891_v11, 5  ;;  %v4604_v16 = vrot.slane %v7934_v39, 5  ;;  %v4114_v37 = vshrl.u32 %v5682_v32, 16  ;;  %v5756_v2 = vrot.slane %v5740_v47, 9 }
 0x10a   : > { %v4608_v8 = vrot.slane %v7908_v20, 5  ;;  %v4611_v26 = vrot.slane %v8976_v14, 5  ;;  %v4088_v38 = vsel %vm7041_vm2, %v4083_v10, %v4087_v36  ;;  %v4117_v28 = vshll.u32 %v5682_v32, 16  ;;  %v5743_v32 = vld [vmem:[%s7014_s27 + $0x78] sm:$0xe]  ;;  %v6746_v10 = vld [vmem:[%s7014_s27 + $0xc] sm:$0xff]  }
 0x10b   : > { %v8307_v63 = vsel %vm7274_vm6, %v5755_v48, %v4601_v21  ;;  %v4603_v11 = vrot.slane %v4601_v21, 4  ;;  %v8977_v39 = vcombine.low %v8039_v58, %v8043_v60  ;;  %v4106_v20 = vor.u32 %v4105_v13, %v8290_v34  ;;  %v8979_v60 = vld [vmem:[#allocation7_spill] sm:$0xff] }
 0x10c   : > { %6325 = vmatpush3.bf16.msra.mxu0 %v6752_v9  ;;  %v8321_v4 = vsel %vm7274_vm6, %v5756_v2, %v4608_v8  ;;  %v4610_v59 = vrot.slane %v4608_v8, 4  ;;  %v5757_v41 = vrot.slane %v5741_v12, 9  ;;  %v8978_v9 = vcombine.low %v8068_v46, %v8077_v42  ;;  %v8980_v42 = vld [vmem:[#allocation11_spill] sm:$0xff] }
 0x10d   : > { %v8330_v58 = vsel %vm7274_vm6, %v4603_v11, %v4604_v16  ;;  %v4618_v1 = vrot.slane %v8011_v22, 5  ;;  %v5758_v62 = vrot.slane %v5742_v49, 9  ;;  %v4622_v55 = vrot.slane %v8980_v42, 5  ;;  %v8375_v12 = vld [vmem:[%s7014_s27 + $0xc4] sm:$0xf]  ;;  %v8985_v42 = vld [vmem:[#allocation13_spill] sm:$0xff] }
 0x10e   : > { %6295 = vmatmul.mubr.msk.bf16.gmra.mrb[8].mxu0 %vm713_vm3, %v8097_v17  ;;  %v4615_v17 = vrot.slane %v8979_v60, 5  ;;  %v5779_v35 = vcombine.low %v8307_v63, %v8330_v58  ;;  %v8338_v46 = vsel %vm7274_vm6, %v4610_v59, %v4611_v26  ;;  %v4625_v51 = vrot.slane %v8981_v52, 5  ;;  %v5744_v26 = vld [vmem:[%s7014_s27 + $0x84] sm:$0xe]  ;;  %v8395_v49 = vld [vmem:[%s7014_s27 + $0xbc] sm:$0x1] }
 0x10f   : > { %6111 = vmatmul.mubr.msk.bf16.gmra.mrb[24].mxu1 %vm713_vm3, %v8977_v39  ;;  %6298 = vmatprep.mubr.msk.bf16.mxu0 %vm713_vm3, %v5705_v61  ;;  %v4123_v25 = vshll.u32 %v8317_v50, 16  ;;  %v5780_v22 = vcombine.low %v8321_v4, %v8338_v46  ;;  %v8350_v23 = vrot.slane %v4109_v15, 5  ;;  %v4127_v30 = vshrl.u32 %v8317_v50, 16  ;;  %v5426_v15 = vld [vmem:[%s7014_s27 + $0x78] sm:$0xf] }
 0x110   : > { %6114 = vmatprep.mubr.msk.bf16.mxu1 %vm713_vm3, %v8978_v9  ;;  %v8348_v27 = vsel %vm7274_vm6, %v5757_v41, %v4615_v17  ;;  %v4617_v7 = vrot.slane %v4615_v17, 4  ;;  %v8355_v31 = vsel %vm7274_vm6, %v5758_v62, %v4622_v55  ;;  %v4624_v61 = vrot.slane %v4622_v55, 4  ;;  %v8984_v59 = vld [vmem:[#allocation10_spill] sm:$0xff]  ;;  %v6821_v46 = vld [vmem:[%s7014_s27 + $0x8c] sm:$0x1] }
 0x111   : > { %v8359_v36 = vcombine.low %v4078_v19, %v4088_v38  ;;  %v8361_v48 = vrot.slane %v4096_v18, 4  ;;  %v8363_v47 = vrot.slane %v4114_v37, 4  ;;  %v8370_v21 = vrot.slane %v4106_v20, 4  ;;  %v6748_v52 = vld [vmem:[%s7014_s27 + $0x18] sm:$0xff]  }
 0x112   : > { %v8367_v13 = vsel %vm7274_vm6, %v4617_v7, %v4618_v1  ;;  %v8372_v16 = vrot.slane %v4117_v28, 5  ;;  %v8381_v18 = vsel %vm7274_vm6, %v4624_v61, %v4625_v51  ;;  %v8383_v37 = vrot.slane %v4123_v25, 5  ;;  %v8982_v28 = vld [vmem:[#allocation12_spill] sm:$0xff] }
 0x113   : > { %v5781_v19 = vcombine.low %v8348_v27, %v8367_v13  ;;  %v4138_v2 = vshrl.u32 %v5685_v45, 16  ;;  %v5782_v8 = vcombine.low %v8355_v31, %v8381_v18  ;;  %v5759_v14 = vrot.slane %v5743_v32, 9  ;;  %v6749_v61 = vld [vmem:[%s7014_s27 + $0x24] sm:$0xff]  }
 0x114   : > { %v4141_v38 = vshll.u32 %v5685_v45, 16  ;;  %v4629_v11 = vrot.slane %v8982_v28, 5  ;;  %v4632_v39 = vrot.slane %v8157_v6, 5  ;;  %v2376_v20 = vshrl.u32 %v5426_v15, 16  ;;  %v5688_v45 = vld [vmem:[%s7014_s27 + $0xcc] sm:$0xf] }
 0x115   : > { %v4147_v44 = vshll.u32 %v8375_v12, 16  ;;  %v4151_v56 = vshrl.u32 %v8375_v12, 16  ;;  %v5760_v17 = vrot.slane %v5744_v26, 9  ;;  %v4133_v1 = vshll.u32 %v8395_v49, 16  ;;  %v5745_v26 = vld [vmem:[%s7014_s27 + $0x90] sm:$0xe] }
 0x116   : > { %6299 = vmatmul.mubr.msk.bf16.gmra.mrb[12].mxu0 %vm713_vm3, %v8280_v43  ;;  %v8983_v43 = vld [vmem:[#allocation6_spill] sm:$0xff]  ;;  %v8410_v6 = vsel %vm7274_vm6, %v5759_v14, %v4629_v11  ;;  %v4631_v9 = vrot.slane %v4629_v11, 4  ;;  %v2378_v60 = vrot.slane %v2376_v20, 4  ;;  %v4636_v55 = vrot.slane %v8985_v42, 5 }
 0x117   : > { %6115 = vmatmul.mubr.msk.bf16.gmra.mrb[28].mxu1 %vm713_vm3, %v5302_v5  ;;  %6302 = vmatprep.mubr.msk.bf16.mxu0 %vm713_vm3, %v8282_v0  ;;  %v2379_v5 = vshll.u32 %v5426_v15, 16  ;;  %v2398_v41 = vsel %vm7041_vm2, %v8984_v59, %v8983_v43  ;;  %v4129_v0 = vrot.slane %v4127_v30, 4  ;;  %v4102_v51 = vsel %vm7041_vm2, %v8361_v48, %v8290_v34 }
 0x118   : > { %6126 = vmatprep.mubr.msk.bf16.mxu1 %vm713_vm3, %v6746_v10  ;;  %v4120_v25 = vor.u32 %v8372_v16, %v8363_v47  ;;  %v8424_v7 = vsel %vm7274_vm6, %v4631_v9, %v4632_v39  ;;  %v4639_v30 = vrot.slane %v8166_v24, 5  ;;  %v4140_v32 = vrot.slane %v4138_v2, 4  ;;  %v8434_v47 = vld [vmem:[%s7014_s27 + $0xd0] sm:$0xf] }
 0x119   : > { %v2381_v62 = vrot.slane %v2379_v5, 5  ;;  %v4143_v10 = vrot.slane %v4141_v38, 5  ;;  %v5783_v15 = vcombine.low %v8410_v6, %v8424_v7  ;;  %v8431_v34 = vrot.slane %v4147_v44, 5  ;;  %v8446_v38 = vld [vmem:[%s7014_s27 + $0xc8] sm:$0x1]  ;;  %v8986_v5 = vld [vmem:[#allocation14_spill] sm:$0xff] }
 0x11a   : > { %v4153_v48 = vrot.slane %v4151_v56, 4  ;;  %v8438_v16 = vsel %vm7274_vm6, %v5760_v17, %v4636_v55  ;;  %v4638_v28 = vrot.slane %v4636_v55, 4  ;;  %v4112_v24 = vsel %vm7041_vm2, %v8370_v21, %v8350_v23  ;;  %v8987_v23 = vld [vmem:[#allocation9_spill] sm:$0xff]  ;;  %v6805_v17 = vld [vmem:[%s8924_s1 + $0x88] sm:$0xff]  }
 0x11b   : > { %v2382_v14 = vor.u32 %v2381_v62, %v2378_v60  ;;  %v4130_v2 = vor.u32 %v4129_v0, %v8383_v37  ;;  %v4162_v11 = vshrl.u32 %v5688_v45, 16  ;;  %v4165_v20 = vshll.u32 %v5688_v45, 16  ;;  %v8988_v9 = vld [vmem:[#allocation5_spill] sm:$0xff] }
 0x11c   : > { %v8453_v44 = vsel %vm7274_vm6, %v4638_v28, %v4639_v30  ;;  %v5761_v56 = vrot.slane %v5745_v26, 9  ;;  %v4643_v43 = vrot.slane %v8986_v5, 5  ;;  %v4171_v21 = vshll.u32 %v8434_v47, 16  ;;  %v8989_v30 = vld [vmem:[#allocation17_spill] sm:$0xff]  ;;  %v6751_v5 = vld [vmem:[%s7014_s27 + $0x3c] sm:$0xff]  }
 0x11d   : > { %v2383_v39 = vrot.slane %v2382_v14, 4  ;;  %v4175_v59 = vshrl.u32 %v8434_v47, 16  ;;  %v5784_v60 = vcombine.low %v8438_v16, %v8453_v44  ;;  %v4144_v0 = vor.u32 %v4143_v10, %v4140_v32  ;;  %v6750_v14 = vld [vmem:[%s7014_s27 + $0x30] sm:$0xff]   ;;  %v5746_v10 = vld [vmem:[%s7014_s27 + $0x9c] sm:$0xe] }
 0x11e   : > { %6303 = vmatmul.mubr.msk.bf16.gmra.mrb[16].mxu0 %vm713_vm3, %v8285_v53  ;;  %v4154_v62 = vor.u32 %v4153_v48, %v8431_v34  ;;  %v4157_v42 = vshll.u32 %v8446_v38, 16  ;;  %v8476_v45 = vsel %vm7274_vm6, %v5761_v56, %v4643_v43  ;;  %v5711_v26 = vcombine.low %v4102_v51, %v4112_v24  ;;  %v8483_v48 = vld [vmem:[%s7014_s27 + $0xd4] sm:$0x1]  ;;  %v6827_v16 = vld [vmem:[%s7014_s27 + $0xc4] sm:$0xf] }
 0x11f   : > { %6127 = vmatmul.mubr.msk.bf16.vlgmr.msra.gmra.mrb[0].mxu1 %vm713_vm3, %v6748_v52  ;;  %v2388_v53 = vsel %vm7041_vm2, %v2383_v39, %v8988_v9  ;;  %6306 = vmatprep.mubr.msk.bf16.mxu0 %vm713_vm3, %v8288_v33  ;;  %v4135_v52 = vrot.slane %v4133_v1, 5  ;;  %v4645_v33 = vrot.slane %v4643_v43, 4  ;;  %v4121_v28 = vrot.slane %v4120_v25, 4  ;;  %v6806_v51 = vld [vmem:[%s8924_s1 + $0x90] sm:$0xff]  }
 0x120   : > { %6362 = vmatpush3.bf16.msra.mxu1 %v8987_v23  ;;  %6130 = vmatprep.mubr.msk.bf16.mxu1 %vm713_vm3, %v6749_v61  ;;  %v8472_v55 = vcombine.low %v2388_v53, %v2398_v41  ;;  %v4646_v61 = vrot.slane %v8989_v30, 5  ;;  %v4131_v39 = vrot.slane %v4130_v2, 4  ;;  %v4164_v32 = vrot.slane %v4162_v11, 4  ;;  %v8990_v2 = vld [vmem:[#allocation16_spill] sm:$0xff] }
 0x121   : > { %6359 = vmatprep.subr.bf16.mxu1 %v6805_v17  ;;  %v4167_v41 = vrot.slane %v4165_v20, 5  ;;  %v8485_v23 = vrot.slane %v4171_v21, 5  ;;  %v4177_v1 = vrot.slane %v4175_v59, 4  ;;  %v4145_v43 = vrot.slane %v4144_v0, 4 }
 0x122   : > { %v8489_v56 = vsel %vm7274_vm6, %v4645_v33, %v4646_v61  ;;  %v4155_v9 = vrot.slane %v4154_v62, 4  ;;  %v4159_v53 = vrot.slane %v4157_v42, 5  ;;  %v5762_v24 = vrot.slane %v5746_v10, 9  ;;  %v5735_v62 = vld [vmem:[%s7014_s27 + $0x18] sm:$0xe] }
 0x123   : > { %v5785_v25 = vcombine.low %v8476_v45, %v8489_v56  ;;  %v4650_v11 = vrot.slane %v8990_v2, 5  ;;  %v4126_v20 = vsel %vm7041_vm2, %v4121_v28, %v8383_v37  ;;  %v4136_v21 = vsel %vm7041_vm2, %v4131_v39, %v4135_v52  ;;  %v6807_v33 = vld [vmem:[%s7014_s27 + $0x1c] sm:$0xf]  ;;  %v6753_v28 = vld [vmem:[%s7014_s27 + $0x48] sm:$0xff]  }
 0x124   : > { %6363 = vmatpush3.bf16.msra.mxu1 %v6805_v17  ;;  %v4181_v59 = vshll.u32 %v8483_v48, 16  ;;  %v4653_v17 = vrot.slane %v8211_v40, 5  ;;  %v4168_v0 = vor.u32 %v4167_v41, %v4164_v32  ;;  %v4150_v40 = vsel %vm7041_vm2, %v4145_v43, %v8431_v34  ;;  %v6808_v61 = vld [vmem:[%s8924_s1 + $0x98] sm:$0xff]  }
 0x125   : > { %6360 = vmatprep.subr.bf16.mxu1 %v6806_v51  ;;  %v8513_v37 = vsel %vm7274_vm6, %v5762_v24, %v4650_v11  ;;  %v4652_v42 = vrot.slane %v4650_v11, 4  ;;  %v4160_v52 = vsel %vm7041_vm2, %v4155_v9, %v4159_v53  ;;  %v4573_v30 = vrot.slane %v6807_v33, 5  ;;  %v6809_v9 = vld [vmem:[%s7014_s27 + $0x20] sm:$0x1] }
 0x126   : > { %6307 = vmatmul.mubr.msk.bf16.gmra.mrb[20].mxu0 %vm713_vm3, %v8359_v36  ;;  %v4178_v36 = vor.u32 %v4177_v1, %v8485_v23  ;;  %v5712_v34 = vcombine.low %v4126_v20, %v4136_v21  ;;  %v4183_v39 = vrot.slane %v4181_v59, 5  ;;  %v5751_v32 = vrot.slane %v5735_v62, 9  ;;  %v5748_v20 = vld [vmem:[%s7014_s27 + $0xb4] sm:$0xe] }
 0x127   : > { %6131 = vmatmul.mubr.msk.bf16.gmra.mrb[4].mxu1 %vm713_vm3, %v6750_v14  ;;  %6310 = vmatprep.mubr.msk.bf16.mxu0 %vm713_vm3, %v5711_v26  ;;  %v8526_v14 = vsel %vm7274_vm6, %v4652_v42, %v4653_v17  ;;  %v5747_v26 = vld [vmem:[%s7014_s27 + $0xa8] sm:$0xe]  ;;  %v5713_v41 = vcombine.low %v4150_v40, %v4160_v52  ;;  %v4169_v1 = vrot.slane %v4168_v0, 4  ;;  %v4576_v53 = vrot.slane %v6809_v9, 5  ;;  %v5736_v0 = vld [vmem:[%s7014_s27 + $0x24] sm:$0xe] }
 0x128   : > { %6134 = vmatprep.mubr.msk.bf16.mxu1 %vm713_vm3, %v6751_v5  ;;  %6364 = vmatpush3.bf16.msra.mxu1 %v6806_v51  ;;  %v5786_v10 = vcombine.low %v8513_v37, %v8526_v14  ;;  %v6754_v5 = vld [vmem:[%s7014_s27 + $0x54] sm:$0xff]   ;;  %v4179_v43 = vrot.slane %v4178_v36, 4  ;;  %v4575_v51 = vrot.slane %v4573_v30, 4  ;;  %v5763_v24 = vrot.slane %v5747_v26, 9  ;;  %v6810_v36 = vld [vmem:[%s7014_s27 + $0x28] sm:$0xf] }
 0x129   : > { %6361 = vmatprep.subr.bf16.mxu1 %v6808_v61  ;;  %v4657_v2 = vrot.slane %v8214_v3, 5  ;;  %v4660_v11 = vrot.slane %v8266_v54, 5  ;;  %v4174_v3 = vsel %vm7041_vm2, %v4169_v1, %v8485_v23  ;;  %v4574_v17 = vsel %vm7274_vm6, %v5751_v32, %v4573_v30  ;;  %v6811_v40 = vld [vmem:[%s7014_s27 + $0x34] sm:$0xf]  ;;  %v6812_v32 = vld [vmem:[%s7014_s27 + $0x2c] sm:$0x1] }
 0x12a   : > { %v4184_v54 = vsel %vm7041_vm2, %v4179_v43, %v4183_v39  ;;  %v4580_v62 = vrot.slane %v6810_v36, 5  ;;  %v4577_v42 = vsel %vm7274_vm6, %v4575_v51, %v4576_v53  ;;  %v4587_v52 = vrot.slane %v6811_v40, 5  ;;  %v6756_v1 = vld [vmem:[%s7014_s27 + $0x6c] sm:$0xff]  }
 0x12b   : > { %v8541_v21 = vsel %vm7274_vm6, %v5763_v24, %v4657_v2  ;;  %v4659_v59 = vrot.slane %v4657_v2, 4  ;;  %v5764_v23 = vrot.slane %v5748_v20, 9  ;;  %v4664_v30 = vrot.slane %v8317_v50, 5  ;;  %v6813_v50 = vld [vmem:[%s7014_s27 + $0x38] sm:$0x1] }
 0x12c   : > { %6365 = vmatpush3.bf16.msra.mxu1 %v6808_v61  ;;  %v5737_v61 = vld [vmem:[%s7014_s27 + $0x30] sm:$0xe]  ;;  %v5752_v39 = vrot.slane %v5736_v0, 9  ;;  %v5775_v43 = vcombine.low %v4574_v17, %v4577_v42  ;;  %v4582_v9 = vrot.slane %v4580_v62, 4  ;;  %v4589_v2 = vrot.slane %v4587_v52, 4 }
 0x12d   : > { %v8559_v33 = vsel %vm7274_vm6, %v4659_v59, %v4660_v11  ;;  %v8571_v53 = vsel %vm7274_vm6, %v5764_v23, %v4664_v30  ;;  %v4666_v51 = vrot.slane %v4664_v30, 4  ;;  %v5753_v24 = vrot.slane %v5737_v61, 9  ;;  %v5749_v20 = vld [vmem:[%s7014_s27 + $0xc0] sm:$0xe]  ;;  %v5738_v23 = vld [vmem:[%s7014_s27 + $0x3c] sm:$0xe] }
 0x12e   : > { %6311 = vmatmul.mubr.msk.bf16.gmra.mrb[24].mxu0 %vm713_vm3, %v5712_v34  ;;  %v5787_v26 = vcombine.low %v8541_v21, %v8559_v33  ;;  %v5714_v34 = vcombine.low %v4174_v3, %v4184_v54  ;;  %v4590_v11 = vrot.slane %v6813_v50, 5  ;;  %v4581_v3 = vsel %vm7274_vm6, %v5752_v39, %v4580_v62  ;;  %v6814_v17 = vld [vmem:[%s7014_s27 + $0x40] sm:$0xf]  ;;  %v5423_v62 = vld [vmem:[%s7014_s27 + $0x6c] sm:$0xf] }
 0x12f   : > { %6135 = vmatmul.mubr.msk.bf16.gmra.mrb[8].mxu1 %vm713_vm3, %v6753_v28  ;;  %6314 = vmatprep.mubr.msk.bf16.mxu0 %vm713_vm3, %v5713_v41  ;;  %v6755_v28 = vld [vmem:[%s7014_s27 + $0x60] sm:$0xff]   ;;  %v4667_v41 = vrot.slane %v8395_v49, 5  ;;  %v4594_v0 = vrot.slane %v6814_v17, 5  ;;  %v5765_v36 = vrot.slane %v5749_v20, 9  ;;  %v4588_v42 = vsel %vm7274_vm6, %v5753_v24, %v4587_v52 }
 0x130   : > { %6138 = vmatprep.mubr.msk.bf16.mxu1 %vm713_vm3, %v6754_v5  ;;  %v4583_v5 = vrot.slane %v6812_v32, 5  ;;  %v4591_v40 = vsel %vm7274_vm6, %v4589_v2, %v4590_v11  ;;  %v4671_v61 = vrot.slane %v8375_v12, 5  ;;  %v4674_v30 = vrot.slane %v8446_v38, 5  ;;  %v6816_v11 = vld [vmem:[%s7014_s27 + $0x70] sm:$0xf] }
 0x131   : > { %v8577_v59 = vsel %vm7274_vm6, %v4666_v51, %v4667_v41  ;;  %v6758_v41 = vld [vmem:[%s7014_s27 + $0x84] sm:$0xff]   ;;  %v5777_v52 = vcombine.low %v4588_v42, %v4591_v40  ;;  %v2352_v24 = vshrl.u32 %v5423_v62, 16  ;;  %v2355_v12 = vshll.u32 %v5423_v62, 16 }
 0x132   : > { %v5788_v49 = vcombine.low %v8571_v53, %v8577_v59  ;;  %v4584_v54 = vsel %vm7274_vm6, %v4582_v9, %v4583_v5  ;;  %v8602_v32 = vsel %vm7274_vm6, %v5765_v36, %v4671_v61  ;;  %v4673_v5 = vrot.slane %v4671_v61, 4  ;;  %v6815_v9 = vld [vmem:[%s7014_s27 + $0x44] sm:$0x1] }
 0x133   : > { %v5776_v39 = vcombine.low %v4581_v3, %v4584_v54  ;;  %v4597_v51 = vrot.slane %v6815_v9, 5  ;;  %v2361_v20 = vshll.u32 %v6816_v11, 16  ;;  %v2365_v3 = vshrl.u32 %v6816_v11, 16  ;;  %v5432_v11 = vld [vmem:[%s7014_s27 + $0x90] sm:$0xf] }
 0x134   : > { %v8608_v38 = vsel %vm7274_vm6, %v4673_v5, %v4674_v30  ;;  %v4678_v54 = vrot.slane %v8434_v47, 5  ;;  %v4681_v17 = vrot.slane %v8483_v48, 5  ;;  %v2354_v40 = vrot.slane %v2352_v24, 4  ;;  %v6759_v30 = vld [vmem:[%s7014_s27 + $0x90] sm:$0xff]  }
 0x135   : > { %v5789_v50 = vcombine.low %v8602_v32, %v8608_v38  ;;  %v2363_v62 = vrot.slane %v2361_v20, 5  ;;  %v6761_v20 = vld [vmem:[%s7014_s27 + $0xa8] sm:$0xff]   ;;  %v2424_v63 = vshrl.u32 %v5432_v11, 16  ;;  %v2427_v58 = vshll.u32 %v5432_v11, 16  ;;  %v6763_v11 = vld [vmem:[%s7014_s27 + $0xc0] sm:$0xff]  }
 0x136   : > { %6315 = vmatmul.mubr.msk.bf16.gmra.mrb[28].mxu0 %vm713_vm3, %v5714_v34  ;;  %v6757_v34 = vld [vmem:[%s7014_s27 + $0x78] sm:$0xff]   ;;  %v4680_v47 = vrot.slane %v4678_v54, 4  ;;  %v2529_v44 = vshll.u32 %v6827_v16, 16 }
 0x137   : > { %6139 = vmatmul.mubr.msk.bf16.gmra.mrb[12].mxu1 %vm713_vm3, %v6755_v28  ;;  %6326 = vmatprep.mubr.msk.bf16.mxu0 %vm713_vm3, %v5775_v43  ;;  %v5750_v28 = vld [vmem:[%s7014_s27 + $0xcc] sm:$0xe]  ;;  %v4596_v43 = vrot.slane %v4594_v0, 4 }
 0x138   : > { %6142 = vmatprep.mubr.msk.bf16.mxu1 %vm713_vm3, %v6756_v1  ;;  %v5754_v1 = vrot.slane %v5738_v23, 9  ;;  %v5766_v2 = vrot.slane %v5750_v28, 9  ;;  %v2357_v23 = vrot.slane %v2355_v12, 5  ;;  %v2367_v28 = vrot.slane %v2365_v3, 4 }
 0x139   : > { %v4598_v42 = vsel %vm7274_vm6, %v4596_v43, %v4597_v51  ;;  %v6818_v51 = vld [vmem:[%s7014_s27 + $0x88] sm:$0xf]  ;;  %v2531_v45 = vrot.slane %v2529_v44, 5 }
 0x13a   : > { %v4595_v36 = vsel %vm7274_vm6, %v5754_v1, %v4594_v0  ;;  %v8625_v61 = vsel %vm7274_vm6, %v5766_v2, %v4678_v54  ;;  %v6760_v0 = vld [vmem:[%s7014_s27 + $0x9c] sm:$0xff]   ;;  %v6817_v1 = vld [vmem:[%s7014_s27 + $0x74] sm:$0x1]  ;;  %v2409_v24 = vshll.u32 %v6818_v51, 16  ;;  %v2413_v12 = vshrl.u32 %v6818_v51, 16 }
 0x13b   : > { %v5778_v48 = vcombine.low %v4595_v36, %v4598_v42  ;;  %v2371_v43 = vshll.u32 %v6817_v1, 16  ;;  %v5435_v42 = vld [vmem:[%s7014_s27 + $0x9c] sm:$0xf]  ;;  %v6820_v1 = vld [vmem:[%s7014_s27 + $0xa0] sm:$0xf] }
 0x13d   : > { %v2373_v54 = vrot.slane %v2371_v43, 5  ;;  %v2461_v43 = vshrl.u32 %v6820_v1, 16 }
 0x13e   : > { %6327 = vmatmul.mubr.msk.bf16.vlgmr.msra.gmra.mrb[0].mxu0 %vm713_vm3, %v5776_v39  ;;  %v5429_v39 = vld [vmem:[%s7014_s27 + $0x84] sm:$0xf] }
 0x13f   : > { %6143 = vmatmul.mubr.msk.bf16.gmra.mrb[16].mxu1 %vm713_vm3, %v6757_v34  ;;  %6330 = vmatprep.mubr.msk.bf16.mxu0 %vm713_vm3, %v5777_v52  ;;  %v8630_v34 = vsel %vm7274_vm6, %v4680_v47, %v4681_v17  ;;  %v2368_v52 = vor.u32 %v2367_v28, %v2363_v62  ;;  %v2400_v57 = vshrl.u32 %v5429_v39, 16  ;;  %v2403_v9 = vshll.u32 %v5429_v39, 16 }
 0x140   : > { %6146 = vmatprep.mubr.msk.bf16.mxu1 %vm713_vm3, %v6758_v41  ;;  %v5790_v5 = vcombine.low %v8625_v61, %v8630_v34  ;;  %v2358_v41 = vor.u32 %v2357_v23, %v2354_v40  ;;  %v6762_v40 = vld [vmem:[%s7014_s27 + $0xb4] sm:$0xff]   ;;  %v8649_v23 = vrot.slane %v2409_v24, 5  ;;  %v2415_v47 = vrot.slane %v2413_v12, 4 }
 0x141   : > { %v2369_v3 = vrot.slane %v2368_v52, 4  ;;  %v2402_v17 = vrot.slane %v2400_v57, 4  ;;  %v2405_v36 = vrot.slane %v2403_v9, 5  ;;  %v2451_v39 = vshll.u32 %v5435_v42, 16 }
 0x142   : > { %v2359_v2 = vrot.slane %v2358_v41, 4  ;;  %v2416_v4 = vor.u32 %v2415_v47, %v8649_v23  ;;  %v2426_v57 = vrot.slane %v2424_v63, 4  ;;  %v2429_v9 = vrot.slane %v2427_v58, 5  ;;  %v6823_v58 = vld [vmem:[%s7014_s27 + $0xa4] sm:$0x1] }
 0x143   : > { %v2374_v41 = vsel %vm7041_vm2, %v2369_v3, %v2373_v54  ;;  %v2406_v52 = vor.u32 %v2405_v36, %v2402_v17  ;;  %v5438_v3 = vld [vmem:[%s7014_s27 + $0xa8] sm:$0xf] }
 0x144   : > { %v2417_v54 = vrot.slane %v2416_v4, 4  ;;  %v2430_v36 = vor.u32 %v2429_v9, %v2426_v57  ;;  %v6825_v4 = vld [vmem:[%s7014_s27 + $0xb8] sm:$0xf] }
 0x145   : > { %v2407_v27 = vrot.slane %v2406_v52, 4 }
 0x146   : > { %6331 = vmatmul.mubr.msk.bf16.gmra.mrb[4].mxu0 %vm713_vm3, %v5778_v48  ;;  %v2431_v18 = vrot.slane %v2430_v36, 4 }
 0x147   : > { %6147 = vmatmul.mubr.msk.bf16.gmra.mrb[20].mxu1 %vm713_vm3, %v6759_v30  ;;  %6334 = vmatprep.mubr.msk.bf16.mxu0 %vm713_vm3, %v5779_v35  ;;  %v2364_v35 = vsel %vm7041_vm2, %v2359_v2, %v2363_v62  ;;  %v6819_v30 = vld [vmem:[%s7014_s27 + $0x94] sm:$0xf]  ;;  %v2457_v62 = vshll.u32 %v6820_v1, 16  ;;  %v2453_v2 = vrot.slane %v2451_v39, 5  ;;  %v6824_v39 = vld [vmem:[%s7014_s27 + $0xac] sm:$0xf]  ;;  %v2412_v1 = vsel %vm7041_vm2, %v2407_v27, %v8649_v23 }
 0x148   : > { %6150 = vmatprep.mubr.msk.bf16.mxu1 %vm713_vm3, %v6760_v0  ;;  %v2433_v48 = vshll.u32 %v6819_v30, 16  ;;  %v2437_v28 = vshrl.u32 %v6819_v30, 16  ;;  %v2448_v0 = vshrl.u32 %v5435_v42, 16  ;;  %v6822_v42 = vld [vmem:[%s7014_s27 + $0x98] sm:$0x1]  ;;  %v2467_v30 = vshll.u32 %v6823_v58, 16 }
 0x149   : > { %v8672_v13 = vrot.slane %v2457_v62, 5  ;;  %v2485_v52 = vshrl.u32 %v6824_v39, 16  ;;  %v2533_v58 = vshrl.u32 %v6827_v16, 16 }
 0x14a   : > { %v8669_v51 = vrot.slane %v2433_v48, 5  ;;  %v2439_v24 = vrot.slane %v2437_v28, 4  ;;  %v2450_v12 = vrot.slane %v2448_v0, 4  ;;  %v2472_v48 = vshrl.u32 %v5438_v3, 16  ;;  %v5441_v28 = vld [vmem:[%s7014_s27 + $0xb4] sm:$0xf] }
 0x14b   : > { %v2475_v0 = vshll.u32 %v5438_v3, 16  ;;  %v2496_v62 = vshrl.u32 %v5441_v28, 16  ;;  %v2469_v6 = vrot.slane %v2467_v30, 5  ;;  %v2487_v23 = vrot.slane %v2485_v52, 4  ;;  %v5444_v3 = vld [vmem:[%s7014_s27 + $0xc0] sm:$0xf] }
 0x14c   : > { %v2440_v47 = vor.u32 %v2439_v24, %v8669_v51  ;;  %v2454_v63 = vor.u32 %v2453_v2, %v2450_v12  ;;  %v2474_v7 = vrot.slane %v2472_v48, 4  ;;  %v6828_v48 = vld [vmem:[%s7014_s27 + $0xbc] sm:$0x1]  ;;  %v2535_v56 = vrot.slane %v2533_v58, 4 }
 0x14d   : > { %v2477_v24 = vrot.slane %v2475_v0, 5 }
 0x14e   : > { %6335 = vmatmul.mubr.msk.bf16.gmra.mrb[8].mxu0 %vm713_vm3, %v5780_v22  ;;  %v2419_v22 = vshll.u32 %v6821_v46, 16  ;;  %v2505_v46 = vshll.u32 %v6825_v4, 16  ;;  %v2441_v57 = vrot.slane %v2440_v47, 4  ;;  %v2455_v9 = vrot.slane %v2454_v63, 4  ;;  %v6826_v47 = vld [vmem:[%s7014_s27 + $0xb0] sm:$0x1] }
 0x14f   : > { %6151 = vmatmul.mubr.msk.bf16.gmra.mrb[24].mxu1 %vm713_vm3, %v6761_v20  ;;  %6338 = vmatprep.mubr.msk.bf16.mxu0 %vm713_vm3, %v5781_v19  ;;  %v5463_v20 = vcombine.low %v2364_v35, %v2374_v41  ;;  %v2463_v19 = vrot.slane %v2461_v43, 4  ;;  %v2481_v41 = vshll.u32 %v6824_v39, 16  ;;  %v2499_v43 = vshll.u32 %v5441_v28, 16 }
 0x150   : > { %6154 = vmatprep.mubr.msk.bf16.mxu1 %vm713_vm3, %v6762_v40  ;;  %v2421_v17 = vrot.slane %v2419_v22, 5  ;;  %v2443_v40 = vshll.u32 %v6822_v42, 16  ;;  %v2509_v22 = vshrl.u32 %v6825_v4, 16  ;;  %v2507_v27 = vrot.slane %v2505_v46, 5 }
 0x151   : > { %v2464_v35 = vor.u32 %v2463_v19, %v8672_v13  ;;  %v2483_v12 = vrot.slane %v2481_v41, 5  ;;  %v2460_v36 = vsel %vm7041_vm2, %v2455_v9, %v8672_v13  ;;  %v2491_v63 = vshll.u32 %v6826_v47, 16 }
 0x152   : > { %v2422_v31 = vsel %vm7041_vm2, %v2417_v54, %v2421_v17  ;;  %v2511_v19 = vrot.slane %v2509_v22, 4  ;;  %v2436_v54 = vsel %vm7041_vm2, %v2431_v18, %v8669_v51  ;;  %v2478_v51 = vor.u32 %v2477_v24, %v2474_v7  ;;  %v6829_v22 = vld [vmem:[%s7014_s27 + $0xc8] sm:$0x1]  ;;  %s175_s27 = sand.u32 1, %s6892_s13  }
 0x153   : > { %v5465_v2 = vcombine.low %v2412_v1, %v2422_v31  ;;  %v2523_v13 = vshll.u32 %v5444_v3, 16  ;;  %v2515_v28 = vshll.u32 %v6828_v48, 16  ;;  %v2493_v52 = vrot.slane %v2491_v63, 5  ;;  %s5181_s5 = sshll.u32 %s175_s27, 8  ;;  %s8877_s15 = scalar_lea.sflag [#allocation3], %s175_s27 }
 0x154   : > { %v2512_v30 = vor.u32 %v2511_v19, %v2507_v27  ;;  %v2479_v39 = vrot.slane %v2478_v51, 4  ;;  %v2536_v46 = vor.u32 %v2535_v56, %v2531_v45  ;;  %s8770_s8 = scalar_lea.vmem [#allocation2], %s5181_s5 }
 0x155   : > { %v2525_v31 = vrot.slane %v2523_v13, 5  ;;  %s5093_s10 = sshll.u32 %s8770_s8, 4  ;;  %s8866_s10 = int_to_ptr.vmem [resolvable:$true] %s5093_s10 }
 0x156   : > { %6339 = vmatmul.mubr.msk.bf16.gmra.mrb[12].mxu0 %vm713_vm3, %v5782_v8  ;;  %v2445_v8 = vrot.slane %v2443_v40, 5  ;;  %v2488_v40 = vor.u32 %v2487_v23, %v2483_v12  ;;  %v2513_v18 = vrot.slane %v2512_v30, 4  ;;  %v2537_v7 = vrot.slane %v2536_v46, 4  ;;  %s6830_s21 = scalar_lea.vmem %s8866_s10, 4096  ;;  %p6837_p1 = scmp.lt.s32.totalorder %s8866_s10, %s6835_s26 }
 0x157   : > { %6155 = vmatmul.mubr.msk.bf16.gmra.mrb[28].mxu1 %vm713_vm3, %v6763_v11  ;;  %6342 = vmatprep.mubr.msk.bf16.mxu0 %vm713_vm3, %v5783_v15  ;;  %v2465_v15 = vrot.slane %v2464_v35, 4  ;;  %v2498_v11 = vrot.slane %v2496_v62, 4  ;;  %v2484_v62 = vsel %vm7041_vm2, %v2479_v39, %v2483_v12  ;;  %p6831_p12 = scmp.ne.s32.totalorder %s8866_s10, %s6830_s21  ;;  %p6838_p2 = scmp.lt.s32.totalorder %s6836_s28, %s6830_s21 }
 0x158   : > { %6182 = vmatprep.mubr.msk.bf16.mxu1 %vm713_vm3, %v5463_v20  ;;  %v2501_v20 = vrot.slane %v2499_v43, 5  ;;  %v2446_v17 = vsel %vm7041_vm2, %v2441_v57, %v2445_v8  ;;  %v2489_v41 = vrot.slane %v2488_v40, 4  ;;  %v2517_v8 = vrot.slane %v2515_v28, 5 }
 0x159   : > { %v2470_v42 = vsel %vm7041_vm2, %v2465_v15, %v2469_v6  ;;  %v5466_v35 = vcombine.low %v2436_v54, %v2446_v17  ;;  %v2539_v57 = vshll.u32 %v6829_v22, 16  ;;  %p6832_p13 = pnand %p6831_p12, %p6973_p4  ;;  %p6839_p3 = por %p6838_p2, %p6837_p1 }
 0x15a   : > { %v5467_v0 = vcombine.low %v2460_v36, %v2470_v42  ;;  %v2494_v43 = vsel %vm7041_vm2, %v2489_v41, %v2493_v52  ;;  %v2518_v14 = vsel %vm7041_vm2, %v2513_v18, %v2517_v8 }
 0x15b   : > { %v2541_v21 = vrot.slane %v2539_v57, 5  ;;  %p6833_p0 = pneg %p6832_p13 }
 0x15d   : > { %p6840_p5 = pnand %p6839_p3, %p6833_p0 }
 0x15e   : > { %6343 = vmatmul.mubr.msk.bf16.gmra.mrb[16].mxu0 %vm713_vm3, %v5784_v60  ;;  %v2502_v60 = vor.u32 %v2501_v20, %v2498_v11 }
 0x15f   : > { %6183 = vmatmul.mubr.msk.bf16.vlgmr.msra.gmra.mrb[16].mxu1 %vm713_vm3, %v8472_v55  ;;  %6346 = vmatprep.mubr.msk.bf16.mxu0 %vm713_vm3, %v5785_v25  ;;  %v2520_v55 = vshrl.u32 %v5444_v3, 16 }
 0x160   : > { %6186 = vmatprep.mubr.msk.bf16.mxu1 %vm713_vm3, %v5465_v2  ;;  %v2503_v25 = vrot.slane %v2502_v60, 4 }
 0x161   : > { %v2522_v1 = vrot.slane %v2520_v55, 4 }
 0x162   : > { %v2508_v37 = vsel %vm7041_vm2, %v2503_v25, %v2507_v27 }
 0x163   : > { %v2526_v4 = vor.u32 %v2525_v31, %v2522_v1  ;;  %v5469_v9 = vcombine.low %v2508_v37, %v2518_v14 }
 0x165   : > { %v2527_v6 = vrot.slane %v2526_v4, 4 }
 0x166   : > { %6347 = vmatmul.mubr.msk.bf16.gmra.mrb[20].mxu0 %vm713_vm3, %v5786_v10  ;;  %v5468_v10 = vcombine.low %v2484_v62, %v2494_v43 }
 0x167   : > { %6187 = vmatmul.mubr.msk.bf16.gmra.mrb[20].mxu1 %vm713_vm3, %v5466_v35  ;;  %6350 = vmatprep.mubr.msk.bf16.mxu0 %vm713_vm3, %v5787_v26  ;;  %v2532_v33 = vsel %vm7041_vm2, %v2527_v6, %v2531_v45  ;;  %v2542_v26 = vsel %vm7041_vm2, %v2537_v7, %v2541_v21 }
 0x168   : > { %6190 = vmatprep.mubr.msk.bf16.mxu1 %vm713_vm3, %v5467_v0  ;;  %v5470_v15 = vcombine.low %v2532_v33, %v2542_v26 }
 0x16e   : > { %6351 = vmatmul.mubr.msk.bf16.gmra.mrb[24].mxu0 %vm713_vm3, %v5788_v49 }
 0x16f   : > { %6191 = vmatmul.mubr.msk.bf16.gmra.mrb[24].mxu1 %vm713_vm3, %v5468_v10  ;;  %6354 = vmatprep.mubr.msk.bf16.mxu0 %vm713_vm3, %v5789_v50 }
 0x170   : > { %6194 = vmatprep.mubr.msk.bf16.mxu1 %vm713_vm3, %v5469_v9 }
 0x176   : > { %6355 = vmatmul.mubr.msk.bf16.gmra.mrb[28].mxu0 %vm713_vm3, %v5790_v5  ;;  %v8766_v5 = vld [vmem:[%s8925_s2] ss:$0 sm:$0xff] }
 0x177   : > { %6195 = vmatmul.mubr.msk.bf16.gmra.mrb[28].mxu1 %vm713_vm3, %v5470_v15 }
 0x1f2   : > { %v6128_v53 = vpop.f32.mrb[0].mxu1 }
 0x1f3   : > { %v1952_v59 = vpop.f32.mrb[1].mxu1 }
 0x1f4   : > { %v6129_v49 = vpop.f32.mrb[2].mxu1 }
 0x1f5   : > { %v1955_v32 = vpop.f32.mrb[3].mxu1 }
 0x1fa   : > { %v6132_v38 = vpop.f32.mrb[4].mxu1 }
 0x1fb   : > { %v1968_v50 = vpop.f32.mrb[5].mxu1 }
 0x1fc   : > { %v6133_v24 = vpop.f32.mrb[6].mxu1 }
 0x1fd   : > { %v1971_v12 = vpop.f32.mrb[7].mxu1 }
 0x202   : > { %v6136_v29 = vpop.f32.mrb[8].mxu1 }
 0x203   : > { %v1984_v23 = vpop.f32.mrb[9].mxu1 }
 0x204   : > { %v6137_v2 = vpop.f32.mrb[10].mxu1 }
 0x205   : > { %v1987_v11 = vpop.f32.mrb[11].mxu1 }
 0x20a   : > { %v6140_v20 = vpop.f32.mrb[12].mxu1 }
 0x20b   : > { %v2000_v27 = vpop.f32.mrb[13].mxu1 }
 0x20c   : > { %v6141_v19 = vpop.f32.mrb[14].mxu1 }
 0x20d   : > { %v2003_v61 = vpop.f32.mrb[15].mxu1 }
 0x211   : > { %v6328_v34 = vpop.f32.mrb[0].mxu0 }
 0x212   : > { %v6366_v3 = vadd.f32 %v6328_v34, %v6128_v53  ;;  %v4846_v54 = vpop.f32.mrb[1].mxu0 }
 0x213   : > { %v6367_v17 = vadd.f32 %v4846_v54, %v1952_v59  ;;  %v6329_v36 = vpop.f32.mrb[2].mxu0 }
 0x214   : > { %v5014_v42 = vadd.f32 %v6366_v3, %v8766_v5  ;;  %v6368_v51 = vadd.f32 %v6329_v36, %v6129_v49  ;;  %v4849_v40 = vpop.f32.mrb[3].mxu0 }
 0x215   : > { %v5012_v47 = vadd.f32 %v6367_v17, %v8766_v5  ;;  %v6369_v63 = vadd.f32 %v4849_v40, %v1955_v32 }
 0x216   : > { %5046 = vst.msk [vmem:[%s8770_s8 + $0x10] sm:$0xff] %vm713_vm3, %v5014_v42  ;;  %v5015_v55 = vadd.f32 %v6368_v51, %v8766_v5 }
 0x217   : > { %5044 = vst.msk [vmem:[%s8770_s8] sm:$0xff] %vm713_vm3, %v5012_v47  ;;  %v5013_v13 = vadd.f32 %v6369_v63, %v8766_v5 }
 0x218   : > { %5047 = vst.msk [vmem:[%s8770_s8 + $0x18] sm:$0xff] %vm713_vm3, %v5015_v55 }
 0x219   : > { %5045 = vst.msk [vmem:[%s8770_s8 + $0x8] sm:$0xff] %vm713_vm3, %v5013_v13  ;;  %v6332_v16 = vpop.f32.mrb[4].mxu0 }
 0x21a   : > { %v6370_v44 = vadd.f32 %v6332_v16, %v6132_v38  ;;  %v4862_v58 = vpop.f32.mrb[5].mxu0 }
 0x21b   : > { %v6371_v60 = vadd.f32 %v4862_v58, %v1968_v50  ;;  %v6333_v30 = vpop.f32.mrb[6].mxu0 }
 0x21c   : > { %v5018_v48 = vadd.f32 %v6370_v44, %v8766_v5  ;;  %v6372_v28 = vadd.f32 %v6333_v30, %v6133_v24  ;;  %v4865_v35 = vpop.f32.mrb[7].mxu0 }
 0x21d   : > { %v5016_v0 = vadd.f32 %v6371_v60, %v8766_v5  ;;  %v6373_v39 = vadd.f32 %v4865_v35, %v1971_v12 }
 0x21e   : > { %5050 = vst.msk [vmem:[%s8770_s8 + $0x30] sm:$0xff] %vm713_vm3, %v5018_v48  ;;  %v5019_v41 = vadd.f32 %v6372_v28, %v8766_v5 }
 0x21f   : > { %5048 = vst.msk [vmem:[%s8770_s8 + $0x20] sm:$0xff] %vm713_vm3, %v5016_v0  ;;  %v5017_v52 = vadd.f32 %v6373_v39, %v8766_v5 }
 0x220   : > { %5051 = vst.msk [vmem:[%s8770_s8 + $0x38] sm:$0xff] %vm713_vm3, %v5019_v41 }
 0x221   : > { %5049 = vst.msk [vmem:[%s8770_s8 + $0x28] sm:$0xff] %vm713_vm3, %v5017_v52  ;;  %v6336_v1 = vpop.f32.mrb[8].mxu0 }
 0x222   : > { %v6374_v31 = vadd.f32 %v6336_v1, %v6136_v29  ;;  %v4878_v45 = vpop.f32.mrb[9].mxu0 }
 0x223   : > { %v6375_v56 = vadd.f32 %v4878_v45, %v1984_v23  ;;  %v6337_v25 = vpop.f32.mrb[10].mxu0 }
 0x224   : > { %v5022_v18 = vadd.f32 %v6374_v31, %v8766_v5  ;;  %v6376_v8 = vadd.f32 %v6337_v25, %v6137_v2  ;;  %v4881_v62 = vpop.f32.mrb[11].mxu0 }
 0x225   : > { %v5020_v43 = vadd.f32 %v6375_v56, %v8766_v5  ;;  %v6377_v4 = vadd.f32 %v4881_v62, %v1987_v11 }
 0x226   : > { %5054 = vst.msk [vmem:[%s8770_s8 + $0x50] sm:$0xff] %vm713_vm3, %v5022_v18  ;;  %v5023_v46 = vadd.f32 %v6376_v8, %v8766_v5 }
 0x227   : > { %5052 = vst.msk [vmem:[%s8770_s8 + $0x40] sm:$0xff] %vm713_vm3, %v5020_v43  ;;  %v5021_v22 = vadd.f32 %v6377_v4, %v8766_v5 }
 0x228   : > { %5055 = vst.msk [vmem:[%s8770_s8 + $0x58] sm:$0xff] %vm713_vm3, %v5023_v46 }
 0x229   : > { %5053 = vst.msk [vmem:[%s8770_s8 + $0x48] sm:$0xff] %vm713_vm3, %v5021_v22  ;;  %v6340_v57 = vpop.f32.mrb[12].mxu0 }
 0x22a   : > { %v6378_v37 = vadd.f32 %v6340_v57, %v6140_v20  ;;  %v4894_v14 = vpop.f32.mrb[13].mxu0 }
 0x22b   : > { %v6379_v10 = vadd.f32 %v4894_v14, %v2000_v27  ;;  %v6341_v9 = vpop.f32.mrb[14].mxu0 }
 0x22c   : > { %v5026_v6 = vadd.f32 %v6378_v37, %v8766_v5  ;;  %v6380_v7 = vadd.f32 %v6341_v9, %v6141_v19  ;;  %v4897_v21 = vpop.f32.mrb[15].mxu0 }
 0x22d   : > { %v5024_v33 = vadd.f32 %v6379_v10, %v8766_v5  ;;  %v6381_v26 = vadd.f32 %v4897_v21, %v2003_v61 }
 0x22e   : > { %5058 = vst.msk [vmem:[%s8770_s8 + $0x70] sm:$0xff] %vm713_vm3, %v5026_v6  ;;  %v5027_v15 = vadd.f32 %v6380_v7, %v8766_v5 }
 0x22f   : > { %5056 = vst.msk [vmem:[%s8770_s8 + $0x60] sm:$0xff] %vm713_vm3, %v5024_v33  ;;  %v5025_v53 = vadd.f32 %v6381_v26, %v8766_v5 }
 0x230   : > { %5059 = vst.msk [vmem:[%s8770_s8 + $0x78] sm:$0xff] %vm713_vm3, %v5027_v15 }
 0x231   : > { %5057 = vst.msk [vmem:[%s8770_s8 + $0x68] sm:$0xff] %vm713_vm3, %v5025_v53  ;;  %v6344_v49 = vpop.f32.mrb[16].mxu0 }
 0x232   : > { %v6184_v59 = vpop.f32.mrb[16].mxu1  ;;  %v4910_v50 = vpop.f32.mrb[17].mxu0 }
 0x233   : > { %v6382_v32 = vadd.f32 %v6344_v49, %v6184_v59  ;;  %v2770_v38 = vpop.f32.mrb[17].mxu1  ;;  %v6345_v29 = vpop.f32.mrb[18].mxu0 }
 0x234   : > { %v6383_v24 = vadd.f32 %v4910_v50, %v2770_v38  ;;  %v6185_v12 = vpop.f32.mrb[18].mxu1  ;;  %v4913_v20 = vpop.f32.mrb[19].mxu0 }
 0x235   : > { %v5030_v23 = vadd.f32 %v6382_v32, %v8766_v5  ;;  %v6384_v2 = vadd.f32 %v6345_v29, %v6185_v12  ;;  %v2773_v11 = vpop.f32.mrb[19].mxu1 }
 0x236   : > { %v5028_v27 = vadd.f32 %v6383_v24, %v8766_v5  ;;  %v6385_v19 = vadd.f32 %v4913_v20, %v2773_v11 }
 0x237   : > { %5062 = vst.msk [vmem:[%s8770_s8 + $0x90] sm:$0xff] %vm713_vm3, %v5030_v23  ;;  %v5031_v61 = vadd.f32 %v6384_v2, %v8766_v5 }
 0x238   : > { %5060 = vst.msk [vmem:[%s8770_s8 + $0x80] sm:$0xff] %vm713_vm3, %v5028_v27  ;;  %v5029_v34 = vadd.f32 %v6385_v19, %v8766_v5 }
 0x239   : > { %5063 = vst.msk [vmem:[%s8770_s8 + $0x98] sm:$0xff] %vm713_vm3, %v5031_v61  ;;  %v6348_v54 = vpop.f32.mrb[20].mxu0 }
 0x23a   : > { %5061 = vst.msk [vmem:[%s8770_s8 + $0x88] sm:$0xff] %vm713_vm3, %v5029_v34  ;;  %v6188_v3 = vpop.f32.mrb[20].mxu1  ;;  %v4926_v42 = vpop.f32.mrb[21].mxu0 }
 0x23b   : > { %v6386_v17 = vadd.f32 %v6348_v54, %v6188_v3  ;;  %v2786_v36 = vpop.f32.mrb[21].mxu1  ;;  %v6349_v47 = vpop.f32.mrb[22].mxu0 }
 0x23c   : > { %v6387_v51 = vadd.f32 %v4926_v42, %v2786_v36  ;;  %v6189_v40 = vpop.f32.mrb[22].mxu1  ;;  %v4929_v16 = vpop.f32.mrb[23].mxu0 }
 0x23d   : > { %v5034_v63 = vadd.f32 %v6386_v17, %v8766_v5  ;;  %v6388_v55 = vadd.f32 %v6349_v47, %v6189_v40  ;;  %v2789_v13 = vpop.f32.mrb[23].mxu1 }
 0x23e   : > { %v5032_v44 = vadd.f32 %v6387_v51, %v8766_v5  ;;  %v6389_v58 = vadd.f32 %v4929_v16, %v2789_v13 }
 0x23f   : > { %5066 = vst.msk [vmem:[%s8770_s8 + $0xb0] sm:$0xff] %vm713_vm3, %v5034_v63  ;;  %v5035_v60 = vadd.f32 %v6388_v55, %v8766_v5 }
 0x240   : > { %5064 = vst.msk [vmem:[%s8770_s8 + $0xa0] sm:$0xff] %vm713_vm3, %v5032_v44  ;;  %v5033_v30 = vadd.f32 %v6389_v58, %v8766_v5 }
 0x241   : > { %5067 = vst.msk [vmem:[%s8770_s8 + $0xb8] sm:$0xff] %vm713_vm3, %v5035_v60  ;;  %v6352_v28 = vpop.f32.mrb[24].mxu0 }
 0x242   : > { %5065 = vst.msk [vmem:[%s8770_s8 + $0xa8] sm:$0xff] %vm713_vm3, %v5033_v30  ;;  %v6192_v48 = vpop.f32.mrb[24].mxu1  ;;  %v4942_v39 = vpop.f32.mrb[25].mxu0 }
 0x243   : > { %v6390_v35 = vadd.f32 %v6352_v28, %v6192_v48  ;;  %v2802_v0 = vpop.f32.mrb[25].mxu1  ;;  %v6353_v1 = vpop.f32.mrb[26].mxu0 }
 0x244   : > { %v6391_v41 = vadd.f32 %v4942_v39, %v2802_v0  ;;  %v6193_v52 = vpop.f32.mrb[26].mxu1  ;;  %v4945_v25 = vpop.f32.mrb[27].mxu0 }
 0x245   : > { %v5038_v31 = vadd.f32 %v6390_v35, %v8766_v5  ;;  %v6392_v45 = vadd.f32 %v6353_v1, %v6193_v52  ;;  %v2805_v56 = vpop.f32.mrb[27].mxu1 }
 0x246   : > { %v5036_v18 = vadd.f32 %v6391_v41, %v8766_v5  ;;  %v6393_v8 = vadd.f32 %v4945_v25, %v2805_v56 }
 0x247   : > { %5070 = vst.msk [vmem:[%s8770_s8 + $0xd0] sm:$0xff] %vm713_vm3, %v5038_v31  ;;  %v5039_v62 = vadd.f32 %v6392_v45, %v8766_v5 }
 0x248   : > { %5068 = vst.msk [vmem:[%s8770_s8 + $0xc0] sm:$0xff] %vm713_vm3, %v5036_v18  ;;  %v5037_v43 = vadd.f32 %v6393_v8, %v8766_v5 }
 0x249   : > { %5071 = vst.msk [vmem:[%s8770_s8 + $0xd8] sm:$0xff] %vm713_vm3, %v5039_v62  ;;  %v6356_v46 = vpop.f32.mrb[28].mxu0 }
 0x24a   : > { %5069 = vst.msk [vmem:[%s8770_s8 + $0xc8] sm:$0xff] %vm713_vm3, %v5037_v43  ;;  %v6196_v4 = vpop.f32.mrb[28].mxu1  ;;  %v4958_v37 = vpop.f32.mrb[29].mxu0 }
 0x24b   : > { %v6394_v22 = vadd.f32 %v6356_v46, %v6196_v4  ;;  %v2818_v57 = vpop.f32.mrb[29].mxu1  ;;  %v6357_v9 = vpop.f32.mrb[30].mxu0 }
 0x24c   : > { %v6395_v14 = vadd.f32 %v4958_v37, %v2818_v57  ;;  %v6197_v10 = vpop.f32.mrb[30].mxu1  ;;  %v4961_v33 = vpop.f32.mrb[31].mxu0 }
 0x24d   : > { %v5042_v6 = vadd.f32 %v6394_v22, %v8766_v5  ;;  %v6396_v7 = vadd.f32 %v6357_v9, %v6197_v10  ;;  %v2821_v21 = vpop.f32.mrb[31].mxu1 }
 0x24e   : > { %v5040_v26 = vadd.f32 %v6395_v14, %v8766_v5  ;;  %v6397_v15 = vadd.f32 %v4961_v33, %v2821_v21 }
 0x24f   : > { %5074 = vst.msk [vmem:[%s8770_s8 + $0xf0] sm:$0xff] %vm713_vm3, %v5042_v6  ;;  %v5043_v53 = vadd.f32 %v6396_v7, %v8766_v5 }
 0x250   : > { %5072 = vst.msk [vmem:[%s8770_s8 + $0xe0] sm:$0xff] %vm713_vm3, %v5040_v26  ;;  %v5041_v59 = vadd.f32 %v6397_v15, %v8766_v5 }
 0x251   : > { %5075 = vst.msk [vmem:[%s8770_s8 + $0xf8] sm:$0xff] %vm713_vm3, %v5043_v53 }
 0x252   : > { %5073 = vst.msk [vmem:[%s8770_s8 + $0xe8] sm:$0xff] %vm713_vm3, %v5041_v59 }
 0x253   : > { %6843 = shalt.err (!%p6840_p5)
}
 0x254   : > { %s6844_s29 = scalar_lea.hbm %s8864_s19, 4096  ;;  %s6848_s27 = scalar_lea.hbm %s8926_s3, 8192 }
 0x255   : > { %p6845_p6 = scmp.ne.s32.totalorder %s8864_s19, %s6844_s29  ;;  %p6849_p10 = scmp.lt.u32.totalorder %s8864_s19, %s8926_s3 }
 0x256   : > { %p6850_p11 = scmp.lt.u32.totalorder %s6848_s27, %s6844_s29  ;;  %p6852_p13 = scmp.lt.u32.totalorder %s6844_s29, %s8864_s19 }
 0x257   : > { %p6846_p7 = pnand %p6845_p6, %p6973_p4 }
 0x258   : > { %p6851_p12 = por %p6850_p11, %p6849_p10 }
 0x259   : > { %p6847_p9 = pneg %p6846_p7 }
 0x25a   : > { %p6853_p0 = por %p6852_p13, %p6851_p12 }
 0x25c   : > { %p6854_p1 = pnand %p6853_p0, %p6847_p9 }
 0x25e   : > { %6857 = shalt.err (!%p6854_p1)
}
 0x25f   : > { %s6911_s7 = smov 128   ;;  %s6912_s8 = smov 8  }
 0x260   : > { %6623 = dma.vmem_to_hbm [thread:$0]  (%p6973_p4), %s8866_s10, 4096, %s8864_s19, %s8877_s15, %s6911_s7, %s6911_s7, %s6912_s8  }
 0x261 PF: > { %p6629_p2 = scmp.ge.s32.totalorder %s6908_s17, 2  ;;  %s5108_s9 = sand.u32 1, %s6888_s12  }
 0x262   : > { %s5109_s11 = scalar_lea.sflag [#allocation3], %s5108_s9 }
 0x263   : > { %p6626_p3 = pnand %p6629_p2, %p6980_p8 }
 0x265   : > { %6883 = dma.done.wait (!%p6626_p3), %s5109_s11, 4096  }
 0x266   : > { %6885 = vsyncadd (!%p6626_p3), %s5109_s11, 4294963200  ;;  %s16_s17 = sadd.s32 1, %s6908_s17   ;;  %s8991_s12 = smov %s6892_s13 }
 0x267   : > { %p13_p5 = scmp.ge.s32.totalorder %s16_s17, 4   ;;  %s8992_s13 = smov %s6896_s14 }
 0x268   : > { %s8993_s14 = smov %s6986_s25  ;;  %s8994_s15 = smov %s6904_s16 }
 0x269   : > { %s8995_s16 = smov %s8997_s20  ;;  %15 = sbr.rel (!%p13_p5) target bundleno = 4 (0x4), region = 78 }
 0x270   :  { %5114 = vsyncpa [#allocation3], 1 }
 0x271   :  { %5116 = vsyncpa [#allocation3 + $0x1], 1 }

</bundles_post_ra>
